<compile_context>
chip_gen: v6e
topology: v6e:2x2x1
jax: 0.10.0
libtpu: 0.0.40
codegen_flags: <defaults>
</compile_context>

<pallas_src>
import functools

import jax
import jax.numpy as jnp
from jax import lax
from jax.experimental import pallas as pl
from jax.experimental.pallas import tpu as pltpu


# ----------------------------- helpers ---------------------------------------

def _make_divisible(v, divisor, min_value=None):
    if min_value is None:
        min_value = divisor
    new_v = max(min_value, int(v + divisor / 2) // divisor * divisor)
    if new_v < 0.9 * v:
        new_v += divisor
    return new_v


def _act(x, act):
    if act == "relu":
        return jnp.maximum(x, 0.0)
    if act == "hswish":
        return x * (jnp.clip(x + 3.0, 0.0, 6.0) * (1.0 / 6.0))
    return x  # "none"


def _mm(x2, w):
    """(M, K) @ (K, N) -> (M, N) in f32.

    For tiny contraction dims the 128x128 (256x256 on v6e/v7x) MXU tile would be
    ~99% padding, so use a fully unrolled VPU broadcast-MAC instead; otherwise use
    the MXU with an f32 accumulator.
    """
    K = x2.shape[1]
    if K <= 16:
        acc = jnp.zeros((x2.shape[0], w.shape[1]), jnp.float32)
        for c in range(K):
            acc = acc + x2[:, c:c + 1] * w[c:c + 1, :]
        return acc
    return jnp.dot(x2, w, preferred_element_type=jnp.float32)


# ----------------------------- fused Pallas kernel ----------------------------

def _make_fused_kernel(*, H, W, Cin, Chid, Cout, k, stride, use_se, expand,
                       identity, act):
    p = (k - 1) // 2
    Ho = (H + 2 * p - k) // stride + 1
    Wo = (W + 2 * p - k) // stride + 1

    def kernel(*refs):
        it = iter(refs)
        x_ref = next(it)
        if expand:
            w1_ref, b1_ref = next(it), next(it)
        wd_ref, bd_ref = next(it), next(it)
        if use_se:
            sw1_ref, sb1_ref, sw2_ref, sb2_ref = (next(it), next(it),
                                                  next(it), next(it))
        w2_ref, b2_ref = next(it), next(it)
        o_ref = next(it)
        hbuf = next(it)          # VMEM scratch: zero-padded hidden activation

        x = x_ref[0]             # (H, W, Cin) f32

        # ---- stage 1: expand 1x1 conv (BN folded) + activation, into padded VMEM.
        # Full zero-fill every step keeps the conv padding border valid on every
        # core (scratch is per-core and persists); interior is overwritten below.
        hbuf[...] = jnp.zeros_like(hbuf)
        if expand:
            h = _act(_mm(x.reshape(H * W, Cin), w1_ref[...]) + b1_ref[...], act)
            hbuf[p:p + H, p:p + W, :] = h.reshape(H, W, Chid)
        else:
            hbuf[p:p + H, p:p + W, :] = x          # dw runs directly on the input

        # ---- stage 2: depthwise kxk conv, stride handled directly (BN folded).
        wd = wd_ref[...]                           # (k*k, Chid)
        acc = jnp.zeros((Ho, Wo, Chid), jnp.float32)
        for dy in range(k):
            for dx in range(k):
                if stride == 1:
                    tap = hbuf[dy:dy + Ho, dx:dx + Wo, :]
                else:
                    # strided window read straight from the padded VMEM scratch
                    tap = hbuf[pl.ds(dy, Ho, stride), pl.ds(dx, Wo, stride), :]
                acc = acc + tap * wd[dy * k + dx]
        d = acc.reshape(Ho * Wo, Chid) + bd_ref[...]
        if not expand:
            d = _act(d, act)                       # no-expand branch: act before SE

        # ---- stage 3: Squeeze-and-Excite, fully fused (pool + 2 tiny FCs + gate).
        if use_se:
            m = jnp.mean(d, axis=0, keepdims=True)             # (1, Chid) avg pool
            z = jnp.maximum(_mm(m, sw1_ref[...]) + sb1_ref[...], 0.0)
            g = _mm(z, sw2_ref[...]) + sb2_ref[...]
            g = jnp.clip(g + 3.0, 0.0, 6.0) * (1.0 / 6.0)      # h_sigmoid gate
            d = d * g
        if expand:
            d = _act(d, act)                       # expand branch: act after SE

        # ---- stage 4: project 1x1 conv (BN folded) + fused residual.
        y = _mm(d, w2_ref[...]) + b2_ref[...]
        y = y.reshape(Ho, Wo, Cout)
        if identity:
            y = y + x                              # stride == 1 and Cin == Cout
        o_ref[0] = y.astype(o_ref.dtype)

    return kernel


# ----------------------------- forward wrapper --------------------------------

def inverted_residual_forward(x_nchw, kparams, *, inp, hidden_dim, oup,
                              kernel_size, stride, use_se, use_hs):
    """InvertedResidual forward (NCHW in/out). `kparams` = fold_bn_params(...)."""
    B, C, H, W = x_nchw.shape
    assert C == inp
    k = kernel_size
    p = (k - 1) // 2
    Ho = (H + 2 * p - k) // stride + 1
    Wo = (W + 2 * p - k) // stride + 1
    Hp, Wp = H + 2 * p, W + 2 * p
    act = "hswish" if use_hs else "relu"
    expand = inp != hidden_dim
    identity = (stride == 1 and inp == oup)

    # TODO(synk): keep NHWC end-to-end across a full network; transpose kept only to
    # preserve the PyTorch module's NCHW interface.
    x = jnp.transpose(x_nchw, (0, 2, 3, 1)).astype(jnp.float32)

    args = [x]
    in_specs = [pl.BlockSpec((1, H, W, inp), lambda b: (b, 0, 0, 0))]

    def add_param(a):
        n = a.ndim
        args.append(a)
        # full array, same block every grid step (resident weights, no re-DMA)
        in_specs.append(pl.BlockSpec(a.shape, lambda b, n=n: (0,) * n))

    if expand:
        add_param(kparams["pw1_w"]); add_param(kparams["pw1_b"])
    add_param(kparams["dw_w"]); add_param(kparams["dw_b"])
    if use_se:
        add_param(kparams["se_w1"]); add_param(kparams["se_b1"])
        add_param(kparams["se_w2"]); add_param(kparams["se_b2"])
    add_param(kparams["pw2_w"]); add_param(kparams["pw2_b"])

    out_specs = pl.BlockSpec((1, Ho, Wo, oup), lambda b: (b, 0, 0, 0))
    out_shape = jax.ShapeDtypeStruct((B, Ho, Wo, oup), jnp.float32)

    kernel = _make_fused_kernel(H=H, W=W, Cin=inp, Chid=hidden_dim, Cout=oup,
                                k=k, stride=stride, use_se=use_se, expand=expand,
                                identity=identity, act=act)

    # ---- VMEM budget: one image per grid step, sized against v7x's 64 MiB VMEM.
    itemsize = 4
    w_bytes = sum(int(a.size) * itemsize for a in args[1:])
    block_bytes = (H * W * inp + Ho * Wo * oup) * itemsize
    scratch_bytes = Hp * Wp * hidden_dim * itemsize
    live_bytes = (H * W + 2 * Ho * Wo) * hidden_dim * itemsize
    est = 2 * block_bytes + 2 * w_bytes + scratch_bytes + live_bytes
    vmem_limit = int(min(48 * 1024 * 1024, max(16 * 1024 * 1024, 4 * est)))
    assert est <= vmem_limit, "per-step working set too large; add spatial tiling"

    cr = kparams["se_w1"].shape[1] if use_se else 0
    flops_b = 2 * k * k * Ho * Wo * hidden_dim + 2 * Ho * Wo * hidden_dim * oup
    if expand:
        flops_b += 2 * H * W * inp * hidden_dim
    if use_se:
        flops_b += 4 * hidden_dim * cr + 2 * Ho * Wo * hidden_dim
    if identity:
        flops_b += Ho * Wo * oup
    cost = pl.CostEstimate(flops=B * flops_b, transcendentals=0,
                           bytes_accessed=B * block_bytes + w_bytes)

    y = pl.pallas_call(
        kernel,
        out_shape=out_shape,
        grid_spec=pltpu.PrefetchScalarGridSpec(
            num_scalar_prefetch=0,
            grid=(B,),
            in_specs=in_specs,
            out_specs=out_specs,
            scratch_shapes=[pltpu.VMEM((Hp, Wp, hidden_dim), jnp.float32)],
        ),
        compiler_params=pltpu.CompilerParams(
            dimension_semantics=("parallel",),   # batch axis -> megacore sharding
            vmem_limit_bytes=vmem_limit,
        ),
        cost_estimate=cost,
    )(*args)

    return jnp.transpose(y, (0, 3, 1, 2))        # NHWC -> NCHW


# ----------------------------- parameters -------------------------------------

def init_params(key, inp, hidden_dim, oup, kernel_size, use_se):
    ks = jax.random.split(key, 10)

    def bn_fold(kk, c):
        kg, kb, km, kv = jax.random.split(kk, 4)
        gamma = 1.0 + 0.1 * jax.random.normal(kg, (c,), jnp.float32)
        beta = 0.1 * jax.random.normal(kb, (c,), jnp.float32)
        mean = 0.1 * jax.random.normal(km, (c,), jnp.float32)
        var = jnp.abs(jax.random.normal(kv, (c,), jnp.float32)) + 0.5
        scale = gamma / jnp.sqrt(var + 1e-5)
        bias = beta - mean * scale
        return scale.reshape(1, c), bias.reshape(1, c)

    p = {}
    if inp != hidden_dim:
        p["pw1_w"] = 0.1 * jax.random.normal(ks[0], (inp, hidden_dim), jnp.float32)
        p["pw1_s"], p["pw1_b"] = bn_fold(ks[1], hidden_dim)
    p["dw_w"] = 0.1 * jax.random.normal(
        ks[2], (kernel_size * kernel_size, hidden_dim), jnp.float32)
    p["dw_s"], p["dw_b"] = bn_fold(ks[3], hidden_dim)
    if use_se:
        cr = _make_divisible(hidden_dim // 4, 8)
        p["se_w1"] = 0.1 * jax.random.normal(ks[4], (hidden_dim, cr), jnp.float32)
        p["se_b1"] = 0.1 * jax.random.normal(ks[5], (1, cr), jnp.float32)
        p["se_w2"] = 0.1 * jax.random.normal(ks[6], (cr, hidden_dim), jnp.float32)
        p["se_b2"] = 0.1 * jax.random.normal(ks[7], (1, hidden_dim), jnp.float32)
    p["pw2_w"] = 0.1 * jax.random.normal(ks[8], (hidden_dim, oup), jnp.float32)
    p["pw2_s"], p["pw2_b"] = bn_fold(ks[9], oup)
    return p


def fold_bn_params(p):
    """Fold inference-mode BN scales into conv weights once, at init time."""
    kp = {}
    if "pw1_w" in p:
        kp["pw1_w"] = p["pw1_w"] * p["pw1_s"]
        kp["pw1_b"] = p["pw1_b"]
    kp["dw_w"] = p["dw_w"] * p["dw_s"]
    kp["dw_b"] = p["dw_b"]
    for name in ("se_w1", "se_b1", "se_w2", "se_b2"):
        if name in p:
            kp[name] = p[name]
    kp["pw2_w"] = p["pw2_w"] * p["pw2_s"]
    kp["pw2_b"] = p["pw2_b"]
    return kp


# ----------------------------- pure-JAX reference ------------------------------

def reference_forward(x_nchw, params, cfg):
    inp, hidden, oup, k, stride, use_se, use_hs = cfg
    p = (k - 1) // 2
    act = (lambda v: v * jnp.clip(v + 3.0, 0.0, 6.0) / 6.0) if use_hs \
        else (lambda v: jnp.maximum(v, 0.0))
    x = x_nchw.astype(jnp.float32)

    def pw(h, w, s, b):
        wk = jnp.transpose(w, (1, 0))[:, :, None, None]
        y = lax.conv_general_dilated(h, wk, (1, 1), "VALID",
                                     dimension_numbers=("NCHW", "OIHW", "NCHW"))
        return y * s[0][None, :, None, None] + b[0][None, :, None, None]

    def dw(h, w, s, b):
        C = h.shape[1]
        wk = jnp.transpose(w.reshape(k, k, C), (2, 0, 1))[:, None, :, :]
        y = lax.conv_general_dilated(h, wk, (stride, stride), [(p, p), (p, p)],
                                     dimension_numbers=("NCHW", "OIHW", "NCHW"),
                                     feature_group_count=C)
        return y * s[0][None, :, None, None] + b[0][None, :, None, None]

    def se(h):
        y = jnp.mean(h, axis=(2, 3))
        z = jnp.maximum(y @ params["se_w1"] + params["se_b1"][0], 0.0)
        z = z @ params["se_w2"] + params["se_b2"][0]
        z = jnp.clip(z + 3.0, 0.0, 6.0) / 6.0
        return h * z[:, :, None, None]

    identity = (stride == 1 and inp == oup)
    if inp == hidden:
        h = act(dw(x, params["dw_w"], params["dw_s"], params["dw_b"]))
        if use_se:
            h = se(h)
        y = pw(h, params["pw2_w"], params["pw2_s"], params["pw2_b"])
    else:
        h = act(pw(x, params["pw1_w"], params["pw1_s"], params["pw1_b"]))
        h = dw(h, params["dw_w"], params["dw_s"], params["dw_b"])
        if use_se:
            h = se(h)
        h = act(h)
        y = pw(h, params["pw2_w"], params["pw2_s"], params["pw2_b"])
    return x + y if identity else y


# ----------------------------- main --------------------------------------------

if __name__ == "__main__":
    B, H, W = 2, 16, 16
    configs = [
        # (inp, hidden_dim, oup, kernel_size, stride, use_se, use_hs)
        (8, 24, 8, 3, 1, True, True),      # expand + SE + h-swish, identity branch
        (16, 16, 24, 3, 1, False, False),  # no-expand (inp == hidden_dim), ReLU
        (8, 32, 16, 5, 2, True, True),     # expand, 5x5, stride 2 (strided dw in-kernel)
    ]
    key = jax.random.PRNGKey(0)
    for i, (inp, hid, oup, k, s, use_se, use_hs) in enumerate(configs):
        key, kx, kp = jax.random.split(key, 3)
        x = jax.random.normal(kx, (B, inp, H, W), jnp.float32)   # NCHW like PyTorch
        params = init_params(kp, inp, hid, oup, k, use_se)
        kparams = fold_bn_params(params)

        fwd = jax.jit(functools.partial(
            inverted_residual_forward, inp=inp, hidden_dim=hid, oup=oup,
            kernel_size=k, stride=s, use_se=use_se, use_hs=use_hs))
        out = jax.block_until_ready(fwd(x, kparams))

        ref = reference_forward(x, params, (inp, hid, oup, k, s, use_se, use_hs))
        Ho = (H + (k - 1) - k) // s + 1
        assert out.shape == (B, oup, Ho, Ho), (i, out.shape)
        max_err = float(jnp.max(jnp.abs(out - ref)))
        assert jnp.allclose(out, ref, atol=1e-4, rtol=1e-4), (i, max_err)

    print("KERNEL_OK")
</pallas_src>

<mosaic_0001>
module attributes {stable_mosaic.version = 11 : i64} {
  func.func @kernel(%arg0: i32, %arg1: memref<1x16x16x8xf32, #tpu.memory_space<vmem>>, %arg2: memref<8x24xf32, #tpu.memory_space<vmem>>, %arg3: memref<1x24xf32, #tpu.memory_space<vmem>>, %arg4: memref<9x24xf32, #tpu.memory_space<vmem>>, %arg5: memref<1x24xf32, #tpu.memory_space<vmem>>, %arg6: memref<24x8xf32, #tpu.memory_space<vmem>>, %arg7: memref<1x8xf32, #tpu.memory_space<vmem>>, %arg8: memref<8x24xf32, #tpu.memory_space<vmem>>, %arg9: memref<1x24xf32, #tpu.memory_space<vmem>>, %arg10: memref<24x8xf32, #tpu.memory_space<vmem>>, %arg11: memref<1x8xf32, #tpu.memory_space<vmem>>, %arg12: memref<1x16x16x8xf32, #tpu.memory_space<vmem>>, %arg13: memref<18x18x24xf32, #tpu.memory_space<vmem>>) attributes {dimension_semantics = [#tpu.dimension_semantics<parallel>], iteration_bounds = array<i64: 2>, scalar_prefetch = 0 : i64, scratch_operands = 1 : i64, tpu.core_type = #tpu.core_type<tc>, window_params = [{transform_indices = @transform_0, window_bounds = array<i64: 1, 16, 16, 8>}, {pipeline_mode = #tpu.pipeline_mode<synchronous>, transform_indices = @transform_1, window_bounds = array<i64: 8, 24>}, {pipeline_mode = #tpu.pipeline_mode<synchronous>, transform_indices = @transform_2, window_bounds = array<i64: 1, 24>}, {pipeline_mode = #tpu.pipeline_mode<synchronous>, transform_indices = @transform_3, window_bounds = array<i64: 9, 24>}, {pipeline_mode = #tpu.pipeline_mode<synchronous>, transform_indices = @transform_4, window_bounds = array<i64: 1, 24>}, {pipeline_mode = #tpu.pipeline_mode<synchronous>, transform_indices = @transform_5, window_bounds = array<i64: 24, 8>}, {pipeline_mode = #tpu.pipeline_mode<synchronous>, transform_indices = @transform_6, window_bounds = array<i64: 1, 8>}, {pipeline_mode = #tpu.pipeline_mode<synchronous>, transform_indices = @transform_7, window_bounds = array<i64: 8, 24>}, {pipeline_mode = #tpu.pipeline_mode<synchronous>, transform_indices = @transform_8, window_bounds = array<i64: 1, 24>}, {pipeline_mode = #tpu.pipeline_mode<synchronous>, transform_indices = @transform_9, window_bounds = array<i64: 24, 8>}, {pipeline_mode = #tpu.pipeline_mode<synchronous>, transform_indices = @transform_10, window_bounds = array<i64: 1, 8>}, {transform_indices = @transform_11, window_bounds = array<i64: 1, 16, 16, 8>}]} {
    %c0 = arith.constant 0 : index
    %c0_0 = arith.constant 0 : index
    %c0_1 = arith.constant 0 : index
    %c0_2 = arith.constant 0 : index
    %0 = vector.load %arg1[%c0, %c0_0, %c0_1, %c0_2] : memref<1x16x16x8xf32, #tpu.memory_space<vmem>>, vector<1x16x16x8xf32>
    %1 = vector.shape_cast %0 : vector<1x16x16x8xf32> to vector<16x16x8xf32>
    %cst = arith.constant 0.000000e+00 : f32
    %2 = vector.broadcast %cst : f32 to vector<18x18x24xf32>
    %c0_3 = arith.constant 0 : index
    %c0_4 = arith.constant 0 : index
    %c0_5 = arith.constant 0 : index
    %3 = vector.load %arg13[%c0_3, %c0_4, %c0_5] : memref<18x18x24xf32, #tpu.memory_space<vmem>>, vector<18x18x24xf32>
    tpu.vector_store %arg13[%c0_3, %c0_4, %c0_5], %2 {strides = array<i32>} : memref<18x18x24xf32, #tpu.memory_space<vmem>>, vector<18x18x24xf32>,
    %4 = vector.shape_cast %1 : vector<16x16x8xf32> to vector<256x8xf32>
    %c0_6 = arith.constant 0 : index
    %c0_7 = arith.constant 0 : index
    %5 = vector.load %arg2[%c0_6, %c0_7] : memref<8x24xf32, #tpu.memory_space<vmem>>, vector<8x24xf32>
    %cst_8 = arith.constant 0.000000e+00 : f32
    %6 = vector.broadcast %cst_8 : f32 to vector<256x24xf32>
    %7 = vector.extract_strided_slice %4 {offsets = [0, 0], sizes = [256, 1], strides = [1, 1]} : vector<256x8xf32> to vector<256x1xf32>
    %8 = vector.extract_strided_slice %5 {offsets = [0, 0], sizes = [1, 24], strides = [1, 1]} : vector<8x24xf32> to vector<1x24xf32>
    %9 = vector.broadcast %7 : vector<256x1xf32> to vector<256x24xf32>
    %10 = vector.broadcast %8 : vector<1x24xf32> to vector<256x24xf32>
    %11 = arith.mulf %9, %10 : vector<256x24xf32>
    %12 = arith.addf %6, %11 : vector<256x24xf32>
    %13 = vector.extract_strided_slice %4 {offsets = [0, 1], sizes = [256, 1], strides = [1, 1]} : vector<256x8xf32> to vector<256x1xf32>
    %14 = vector.extract_strided_slice %5 {offsets = [1, 0], sizes = [1, 24], strides = [1, 1]} : vector<8x24xf32> to vector<1x24xf32>
    %15 = vector.broadcast %13 : vector<256x1xf32> to vector<256x24xf32>
    %16 = vector.broadcast %14 : vector<1x24xf32> to vector<256x24xf32>
    %17 = arith.mulf %15, %16 : vector<256x24xf32>
    %18 = arith.addf %12, %17 : vector<256x24xf32>
    %19 = vector.extract_strided_slice %4 {offsets = [0, 2], sizes = [256, 1], strides = [1, 1]} : vector<256x8xf32> to vector<256x1xf32>
    %20 = vector.extract_strided_slice %5 {offsets = [2, 0], sizes = [1, 24], strides = [1, 1]} : vector<8x24xf32> to vector<1x24xf32>
    %21 = vector.broadcast %19 : vector<256x1xf32> to vector<256x24xf32>
    %22 = vector.broadcast %20 : vector<1x24xf32> to vector<256x24xf32>
    %23 = arith.mulf %21, %22 : vector<256x24xf32>
    %24 = arith.addf %18, %23 : vector<256x24xf32>
    %25 = vector.extract_strided_slice %4 {offsets = [0, 3], sizes = [256, 1], strides = [1, 1]} : vector<256x8xf32> to vector<256x1xf32>
    %26 = vector.extract_strided_slice %5 {offsets = [3, 0], sizes = [1, 24], strides = [1, 1]} : vector<8x24xf32> to vector<1x24xf32>
    %27 = vector.broadcast %25 : vector<256x1xf32> to vector<256x24xf32>
    %28 = vector.broadcast %26 : vector<1x24xf32> to vector<256x24xf32>
    %29 = arith.mulf %27, %28 : vector<256x24xf32>
    %30 = arith.addf %24, %29 : vector<256x24xf32>
    %31 = vector.extract_strided_slice %4 {offsets = [0, 4], sizes = [256, 1], strides = [1, 1]} : vector<256x8xf32> to vector<256x1xf32>
    %32 = vector.extract_strided_slice %5 {offsets = [4, 0], sizes = [1, 24], strides = [1, 1]} : vector<8x24xf32> to vector<1x24xf32>
    %33 = vector.broadcast %31 : vector<256x1xf32> to vector<256x24xf32>
    %34 = vector.broadcast %32 : vector<1x24xf32> to vector<256x24xf32>
    %35 = arith.mulf %33, %34 : vector<256x24xf32>
    %36 = arith.addf %30, %35 : vector<256x24xf32>
    %37 = vector.extract_strided_slice %4 {offsets = [0, 5], sizes = [256, 1], strides = [1, 1]} : vector<256x8xf32> to vector<256x1xf32>
    %38 = vector.extract_strided_slice %5 {offsets = [5, 0], sizes = [1, 24], strides = [1, 1]} : vector<8x24xf32> to vector<1x24xf32>
    %39 = vector.broadcast %37 : vector<256x1xf32> to vector<256x24xf32>
    %40 = vector.broadcast %38 : vector<1x24xf32> to vector<256x24xf32>
    %41 = arith.mulf %39, %40 : vector<256x24xf32>
    %42 = arith.addf %36, %41 : vector<256x24xf32>
    %43 = vector.extract_strided_slice %4 {offsets = [0, 6], sizes = [256, 1], strides = [1, 1]} : vector<256x8xf32> to vector<256x1xf32>
    %44 = vector.extract_strided_slice %5 {offsets = [6, 0], sizes = [1, 24], strides = [1, 1]} : vector<8x24xf32> to vector<1x24xf32>
    %45 = vector.broadcast %43 : vector<256x1xf32> to vector<256x24xf32>
    %46 = vector.broadcast %44 : vector<1x24xf32> to vector<256x24xf32>
    %47 = arith.mulf %45, %46 : vector<256x24xf32>
    %48 = arith.addf %42, %47 : vector<256x24xf32>
    %49 = vector.extract_strided_slice %4 {offsets = [0, 7], sizes = [256, 1], strides = [1, 1]} : vector<256x8xf32> to vector<256x1xf32>
    %50 = vector.extract_strided_slice %5 {offsets = [7, 0], sizes = [1, 24], strides = [1, 1]} : vector<8x24xf32> to vector<1x24xf32>
    %51 = vector.broadcast %49 : vector<256x1xf32> to vector<256x24xf32>
    %52 = vector.broadcast %50 : vector<1x24xf32> to vector<256x24xf32>
    %53 = arith.mulf %51, %52 : vector<256x24xf32>
    %54 = arith.addf %48, %53 : vector<256x24xf32>
    %c0_9 = arith.constant 0 : index
    %c0_10 = arith.constant 0 : index
    %55 = vector.load %arg3[%c0_9, %c0_10] : memref<1x24xf32, #tpu.memory_space<vmem>>, vector<1x24xf32>
    %56 = vector.broadcast %55 : vector<1x24xf32> to vector<256x24xf32>
    %57 = arith.addf %54, %56 : vector<256x24xf32>
    %cst_11 = arith.constant 3.000000e+00 : f32
    %58 = vector.broadcast %cst_11 : f32 to vector<256x24xf32>
    %59 = arith.addf %57, %58 : vector<256x24xf32>
    %cst_12 = arith.constant 0.000000e+00 : f32
    %cst_13 = arith.constant 6.000000e+00 : f32
    %60 = vector.broadcast %cst_12 : f32 to vector<256x24xf32>
    %61 = arith.maximumf %60, %59 : vector<256x24xf32>
    %62 = vector.broadcast %cst_13 : f32 to vector<256x24xf32>
    %63 = arith.minimumf %62, %61 : vector<256x24xf32>
    %cst_14 = arith.constant 0.166666672 : f32
    %64 = vector.broadcast %cst_14 : f32 to vector<256x24xf32>
    %65 = arith.mulf %63, %64 : vector<256x24xf32>
    %66 = arith.mulf %57, %65 : vector<256x24xf32>
    %67 = vector.shape_cast %66 : vector<256x24xf32> to vector<16x16x24xf32>
    %c1 = arith.constant 1 : index
    %c1_15 = arith.constant 1 : index
    %c0_16 = arith.constant 0 : index
    %68 = vector.load %arg13[%c1, %c1_15, %c0_16] : memref<18x18x24xf32, #tpu.memory_space<vmem>>, vector<16x16x24xf32>
    tpu.vector_store %arg13[%c1, %c1_15, %c0_16], %67 {strides = array<i32>} : memref<18x18x24xf32, #tpu.memory_space<vmem>>, vector<16x16x24xf32>,
    %c0_17 = arith.constant 0 : index
    %c0_18 = arith.constant 0 : index
    %69 = vector.load %arg4[%c0_17, %c0_18] : memref<9x24xf32, #tpu.memory_space<vmem>>, vector<9x24xf32>
    %cst_19 = arith.constant 0.000000e+00 : f32
    %70 = vector.broadcast %cst_19 : f32 to vector<16x16x24xf32>
    %c0_20 = arith.constant 0 : index
    %c0_21 = arith.constant 0 : index
    %c0_22 = arith.constant 0 : index
    %71 = vector.load %arg13[%c0_20, %c0_21, %c0_22] : memref<18x18x24xf32, #tpu.memory_space<vmem>>, vector<16x16x24xf32>
    %72 = vector.extract_strided_slice %69 {offsets = [0, 0], sizes = [1, 24], strides = [1, 1]} : vector<9x24xf32> to vector<1x24xf32>
    %73 = vector.shape_cast %72 : vector<1x24xf32> to vector<24xf32>
    %74 = vector.shape_cast %73 : vector<24xf32> to vector<1x1x24xf32>
    %75 = vector.broadcast %74 : vector<1x1x24xf32> to vector<16x16x24xf32>
    %76 = arith.mulf %71, %75 : vector<16x16x24xf32>
    %77 = arith.addf %70, %76 : vector<16x16x24xf32>
    %c0_23 = arith.constant 0 : index
    %c1_24 = arith.constant 1 : index
    %c0_25 = arith.constant 0 : index
    %78 = vector.load %arg13[%c0_23, %c1_24, %c0_25] : memref<18x18x24xf32, #tpu.memory_space<vmem>>, vector<16x16x24xf32>
    %79 = vector.extract_strided_slice %69 {offsets = [1, 0], sizes = [1, 24], strides = [1, 1]} : vector<9x24xf32> to vector<1x24xf32>
    %80 = vector.shape_cast %79 : vector<1x24xf32> to vector<24xf32>
    %81 = vector.shape_cast %80 : vector<24xf32> to vector<1x1x24xf32>
    %82 = vector.broadcast %81 : vector<1x1x24xf32> to vector<16x16x24xf32>
    %83 = arith.mulf %78, %82 : vector<16x16x24xf32>
    %84 = arith.addf %77, %83 : vector<16x16x24xf32>
    %c0_26 = arith.constant 0 : index
    %c2 = arith.constant 2 : index
    %c0_27 = arith.constant 0 : index
    %85 = vector.load %arg13[%c0_26, %c2, %c0_27] : memref<18x18x24xf32, #tpu.memory_space<vmem>>, vector<16x16x24xf32>
    %86 = vector.extract_strided_slice %69 {offsets = [2, 0], sizes = [1, 24], strides = [1, 1]} : vector<9x24xf32> to vector<1x24xf32>
    %87 = vector.shape_cast %86 : vector<1x24xf32> to vector<24xf32>
    %88 = vector.shape_cast %87 : vector<24xf32> to vector<1x1x24xf32>
    %89 = vector.broadcast %88 : vector<1x1x24xf32> to vector<16x16x24xf32>
    %90 = arith.mulf %85, %89 : vector<16x16x24xf32>
    %91 = arith.addf %84, %90 : vector<16x16x24xf32>
    %c1_28 = arith.constant 1 : index
    %c0_29 = arith.constant 0 : index
    %c0_30 = arith.constant 0 : index
    %92 = vector.load %arg13[%c1_28, %c0_29, %c0_30] : memref<18x18x24xf32, #tpu.memory_space<vmem>>, vector<16x16x24xf32>
    %93 = vector.extract_strided_slice %69 {offsets = [3, 0], sizes = [1, 24], strides = [1, 1]} : vector<9x24xf32> to vector<1x24xf32>
    %94 = vector.shape_cast %93 : vector<1x24xf32> to vector<24xf32>
    %95 = vector.shape_cast %94 : vector<24xf32> to vector<1x1x24xf32>
    %96 = vector.broadcast %95 : vector<1x1x24xf32> to vector<16x16x24xf32>
    %97 = arith.mulf %92, %96 : vector<16x16x24xf32>
    %98 = arith.addf %91, %97 : vector<16x16x24xf32>
    %c1_31 = arith.constant 1 : index
    %c1_32 = arith.constant 1 : index
    %c0_33 = arith.constant 0 : index
    %99 = vector.load %arg13[%c1_31, %c1_32, %c0_33] : memref<18x18x24xf32, #tpu.memory_space<vmem>>, vector<16x16x24xf32>
    %100 = vector.extract_strided_slice %69 {offsets = [4, 0], sizes = [1, 24], strides = [1, 1]} : vector<9x24xf32> to vector<1x24xf32>
    %101 = vector.shape_cast %100 : vector<1x24xf32> to vector<24xf32>
    %102 = vector.shape_cast %101 : vector<24xf32> to vector<1x1x24xf32>
    %103 = vector.broadcast %102 : vector<1x1x24xf32> to vector<16x16x24xf32>
    %104 = arith.mulf %99, %103 : vector<16x16x24xf32>
    %105 = arith.addf %98, %104 : vector<16x16x24xf32>
    %c1_34 = arith.constant 1 : index
    %c2_35 = arith.constant 2 : index
    %c0_36 = arith.constant 0 : index
    %106 = vector.load %arg13[%c1_34, %c2_35, %c0_36] : memref<18x18x24xf32, #tpu.memory_space<vmem>>, vector<16x16x24xf32>
    %107 = vector.extract_strided_slice %69 {offsets = [5, 0], sizes = [1, 24], strides = [1, 1]} : vector<9x24xf32> to vector<1x24xf32>
    %108 = vector.shape_cast %107 : vector<1x24xf32> to vector<24xf32>
    %109 = vector.shape_cast %108 : vector<24xf32> to vector<1x1x24xf32>
    %110 = vector.broadcast %109 : vector<1x1x24xf32> to vector<16x16x24xf32>
    %111 = arith.mulf %106, %110 : vector<16x16x24xf32>
    %112 = arith.addf %105, %111 : vector<16x16x24xf32>
    %c2_37 = arith.constant 2 : index
    %c0_38 = arith.constant 0 : index
    %c0_39 = arith.constant 0 : index
    %113 = vector.load %arg13[%c2_37, %c0_38, %c0_39] : memref<18x18x24xf32, #tpu.memory_space<vmem>>, vector<16x16x24xf32>
    %114 = vector.extract_strided_slice %69 {offsets = [6, 0], sizes = [1, 24], strides = [1, 1]} : vector<9x24xf32> to vector<1x24xf32>
    %115 = vector.shape_cast %114 : vector<1x24xf32> to vector<24xf32>
    %116 = vector.shape_cast %115 : vector<24xf32> to vector<1x1x24xf32>
    %117 = vector.broadcast %116 : vector<1x1x24xf32> to vector<16x16x24xf32>
    %118 = arith.mulf %113, %117 : vector<16x16x24xf32>
    %119 = arith.addf %112, %118 : vector<16x16x24xf32>
    %c2_40 = arith.constant 2 : index
    %c1_41 = arith.constant 1 : index
    %c0_42 = arith.constant 0 : index
    %120 = vector.load %arg13[%c2_40, %c1_41, %c0_42] : memref<18x18x24xf32, #tpu.memory_space<vmem>>, vector<16x16x24xf32>
    %121 = vector.extract_strided_slice %69 {offsets = [7, 0], sizes = [1, 24], strides = [1, 1]} : vector<9x24xf32> to vector<1x24xf32>
    %122 = vector.shape_cast %121 : vector<1x24xf32> to vector<24xf32>
    %123 = vector.shape_cast %122 : vector<24xf32> to vector<1x1x24xf32>
    %124 = vector.broadcast %123 : vector<1x1x24xf32> to vector<16x16x24xf32>
    %125 = arith.mulf %120, %124 : vector<16x16x24xf32>
    %126 = arith.addf %119, %125 : vector<16x16x24xf32>
    %c2_43 = arith.constant 2 : index
    %c2_44 = arith.constant 2 : index
    %c0_45 = arith.constant 0 : index
    %127 = vector.load %arg13[%c2_43, %c2_44, %c0_45] : memref<18x18x24xf32, #tpu.memory_space<vmem>>, vector<16x16x24xf32>
    %128 = vector.extract_strided_slice %69 {offsets = [8, 0], sizes = [1, 24], strides = [1, 1]} : vector<9x24xf32> to vector<1x24xf32>
    %129 = vector.shape_cast %128 : vector<1x24xf32> to vector<24xf32>
    %130 = vector.shape_cast %129 : vector<24xf32> to vector<1x1x24xf32>
    %131 = vector.broadcast %130 : vector<1x1x24xf32> to vector<16x16x24xf32>
    %132 = arith.mulf %127, %131 : vector<16x16x24xf32>
    %133 = arith.addf %126, %132 : vector<16x16x24xf32>
    %134 = vector.shape_cast %133 : vector<16x16x24xf32> to vector<256x24xf32>
    %c0_46 = arith.constant 0 : index
    %c0_47 = arith.constant 0 : index
    %135 = vector.load %arg5[%c0_46, %c0_47] : memref<1x24xf32, #tpu.memory_space<vmem>>, vector<1x24xf32>
    %136 = vector.broadcast %135 : vector<1x24xf32> to vector<256x24xf32>
    %137 = arith.addf %134, %136 : vector<256x24xf32>
    %cst_48 = arith.constant dense<0.000000e+00> : vector<24xf32>
    %138 = vector.multi_reduction <add>, %137, %cst_48 [0] : vector<256x24xf32> to vector<24xf32>
    %139 = vector.shape_cast %138 : vector<24xf32> to vector<1x24xf32>
    %cst_49 = arith.constant 2.560000e+02 : f32
    %140 = vector.broadcast %cst_49 : f32 to vector<1x24xf32>
    %141 = arith.divf %139, %140 : vector<1x24xf32>
    %c0_50 = arith.constant 0 : index
    %c0_51 = arith.constant 0 : index
    %142 = vector.load %arg6[%c0_50, %c0_51] : memref<24x8xf32, #tpu.memory_space<vmem>>, vector<24x8xf32>
    %cst_52 = arith.constant dense<0.000000e+00> : vector<1x8xf32>
    %143 = tpu.matmul %141, %142, %cst_52 {dimension_numbers = #tpu.dot_dimension_numbers<[1], [0], [0], [1], [0, 0, 1, 1], [], []>} : vector<1x24xf32>, vector<24x8xf32>, vector<1x8xf32> -> vector<1x8xf32>
    %c0_53 = arith.constant 0 : index
    %c0_54 = arith.constant 0 : index
    %144 = vector.load %arg7[%c0_53, %c0_54] : memref<1x8xf32, #tpu.memory_space<vmem>>, vector<1x8xf32>
    %145 = arith.addf %143, %144 : vector<1x8xf32>
    %cst_55 = arith.constant 0.000000e+00 : f32
    %146 = vector.broadcast %cst_55 : f32 to vector<1x8xf32>
    %147 = arith.maximumf %145, %146 : vector<1x8xf32>
    %c0_56 = arith.constant 0 : index
    %c0_57 = arith.constant 0 : index
    %148 = vector.load %arg8[%c0_56, %c0_57] : memref<8x24xf32, #tpu.memory_space<vmem>>, vector<8x24xf32>
    %cst_58 = arith.constant 0.000000e+00 : f32
    %149 = vector.broadcast %cst_58 : f32 to vector<1x24xf32>
    %150 = vector.extract_strided_slice %147 {offsets = [0, 0], sizes = [1, 1], strides = [1, 1]} : vector<1x8xf32> to vector<1x1xf32>
    %151 = vector.extract_strided_slice %148 {offsets = [0, 0], sizes = [1, 24], strides = [1, 1]} : vector<8x24xf32> to vector<1x24xf32>
    %152 = vector.broadcast %150 : vector<1x1xf32> to vector<1x24xf32>
    %153 = arith.mulf %152, %151 : vector<1x24xf32>
    %154 = arith.addf %149, %153 : vector<1x24xf32>
    %155 = vector.extract_strided_slice %147 {offsets = [0, 1], sizes = [1, 1], strides = [1, 1]} : vector<1x8xf32> to vector<1x1xf32>
    %156 = vector.extract_strided_slice %148 {offsets = [1, 0], sizes = [1, 24], strides = [1, 1]} : vector<8x24xf32> to vector<1x24xf32>
    %157 = vector.broadcast %155 : vector<1x1xf32> to vector<1x24xf32>
    %158 = arith.mulf %157, %156 : vector<1x24xf32>
    %159 = arith.addf %154, %158 : vector<1x24xf32>
    %160 = vector.extract_strided_slice %147 {offsets = [0, 2], sizes = [1, 1], strides = [1, 1]} : vector<1x8xf32> to vector<1x1xf32>
    %161 = vector.extract_strided_slice %148 {offsets = [2, 0], sizes = [1, 24], strides = [1, 1]} : vector<8x24xf32> to vector<1x24xf32>
    %162 = vector.broadcast %160 : vector<1x1xf32> to vector<1x24xf32>
    %163 = arith.mulf %162, %161 : vector<1x24xf32>
    %164 = arith.addf %159, %163 : vector<1x24xf32>
    %165 = vector.extract_strided_slice %147 {offsets = [0, 3], sizes = [1, 1], strides = [1, 1]} : vector<1x8xf32> to vector<1x1xf32>
    %166 = vector.extract_strided_slice %148 {offsets = [3, 0], sizes = [1, 24], strides = [1, 1]} : vector<8x24xf32> to vector<1x24xf32>
    %167 = vector.broadcast %165 : vector<1x1xf32> to vector<1x24xf32>
    %168 = arith.mulf %167, %166 : vector<1x24xf32>
    %169 = arith.addf %164, %168 : vector<1x24xf32>
    %170 = vector.extract_strided_slice %147 {offsets = [0, 4], sizes = [1, 1], strides = [1, 1]} : vector<1x8xf32> to vector<1x1xf32>
    %171 = vector.extract_strided_slice %148 {offsets = [4, 0], sizes = [1, 24], strides = [1, 1]} : vector<8x24xf32> to vector<1x24xf32>
    %172 = vector.broadcast %170 : vector<1x1xf32> to vector<1x24xf32>
    %173 = arith.mulf %172, %171 : vector<1x24xf32>
    %174 = arith.addf %169, %173 : vector<1x24xf32>
    %175 = vector.extract_strided_slice %147 {offsets = [0, 5], sizes = [1, 1], strides = [1, 1]} : vector<1x8xf32> to vector<1x1xf32>
    %176 = vector.extract_strided_slice %148 {offsets = [5, 0], sizes = [1, 24], strides = [1, 1]} : vector<8x24xf32> to vector<1x24xf32>
    %177 = vector.broadcast %175 : vector<1x1xf32> to vector<1x24xf32>
    %178 = arith.mulf %177, %176 : vector<1x24xf32>
    %179 = arith.addf %174, %178 : vector<1x24xf32>
    %180 = vector.extract_strided_slice %147 {offsets = [0, 6], sizes = [1, 1], strides = [1, 1]} : vector<1x8xf32> to vector<1x1xf32>
    %181 = vector.extract_strided_slice %148 {offsets = [6, 0], sizes = [1, 24], strides = [1, 1]} : vector<8x24xf32> to vector<1x24xf32>
    %182 = vector.broadcast %180 : vector<1x1xf32> to vector<1x24xf32>
    %183 = arith.mulf %182, %181 : vector<1x24xf32>
    %184 = arith.addf %179, %183 : vector<1x24xf32>
    %185 = vector.extract_strided_slice %147 {offsets = [0, 7], sizes = [1, 1], strides = [1, 1]} : vector<1x8xf32> to vector<1x1xf32>
    %186 = vector.extract_strided_slice %148 {offsets = [7, 0], sizes = [1, 24], strides = [1, 1]} : vector<8x24xf32> to vector<1x24xf32>
    %187 = vector.broadcast %185 : vector<1x1xf32> to vector<1x24xf32>
    %188 = arith.mulf %187, %186 : vector<1x24xf32>
    %189 = arith.addf %184, %188 : vector<1x24xf32>
    %c0_59 = arith.constant 0 : index
    %c0_60 = arith.constant 0 : index
    %190 = vector.load %arg9[%c0_59, %c0_60] : memref<1x24xf32, #tpu.memory_space<vmem>>, vector<1x24xf32>
    %191 = arith.addf %189, %190 : vector<1x24xf32>
    %cst_61 = arith.constant 3.000000e+00 : f32
    %192 = vector.broadcast %cst_61 : f32 to vector<1x24xf32>
    %193 = arith.addf %191, %192 : vector<1x24xf32>
    %cst_62 = arith.constant 0.000000e+00 : f32
    %cst_63 = arith.constant 6.000000e+00 : f32
    %194 = vector.broadcast %cst_62 : f32 to vector<1x24xf32>
    %195 = arith.maximumf %194, %193 : vector<1x24xf32>
    %196 = vector.broadcast %cst_63 : f32 to vector<1x24xf32>
    %197 = arith.minimumf %196, %195 : vector<1x24xf32>
    %cst_64 = arith.constant 0.166666672 : f32
    %198 = vector.broadcast %cst_64 : f32 to vector<1x24xf32>
    %199 = arith.mulf %197, %198 : vector<1x24xf32>
    %200 = vector.broadcast %199 : vector<1x24xf32> to vector<256x24xf32>
    %201 = arith.mulf %137, %200 : vector<256x24xf32>
    %cst_65 = arith.constant 3.000000e+00 : f32
    %202 = vector.broadcast %cst_65 : f32 to vector<256x24xf32>
    %203 = arith.addf %201, %202 : vector<256x24xf32>
    %cst_66 = arith.constant 0.000000e+00 : f32
    %cst_67 = arith.constant 6.000000e+00 : f32
    %204 = vector.broadcast %cst_66 : f32 to vector<256x24xf32>
    %205 = arith.maximumf %204, %203 : vector<256x24xf32>
    %206 = vector.broadcast %cst_67 : f32 to vector<256x24xf32>
    %207 = arith.minimumf %206, %205 : vector<256x24xf32>
    %cst_68 = arith.constant 0.166666672 : f32
    %208 = vector.broadcast %cst_68 : f32 to vector<256x24xf32>
    %209 = arith.mulf %207, %208 : vector<256x24xf32>
    %210 = arith.mulf %201, %209 : vector<256x24xf32>
    %c0_69 = arith.constant 0 : index
    %c0_70 = arith.constant 0 : index
    %211 = vector.load %arg10[%c0_69, %c0_70] : memref<24x8xf32, #tpu.memory_space<vmem>>, vector<24x8xf32>
    %cst_71 = arith.constant dense<0.000000e+00> : vector<256x8xf32>
    %212 = tpu.matmul %210, %211, %cst_71 {dimension_numbers = #tpu.dot_dimension_numbers<[1], [0], [0], [1], [0, 0, 1, 1], [], []>} : vector<256x24xf32>, vector<24x8xf32>, vector<256x8xf32> -> vector<256x8xf32>
    %c0_72 = arith.constant 0 : index
    %c0_73 = arith.constant 0 : index
    %213 = vector.load %arg11[%c0_72, %c0_73] : memref<1x8xf32, #tpu.memory_space<vmem>>, vector<1x8xf32>
    %214 = vector.broadcast %213 : vector<1x8xf32> to vector<256x8xf32>
    %215 = arith.addf %212, %214 : vector<256x8xf32>
    %216 = vector.shape_cast %215 : vector<256x8xf32> to vector<16x16x8xf32>
    %217 = arith.addf %216, %1 : vector<16x16x8xf32>
    %c0_74 = arith.constant 0 : index
    %c0_75 = arith.constant 0 : index
    %c0_76 = arith.constant 0 : index
    %c0_77 = arith.constant 0 : index
    %218 = vector.load %arg12[%c0_74, %c0_75, %c0_76, %c0_77] : memref<1x16x16x8xf32, #tpu.memory_space<vmem>>, vector<1x16x16x8xf32>
    %219 = vector.shape_cast %218 : vector<1x16x16x8xf32> to vector<16x16x8xf32>
    %220 = vector.shape_cast %217 : vector<16x16x8xf32> to vector<1x16x16x8xf32>
    tpu.vector_store %arg12[%c0_74, %c0_75, %c0_76, %c0_77], %220 {strides = array<i32>} : memref<1x16x16x8xf32, #tpu.memory_space<vmem>>, vector<1x16x16x8xf32>,
    return
  }
  func.func @transform_0(%arg0: i32) -> (i32, i32, i32, i32) {
    %c0_i32 = arith.constant 0 : i32
    %c0_i32_0 = arith.constant 0 : i32
    %c0_i32_1 = arith.constant 0 : i32
    %c0_i32_2 = arith.constant 0 : i32
    return %arg0, %c0_i32, %c0_i32_0, %c0_i32_1 : i32, i32, i32, i32
  }
  func.func @transform_1(%arg0: i32) -> (i32, i32) {
    %c0_i32 = arith.constant 0 : i32
    %c0_i32_0 = arith.constant 0 : i32
    %c0_i32_1 = arith.constant 0 : i32
    return %c0_i32, %c0_i32_0 : i32, i32
  }
  func.func @transform_2(%arg0: i32) -> (i32, i32) {
    %c0_i32 = arith.constant 0 : i32
    %c0_i32_0 = arith.constant 0 : i32
    %c0_i32_1 = arith.constant 0 : i32
    return %c0_i32, %c0_i32_0 : i32, i32
  }
  func.func @transform_3(%arg0: i32) -> (i32, i32) {
    %c0_i32 = arith.constant 0 : i32
    %c0_i32_0 = arith.constant 0 : i32
    %c0_i32_1 = arith.constant 0 : i32
    return %c0_i32, %c0_i32_0 : i32, i32
  }
  func.func @transform_4(%arg0: i32) -> (i32, i32) {
    %c0_i32 = arith.constant 0 : i32
    %c0_i32_0 = arith.constant 0 : i32
    %c0_i32_1 = arith.constant 0 : i32
    return %c0_i32, %c0_i32_0 : i32, i32
  }
  func.func @transform_5(%arg0: i32) -> (i32, i32) {
    %c0_i32 = arith.constant 0 : i32
    %c0_i32_0 = arith.constant 0 : i32
    %c0_i32_1 = arith.constant 0 : i32
    return %c0_i32, %c0_i32_0 : i32, i32
  }
  func.func @transform_6(%arg0: i32) -> (i32, i32) {
    %c0_i32 = arith.constant 0 : i32
    %c0_i32_0 = arith.constant 0 : i32
    %c0_i32_1 = arith.constant 0 : i32
    return %c0_i32, %c0_i32_0 : i32, i32
  }
  func.func @transform_7(%arg0: i32) -> (i32, i32) {
    %c0_i32 = arith.constant 0 : i32
    %c0_i32_0 = arith.constant 0 : i32
    %c0_i32_1 = arith.constant 0 : i32
    return %c0_i32, %c0_i32_0 : i32, i32
  }
  func.func @transform_8(%arg0: i32) -> (i32, i32) {
    %c0_i32 = arith.constant 0 : i32
    %c0_i32_0 = arith.constant 0 : i32
    %c0_i32_1 = arith.constant 0 : i32
    return %c0_i32, %c0_i32_0 : i32, i32
  }
  func.func @transform_9(%arg0: i32) -> (i32, i32) {
    %c0_i32 = arith.constant 0 : i32
    %c0_i32_0 = arith.constant 0 : i32
    %c0_i32_1 = arith.constant 0 : i32
    return %c0_i32, %c0_i32_0 : i32, i32
  }
  func.func @transform_10(%arg0: i32) -> (i32, i32) {
    %c0_i32 = arith.constant 0 : i32
    %c0_i32_0 = arith.constant 0 : i32
    %c0_i32_1 = arith.constant 0 : i32
    return %c0_i32, %c0_i32_0 : i32, i32
  }
  func.func @transform_11(%arg0: i32) -> (i32, i32, i32, i32) {
    %c0_i32 = arith.constant 0 : i32
    %c0_i32_0 = arith.constant 0 : i32
    %c0_i32_1 = arith.constant 0 : i32
    %c0_i32_2 = arith.constant 0 : i32
    return %arg0, %c0_i32, %c0_i32_0, %c0_i32_1 : i32, i32, i32, i32
  }
}

</mosaic_0001>

<bundles_post_ra>
// kernel: inverted_residual_forward.1
= control target key start
LH: loop header
LB: loop body
LE: loop exit
PB: predicated region body
PF: predicated region fallthrough
CT: control target
= control target key end

     0   :  { %s4565_s17 = smov 0   ;;  %s7128_s0 = inlined_call_operand.vmem [shape: f32[2,16,16,8], index: 0, kind: input, shape index: {}]   ;;  %s7129_s1 = inlined_call_operand.vmem [shape: f32[8,24], index: 1, kind: input, shape index: {}]   ;;  %s7130_s2 = inlined_call_operand.vmem [shape: f32[1,24], index: 2, kind: input, shape index: {}]   ;;  %s7131_s3 = inlined_call_operand.vmem [shape: f32[9,24], index: 3, kind: input, shape index: {}]   ;;  %s7132_s4 = inlined_call_operand.vmem [shape: f32[1,24], index: 4, kind: input, shape index: {}]   ;;  %s7133_s5 = inlined_call_operand.vmem [shape: f32[24,8], index: 5, kind: input, shape index: {}]   ;;  %s7134_s6 = inlined_call_operand.vmem [shape: f32[1,8], index: 6, kind: input, shape index: {}]   ;;  %s7135_s7 = inlined_call_operand.vmem [shape: f32[8,24], index: 7, kind: input, shape index: {}]   ;;  %s7136_s8 = inlined_call_operand.vmem [shape: f32[1,24], index: 8, kind: input, shape index: {}]   ;;  %s7137_s9 = inlined_call_operand.vmem [shape: f32[24,8], index: 9, kind: input, shape index: {}]   ;;  %s7138_s10 = inlined_call_operand.vmem [shape: f32[1,8], index: 10, kind: input, shape index: {}]   ;;  %s7139_s11 = inlined_call_operand.vmem [shape: f32[2,16,16,8], index: 11, kind: output, shape index: {}]  }
   0x1 LB: > { %s4117_s18 = sadd.s32 4294967295, %s4493_s17   ;;  %p4121_p0 = scmp.ge.s32.totalorder %s4493_s17, 1  ;;  %s4493_s17 = sphi %s4565_s17, %s21_s17  }
   0x2   : > { %p337_p1 = scmp.lt.s32.totalorder %s4493_s17, 3 }
   0x4   : > { %p338_p2 = pnand %p4121_p0, %p337_p1 }
   0x6   : > { %341 = sbr.rel (%p338_p2) target bundleno = 1549 (0x60d), region = 64 }
   0xb   : > { %p377_p3 = scmp.lt.s32.totalorder %s4117_s18, 1  ;;  %v7140_v0 = vmov 0   ;;  %v7141_v33 = vmov 1   ;;  %v7142_v38 = vmov 2   ;;  %v7147_v39 = vmov 4  }
   0xc   : > { %4294 = vset.pattern.permute.xlu1 %v7140_v0  ;;  %4293 = vset.pattern.permute.xlu0 %v7140_v0  ;;  %v7143_v50 = vmov 7   ;;  %v7145_v63 = vmov 3   ;;  %vm419_vm0 = vcmask 195584   ;;  %vm422_vm1 = vcmask 189440  }
   0xd   : > { %s7397_s18 = smov (!%p377_p3, %s4117_s18), 1  ;;  %vm4504_vm2 = vmmov 0   ;;  %vm4029_vm3 = vcmask 64512  }
   0xe   : > { %s4165_s19 = sshll.u32 %s7397_s18, 8 }
   0xf   : > { %s4583_s22 = scalar_lea.vmem %s7128_s0, %s4165_s19  ;;  %s6997_s14 = scalar_lea.vmem %s7139_s11, %s4165_s19 }
  0x10   : > { %v4586_v1 = vld [vmem:[%s4583_s22 + $0x10] sm:$0xff]  ;;  %v4589_v2 = vld [vmem:[%s4583_s22] sm:$0xff]  ;;  %v4594_v3 = vld [vmem:[%s4583_s22 + $0x18] sm:$0xff] }
  0x11   : > { %488 = vperm.xlu1 %4294, %v4586_v1   ;;  %478 = vperm.xlu0 %4293, %v4589_v2   ;;  %v4597_v4 = vld [vmem:[%s4583_s22 + $0x8] sm:$0xff]  ;;  %v4605_v6 = vld [vmem:[%s4583_s22 + $0x20] sm:$0xff]  ;;  %v4610_v7 = vld [vmem:[%s4583_s22 + $0x38] sm:$0xff] }
  0x12   : > { %7198 = vst [vmem:[#allocation3_spill] sm:$0xff] %v4597_v4  ;;  %v4602_v5 = vld [vmem:[%s4583_s22 + $0x28] sm:$0xff]  ;;  %v4613_v8 = vld [vmem:[%s4583_s22 + $0x30] sm:$0xff]  ;;  %v4621_v10 = vld [vmem:[%s4583_s22 + $0x40] sm:$0xff] }
  0x13   : > { %v4618_v9 = vld [vmem:[%s4583_s22 + $0x48] sm:$0xff]  ;;  %v4626_v11 = vld [vmem:[%s4583_s22 + $0x58] sm:$0xff]  ;;  %v4629_v12 = vld [vmem:[%s4583_s22 + $0x50] sm:$0xff] }
  0x14   : > { %7199 = vst [vmem:[#allocation4_spill] sm:$0xff] %v4618_v9  ;;  %7200 = vst [vmem:[#allocation5_spill] sm:$0xff] %v4626_v11  ;;  %v4634_v13 = vld [vmem:[%s4583_s22 + $0x68] sm:$0xff]  ;;  %v4637_v14 = vld [vmem:[%s4583_s22 + $0x60] sm:$0xff] }
  0x15   : > { %493 = vperm.xlu1 %4294, %v4594_v3   ;;  %483 = vperm.xlu0 %4293, %v4597_v4   ;;  %7201 = vst [vmem:[#allocation6_spill] sm:$0xff] %v4637_v14  ;;  %v4642_v15 = vld [vmem:[%s4583_s22 + $0x78] sm:$0xff]  ;;  %v4645_v16 = vld [vmem:[%s4583_s22 + $0x70] sm:$0xff]  ;;  %v4650_v17 = vld [vmem:[%s4583_s22 + $0x88] sm:$0xff] }
  0x16   : > { %7202 = vst [vmem:[#allocation7_spill] sm:$0xff] %v4645_v16  ;;  %7203 = vst [vmem:[#allocation8_spill] sm:$0xff] %v4650_v17  ;;  %v4653_v18 = vld [vmem:[%s4583_s22 + $0x80] sm:$0xff]  ;;  %v4658_v19 = vld [vmem:[%s4583_s22 + $0x98] sm:$0xff] }
  0x17   : > { %7204 = vst [vmem:[#allocation9_spill] sm:$0xff] %v4658_v19  ;;  %v4661_v20 = vld [vmem:[%s4583_s22 + $0x90] sm:$0xff]  ;;  %v4666_v21 = vld [vmem:[%s4583_s22 + $0xa8] sm:$0xff]  ;;  %v4669_v22 = vld [vmem:[%s4583_s22 + $0xa0] sm:$0xff] }
  0x18   : > { %v4674_v23 = vld [vmem:[%s4583_s22 + $0xb8] sm:$0xff]  ;;  %v4677_v24 = vld [vmem:[%s4583_s22 + $0xb0] sm:$0xff]  ;;  %v4682_v25 = vld [vmem:[%s4583_s22 + $0xc8] sm:$0xff] }
  0x19   : > { %503 = vperm.xlu1 %4294, %v4602_v5   ;;  %498 = vperm.xlu0 %4293, %v4605_v6   ;;  %v4685_v26 = vld [vmem:[%s4583_s22 + $0xc0] sm:$0xff]  ;;  %v4690_v27 = vld [vmem:[%s4583_s22 + $0xd8] sm:$0xff]  ;;  %v4693_v28 = vld [vmem:[%s4583_s22 + $0xd0] sm:$0xff] }
  0x1a   : > { %v4698_v29 = vld [vmem:[%s4583_s22 + $0xe8] sm:$0xff]  ;;  %v4701_v30 = vld [vmem:[%s4583_s22 + $0xe0] sm:$0xff]  ;;  %v4706_v31 = vld [vmem:[%s4583_s22 + $0xf8] sm:$0xff] }
  0x1b   : > { %v4709_v32 = vld [vmem:[%s4583_s22 + $0xf0] sm:$0xff] }
  0x1d   : > { %513 = vperm.xlu1 %4294, %v4610_v7   ;;  %508 = vperm.xlu0 %4293, %v4613_v8  }
  0x21   : > { %523 = vperm.xlu1 %4294, %v4618_v9   ;;  %518 = vperm.xlu0 %4293, %v4621_v10  }
  0x25   : > { %533 = vperm.xlu1 %4294, %v4626_v11   ;;  %528 = vperm.xlu0 %4293, %v4629_v12  }
  0x29   : > { %543 = vperm.xlu1 %4294, %v4634_v13   ;;  %538 = vperm.xlu0 %4293, %v4637_v14  }
  0x2d   : > { %553 = vperm.xlu1 %4294, %v4642_v15   ;;  %548 = vperm.xlu0 %4293, %v4645_v16  }
  0x31   : > { %563 = vperm.xlu1 %4294, %v4650_v17   ;;  %558 = vperm.xlu0 %4293, %v4653_v18  }
  0x35   : > { %573 = vperm.xlu1 %4294, %v4658_v19   ;;  %568 = vperm.xlu0 %4293, %v4661_v20  }
  0x39   : > { %583 = vperm.xlu1 %4294, %v4666_v21   ;;  %578 = vperm.xlu0 %4293, %v4669_v22  }
  0x3d   : > { %593 = vperm.xlu1 %4294, %v4674_v23   ;;  %588 = vperm.xlu0 %4293, %v4677_v24  }
  0x41   : > { %603 = vperm.xlu1 %4294, %v4682_v25   ;;  %598 = vperm.xlu0 %4293, %v4685_v26  }
  0x45   : > { %613 = vperm.xlu1 %4294, %v4690_v27   ;;  %608 = vperm.xlu0 %4293, %v4693_v28  }
  0x49   : > { %623 = vperm.xlu1 %4294, %v4698_v29   ;;  %618 = vperm.xlu0 %4293, %v4701_v30  }
  0x4d   : > { %633 = vperm.xlu1 %4294, %v4706_v31   ;;  %628 = vperm.xlu0 %4293, %v4709_v32  }
  0x51   : > { %4296 = vset.pattern.permute.xlu1 %v7141_v33  ;;  %4295 = vset.pattern.permute.xlu0 %v7141_v33 }
  0x52   : > { %709 = vperm.xlu1 %4296, %v4597_v4   ;;  %705 = vperm.xlu0 %4295, %v4589_v2  }
  0x56   : > { %713 = vperm.xlu1 %4296, %v4586_v1   ;;  %717 = vperm.xlu0 %4295, %v4594_v3  }
  0x5a   : > { %721 = vperm.xlu1 %4296, %v4605_v6   ;;  %725 = vperm.xlu0 %4295, %v4602_v5  }
  0x5e   : > { %729 = vperm.xlu1 %4296, %v4613_v8   ;;  %733 = vperm.xlu0 %4295, %v4610_v7  }
  0x62   : > { %737 = vperm.xlu1 %4296, %v4621_v10   ;;  %741 = vperm.xlu0 %4295, %v4618_v9  }
  0x66   : > { %745 = vperm.xlu1 %4296, %v4629_v12   ;;  %749 = vperm.xlu0 %4295, %v4626_v11  }
  0x6a   : > { %753 = vperm.xlu1 %4296, %v4637_v14   ;;  %757 = vperm.xlu0 %4295, %v4634_v13  }
  0x6e   : > { %761 = vperm.xlu1 %4296, %v4645_v16   ;;  %765 = vperm.xlu0 %4295, %v4642_v15  }
  0x72   : > { %769 = vperm.xlu1 %4296, %v4653_v18   ;;  %773 = vperm.xlu0 %4295, %v4650_v17  }
  0x76   : > { %777 = vperm.xlu1 %4296, %v4661_v20   ;;  %781 = vperm.xlu0 %4295, %v4658_v19  }
  0x7a   : > { %785 = vperm.xlu1 %4296, %v4669_v22   ;;  %789 = vperm.xlu0 %4295, %v4666_v21  }
  0x7e   : > { %793 = vperm.xlu1 %4296, %v4677_v24   ;;  %797 = vperm.xlu0 %4295, %v4674_v23  }
  0x82   : > { %801 = vperm.xlu1 %4296, %v4685_v26   ;;  %805 = vperm.xlu0 %4295, %v4682_v25  }
  0x86   : > { %809 = vperm.xlu1 %4296, %v4693_v28   ;;  %813 = vperm.xlu0 %4295, %v4690_v27  }
  0x8a   : > { %817 = vperm.xlu1 %4296, %v4701_v30   ;;  %821 = vperm.xlu0 %4295, %v4698_v29  }
  0x8c   : > { %v4745_v34 = vpop.permute.xlu1 %488  ;;  %v4747_v35 = vpop.permute.xlu0 %478 }
  0x8d   : > { %7205 = vst [vmem:[#allocation10_spill] sm:$0xff] %v4745_v34  ;;  %7206 = vst [vmem:[#allocation11_spill] sm:$0xff] %v4747_v35 }
  0x8e   : > { %825 = vperm.xlu1 %4296, %v4709_v32   ;;  %829 = vperm.xlu0 %4295, %v4706_v31  }
  0x90   : > { %v4751_v36 = vpop.permute.xlu1 %493  ;;  %v4753_v37 = vpop.permute.xlu0 %483 }
  0x91   : > { %7207 = vst [vmem:[#allocation12_spill] sm:$0xff] %v4751_v36  ;;  %7208 = vst [vmem:[#allocation13_spill] sm:$0xff] %v4753_v37  ;;  %v4860_v36 = vld [vmem:[%s7129_s1] sm:$0xff] }
  0x92   : > { %4297 = vset.pattern.permute.xlu1 %v7142_v38  ;;  %4307 = vset.pattern.permute.xlu0 %v7147_v39  ;;  %7216 = vst [vmem:[#allocation20_spill] sm:$0xff] %v4860_v36 }
  0x93   : > { %901 = vperm.xlu1 %4297, %v4589_v2   ;;  %1309 = vperm.xlu0 %4307, %v4605_v6  }
  0x94   : > { %v4759_v40 = vpop.permute.xlu1 %503  ;;  %v4761_v41 = vpop.permute.xlu0 %498 }
  0x95   : > { %7209 = vst [vmem:[#allocation14_spill] sm:$0xff] %v4759_v40 }
  0x97   : > { %909 = vperm.xlu1 %4297, %v4586_v1   ;;  %1321 = vperm.xlu0 %4307, %v4610_v7  }
  0x98   : > { %v4765_v42 = vpop.permute.xlu1 %513  ;;  %v4767_v43 = vpop.permute.xlu0 %508 }
  0x99   : > { %7210 = vst [vmem:[#allocation15_spill] sm:$0xff] %v4767_v43 }
  0x9b   : > { %913 = vperm.xlu1 %4297, %v4594_v3   ;;  %1333 = vperm.xlu0 %4307, %v4629_v12  }
  0x9c   : > { %v4771_v44 = vpop.permute.xlu1 %523  ;;  %v4773_v45 = vpop.permute.xlu0 %518 }
  0x9f   : > { %921 = vperm.xlu1 %4297, %v4602_v5   ;;  %1345 = vperm.xlu0 %4307, %v4634_v13  }
  0xa0   : > { %v4777_v46 = vpop.permute.xlu1 %533  ;;  %v4779_v47 = vpop.permute.xlu0 %528 }
  0xa3   : > { %929 = vperm.xlu1 %4297, %v4610_v7   ;;  %1357 = vperm.xlu0 %4307, %v4653_v18  }
  0xa4   : > { %v4783_v48 = vpop.permute.xlu1 %543  ;;  %v4785_v49 = vpop.permute.xlu0 %538 }
  0xa7   : > { %937 = vperm.xlu1 %4297, %v4618_v9   ;;  %4348 = vset.pattern.permute.xlu0 %v7143_v50  ;;  %v636_v50 = vlaneseq }
  0xa8   : > { %v4789_v51 = vpop.permute.xlu1 %553  ;;  %1885 = vperm.xlu0 %4348, %v4597_v4   ;;  %v4792_v52 = vpop.permute.xlu0 %548 }
  0xa9   : > { %v4845_v35 = vshrl.u32 %v636_v50, 7 }
  0xab   : > { %945 = vperm.xlu1 %4297, %v4626_v11   ;;  %7211 = vst [vmem:[#allocation16_spill] sm:$0xff] %v4845_v35  ;;  %v4854_v34 = vsub.s32 0, %v4845_v35  ;;  %v7161_v50 = vsub.s32 1, %v4845_v35 }
  0xac   : > { %v4795_v53 = vpop.permute.xlu1 %563  ;;  %1897 = vperm.xlu0 %4348, %v4605_v6   ;;  %v4798_v54 = vpop.permute.xlu0 %558 }
  0xad   : > { %7215 = vst [vmem:[#allocation19_spill] sm:$0xff] %v4854_v34 }
  0xaf   : > { %953 = vperm.xlu1 %4297, %v4634_v13  }
  0xb0   : > { %v4801_v55 = vpop.permute.xlu1 %573  ;;  %1909 = vperm.xlu0 %4348, %v4610_v7   ;;  %v4804_v56 = vpop.permute.xlu0 %568 }
  0xb3   : > { %961 = vperm.xlu1 %4297, %v4642_v15  }
  0xb4   : > { %v4807_v57 = vpop.permute.xlu1 %583  ;;  %1921 = vperm.xlu0 %4348, %v4629_v12   ;;  %v4810_v58 = vpop.permute.xlu0 %578 }
  0xb7   : > { %969 = vperm.xlu1 %4297, %v4650_v17   ;;  %v7219_v17 = vmov 4  }
  0xb8   : > { %v4813_v59 = vpop.permute.xlu1 %593  ;;  %1933 = vperm.xlu0 %4348, %v4634_v13   ;;  %v4816_v60 = vpop.permute.xlu0 %588 }
  0xbb   : > { %977 = vperm.xlu1 %4297, %v4658_v19  }
  0xbc   : > { %v4819_v61 = vpop.permute.xlu1 %603  ;;  %4351 = vset.pattern.permute.xlu0 %v7142_v38  ;;  %v4822_v62 = vpop.permute.xlu0 %598 }
  0xbd   : > { %905 = vperm.xlu0 %4351, %v4597_v4  }
  0xbf   : > { %4298 = vset.pattern.permute.xlu1 %v7145_v63 }
  0xc0   : > { %v4826_v15 = vpop.permute.xlu1 %613  ;;  %1101 = vperm.xlu1 %4298, %v4597_v4   ;;  %v4829_v0 = vpop.permute.xlu0 %608 }
  0xc1   : > { %917 = vperm.xlu0 %4351, %v4605_v6  }
  0xc4   : > { %v4832_v33 = vpop.permute.xlu1 %623  ;;  %4299 = vset.pattern.permute.xlu1 %v7147_v39  ;;  %v4835_v38 = vpop.permute.xlu0 %618  ;;  %v7213_v39 = vmov 3  }
  0xc5   : > { %1293 = vperm.xlu1 %4299, %v4589_v2   ;;  %925 = vperm.xlu0 %4351, %v4613_v8  }
  0xc8   : > { %v4839_v63 = vpop.permute.xlu1 %633  ;;  %v4841_v37 = vpop.permute.xlu0 %628 }
  0xc9   : > { %1297 = vperm.xlu1 %4299, %v4597_v4   ;;  %933 = vperm.xlu0 %4351, %v4621_v10   ;;  %v4879_v4 = vrot.slane %v4860_v36, %v7161_v50 }
  0xcd   : > { %v4847_v43 = vpop.permute.xlu1 %709  ;;  %4300 = vset.pattern.permute.xlu1 %v7213_v39  ;;  %941 = vperm.xlu0 %4351, %v4629_v12   ;;  %v4851_v40 = vpop.permute.xlu0 %705 }
  0xce   : > { %7212 = vst [vmem:[#allocation17_spill] sm:$0xff] %v4847_v43  ;;  %7214 = vst [vmem:[#allocation18_spill] sm:$0xff] %v4851_v40  ;;  %1109 = vperm.xlu1 %4300, %v4594_v3   ;;  %v4870_v40 = vrot.slane %v4860_v36, %v4854_v34 }
  0xd0   : > { %v644_v11 = vmul.f32 %v4870_v40, %v4761_v41  ;;  %v647_v36 = vmul.f32 %v4870_v40, %v4765_v42 }
  0xd1   : > { %v4863_v19 = vpop.permute.xlu1 %713  ;;  %949 = vperm.xlu0 %4351, %v4637_v14   ;;  %v4866_v43 = vpop.permute.xlu0 %717  ;;  %v7165_v14 = vmov 6  }
  0xd2   : > { %7217 = vst [vmem:[#allocation21_spill] sm:$0xff] %v4863_v19  ;;  %7218 = vst [vmem:[#allocation22_spill] sm:$0xff] %v4866_v43  ;;  %4301 = vset.pattern.permute.xlu1 %v7219_v17 }
  0xd3   : > { %1301 = vperm.xlu1 %4301, %v4586_v1  }
  0xd5   : > { %v722_v19 = vpop.permute.xlu1 %721  ;;  %957 = vperm.xlu0 %4351, %v4645_v16   ;;  %v4882_v43 = vpop.permute.xlu0 %725 }
  0xd6   : > { %7220 = vst [vmem:[#allocation23_spill] sm:$0xff] %v4882_v43  ;;  %v840_v34 = vmul.f32 %v4879_v4, %v722_v19  ;;  %v648_v19 = vmul.f32 %v4870_v40, %v4773_v45  ;;  %v650_v45 = vmul.f32 %v4870_v40, %v4779_v47 }
  0xd7   : > { %4302 = vset.pattern.permute.xlu1 %v7165_v14  ;;  %v649_v14 = vmul.f32 %v4870_v40, %v4771_v44  ;;  %v651_v44 = vmul.f32 %v4870_v40, %v4777_v46  ;;  %v653_v46 = vmul.f32 %v4870_v40, %v4783_v48  ;;  %v655_v48 = vmul.f32 %v4870_v40, %v4789_v51 }
  0xd8   : > { %v4886_v9 = vadd.f32 %v840_v34, %v644_v11  ;;  %1685 = vperm.xlu1 %4302, %v4589_v2   ;;  %v657_v51 = vmul.f32 %v4870_v40, %v4795_v53  ;;  %v659_v53 = vmul.f32 %v4870_v40, %v4801_v55  ;;  %v661_v55 = vmul.f32 %v4870_v40, %v4807_v57 }
  0xd9   : > { %v4889_v41 = vpop.permute.xlu1 %729  ;;  %965 = vperm.xlu0 %4351, %v4653_v18   ;;  %v734_v50 = vpop.permute.xlu0 %733  ;;  %v663_v57 = vmul.f32 %v4870_v40, %v4813_v59  ;;  %v665_v59 = vmul.f32 %v4870_v40, %v4819_v61  ;;  %v667_v61 = vmul.f32 %v4870_v40, %v4826_v15  ;;  %v669_v15 = vmul.f32 %v4870_v40, %v4832_v33 }
  0xda   : > { %7221 = vst [vmem:[#allocation24_spill] sm:$0xff] %v4886_v9  ;;  %7222 = vst [vmem:[#allocation25_spill] sm:$0xff] %v4889_v41  ;;  %v843_v16 = vmul.f32 %v4879_v4, %v734_v50  ;;  %v7167_v9 = vmov 5   ;;  %v671_v33 = vmul.f32 %v4870_v40, %v4839_v63 }
  0xdc   : > { %v4897_v43 = vadd.f32 %v843_v16, %v647_v36  ;;  %4303 = vset.pattern.permute.xlu1 %v7219_v17 }
  0xdd   : > { %v738_v11 = vpop.permute.xlu1 %737  ;;  %1305 = vperm.xlu1 %4303, %v4594_v3   ;;  %973 = vperm.xlu0 %4351, %v4661_v20   ;;  %v742_v34 = vpop.permute.xlu0 %741 }
  0xde   : > { %7223 = vst [vmem:[#allocation26_spill] sm:$0xff] %v4897_v43  ;;  %v844_v42 = vmul.f32 %v4879_v4, %v738_v11  ;;  %v845_v50 = vmul.f32 %v4879_v4, %v742_v34 }
  0xe0   : > { %v4908_v16 = vadd.f32 %v844_v42, %v648_v19  ;;  %v4910_v36 = vadd.f32 %v845_v50, %v649_v14  ;;  %v652_v14 = vmul.f32 %v4870_v40, %v4785_v49  ;;  %v654_v49 = vmul.f32 %v4870_v40, %v4792_v52 }
  0xe1   : > { %v746_v43 = vpop.permute.xlu1 %745  ;;  %4304 = vset.pattern.permute.xlu1 %v7167_v9  ;;  %981 = vperm.xlu0 %4351, %v4669_v22   ;;  %v750_v41 = vpop.permute.xlu0 %749  ;;  %v7227_v9 = vmov 7   ;;  %v656_v52 = vmul.f32 %v4870_v40, %v4798_v54  ;;  %v658_v54 = vmul.f32 %v4870_v40, %v4804_v56  ;;  %v660_v56 = vmul.f32 %v4870_v40, %v4810_v58 }
  0xe2   : > { %7224 = vst [vmem:[#allocation27_spill] sm:$0xff] %v4908_v16  ;;  %7225 = vst [vmem:[#allocation28_spill] sm:$0xff] %v4910_v36  ;;  %v846_v11 = vmul.f32 %v4879_v4, %v746_v43  ;;  %v847_v34 = vmul.f32 %v4879_v4, %v750_v41  ;;  %1497 = vperm.xlu1 %4304, %v4586_v1   ;;  %v662_v58 = vmul.f32 %v4870_v40, %v4816_v60 }
  0xe3   : > { %v664_v60 = vmul.f32 %v4870_v40, %v4822_v62  ;;  %v666_v62 = vmul.f32 %v4870_v40, %v4829_v0  ;;  %v668_v0 = vmul.f32 %v4870_v40, %v4835_v38  ;;  %v670_v38 = vmul.f32 %v4870_v40, %v4841_v37 }
  0xe4   : > { %v4921_v47 = vadd.f32 %v846_v11, %v650_v45  ;;  %v4923_v19 = vadd.f32 %v847_v34, %v651_v44 }
  0xe5   : > { %v754_v42 = vpop.permute.xlu1 %753  ;;  %985 = vperm.xlu0 %4351, %v4666_v21   ;;  %v758_v50 = vpop.permute.xlu0 %757 }
  0xe6   : > { %7226 = vst [vmem:[#allocation29_spill] sm:$0xff] %v4923_v19  ;;  %v848_v43 = vmul.f32 %v4879_v4, %v754_v42  ;;  %v849_v41 = vmul.f32 %v4879_v4, %v758_v50  ;;  %4305 = vset.pattern.permute.xlu1 %v7227_v9 }
  0xe7   : > { %1881 = vperm.xlu1 %4305, %v4589_v2  }
  0xe8   : > { %v4934_v45 = vadd.f32 %v848_v43, %v652_v14  ;;  %v4936_v44 = vadd.f32 %v849_v41, %v653_v46 }
  0xe9   : > { %v762_v11 = vpop.permute.xlu1 %761  ;;  %989 = vperm.xlu0 %4351, %v4677_v24   ;;  %v766_v34 = vpop.permute.xlu0 %765 }
  0xea   : > { %7228 = vst [vmem:[#allocation30_spill] sm:$0xff] %v4934_v45  ;;  %v850_v42 = vmul.f32 %v4879_v4, %v762_v11  ;;  %v851_v50 = vmul.f32 %v4879_v4, %v766_v34 }
  0xeb   : > { %4306 = vset.pattern.permute.xlu1 %v7213_v39 }
  0xec   : > { %v4946_v14 = vadd.f32 %v850_v42, %v654_v49  ;;  %v4948_v46 = vadd.f32 %v851_v50, %v655_v48  ;;  %1117 = vperm.xlu1 %4306, %v4602_v5   ;;  %v7232_v42 = vmov 5  }
  0xed   : > { %v770_v43 = vpop.permute.xlu1 %769  ;;  %993 = vperm.xlu0 %4351, %v4674_v23   ;;  %v774_v41 = vpop.permute.xlu0 %773 }
  0xee   : > { %7229 = vst [vmem:[#allocation31_spill] sm:$0xff] %v4946_v14  ;;  %7230 = vst [vmem:[#allocation32_spill] sm:$0xff] %v4948_v46  ;;  %v852_v11 = vmul.f32 %v4879_v4, %v770_v43  ;;  %v853_v34 = vmul.f32 %v4879_v4, %v774_v41 }
  0xf0   : > { %v4958_v49 = vadd.f32 %v852_v11, %v656_v52  ;;  %v4960_v48 = vadd.f32 %v853_v34, %v657_v51  ;;  %4308 = vset.pattern.permute.xlu1 %v7232_v42  ;;  %v7235_v34 = vmov 6  }
  0xf1   : > { %v778_v50 = vpop.permute.xlu1 %777  ;;  %1501 = vperm.xlu1 %4308, %v4594_v3   ;;  %997 = vperm.xlu0 %4351, %v4685_v26   ;;  %v782_v46 = vpop.permute.xlu0 %781 }
  0xf2   : > { %7231 = vst [vmem:[#allocation33_spill] sm:$0xff] %v4960_v48  ;;  %v854_v43 = vmul.f32 %v4879_v4, %v778_v50  ;;  %v855_v41 = vmul.f32 %v4879_v4, %v782_v46 }
  0xf4   : > { %v4971_v52 = vadd.f32 %v854_v43, %v658_v54  ;;  %v4973_v51 = vadd.f32 %v855_v41, %v659_v53 }
  0xf5   : > { %v786_v11 = vpop.permute.xlu1 %785  ;;  %4309 = vset.pattern.permute.xlu1 %v7235_v34  ;;  %1001 = vperm.xlu0 %4351, %v4682_v25   ;;  %v790_v48 = vpop.permute.xlu0 %789 }
  0xf6   : > { %7233 = vst [vmem:[#allocation34_spill] sm:$0xff] %v4971_v52  ;;  %7234 = vst [vmem:[#allocation35_spill] sm:$0xff] %v4973_v51  ;;  %v856_v50 = vmul.f32 %v4879_v4, %v786_v11  ;;  %v857_v46 = vmul.f32 %v4879_v4, %v790_v48  ;;  %1693 = vperm.xlu1 %4309, %v4586_v1   ;;  %v7251_v52 = vld [vmem:[#allocation3_spill] sm:$0xff] }
  0xf8   : > { %v4984_v54 = vadd.f32 %v856_v50, %v660_v56  ;;  %v4986_v53 = vadd.f32 %v857_v46, %v661_v55 }
  0xf9   : > { %v794_v43 = vpop.permute.xlu1 %793  ;;  %1005 = vperm.xlu0 %4351, %v4693_v28   ;;  %v798_v41 = vpop.permute.xlu0 %797 }
  0xfa   : > { %7236 = vst [vmem:[#allocation36_spill] sm:$0xff] %v4984_v54  ;;  %7237 = vst [vmem:[#allocation37_spill] sm:$0xff] %v4986_v53  ;;  %v858_v11 = vmul.f32 %v4879_v4, %v794_v43  ;;  %v859_v48 = vmul.f32 %v4879_v4, %v798_v41  ;;  %4310 = vset.pattern.permute.xlu1 %v7213_v39  ;;  %v7247_v53 = vld [vmem:[#allocation4_spill] sm:$0xff] }
  0xfb   : > { %1121 = vperm.xlu1 %4310, %v4613_v8  }
  0xfc   : > { %v4997_v56 = vadd.f32 %v858_v11, %v662_v58  ;;  %v4999_v55 = vadd.f32 %v859_v48, %v663_v57 }
  0xfd   : > { %v802_v28 = vpop.permute.xlu1 %801  ;;  %1009 = vperm.xlu0 %4351, %v4690_v27   ;;  %v806_v50 = vpop.permute.xlu0 %805 }
  0xfe   : > { %7238 = vst [vmem:[#allocation38_spill] sm:$0xff] %v4997_v56  ;;  %v860_v46 = vmul.f32 %v4879_v4, %v802_v28  ;;  %v861_v43 = vmul.f32 %v4879_v4, %v806_v50 }
  0xff   : > { %4311 = vset.pattern.permute.xlu1 %v7219_v17 }
 0x100   : > { %v5009_v58 = vadd.f32 %v860_v46, %v664_v60  ;;  %v5011_v41 = vadd.f32 %v861_v43, %v665_v59  ;;  %1313 = vperm.xlu1 %4311, %v4602_v5  }
 0x101   : > { %v810_v27 = vpop.permute.xlu1 %809  ;;  %1013 = vperm.xlu0 %4351, %v4701_v30   ;;  %v814_v57 = vpop.permute.xlu0 %813 }
 0x102   : > { %v862_v11 = vmul.f32 %v4879_v4, %v810_v27  ;;  %v863_v48 = vmul.f32 %v4879_v4, %v814_v57 }
 0x104   : > { %v5021_v60 = vadd.f32 %v862_v11, %v666_v62  ;;  %v5023_v28 = vadd.f32 %v863_v48, %v667_v61  ;;  %4312 = vset.pattern.permute.xlu1 %v7235_v34 }
 0x105   : > { %v818_v50 = vpop.permute.xlu1 %817  ;;  %1697 = vperm.xlu1 %4312, %v4594_v3   ;;  %1017 = vperm.xlu0 %4351, %v4698_v29   ;;  %v822_v59 = vpop.permute.xlu0 %821 }
 0x106   : > { %v864_v46 = vmul.f32 %v4879_v4, %v818_v50  ;;  %v865_v43 = vmul.f32 %v4879_v4, %v822_v59 }
 0x108   : > { %v5034_v62 = vadd.f32 %v864_v46, %v668_v0  ;;  %v5036_v27 = vadd.f32 %v865_v43, %v669_v15 }
 0x109   : > { %v826_v57 = vpop.permute.xlu1 %825  ;;  %4313 = vset.pattern.permute.xlu1 %v7227_v9  ;;  %1021 = vperm.xlu0 %4351, %v4709_v32   ;;  %v830_v29 = vpop.permute.xlu0 %829 }
 0x10a   : > { %v866_v61 = vmul.f32 %v4879_v4, %v826_v57  ;;  %v867_v11 = vmul.f32 %v4879_v4, %v830_v29  ;;  %1889 = vperm.xlu1 %4313, %v4586_v1   ;;  %v7169_v29 = vmov 0.0  }
 0x10b   : > { %427 = vst.msk [vmem:[#allocation2 + $0x30] sm:$0xff] %vm419_vm0, %v7169_v29  ;;  %428 = vst.msk [vmem:[#allocation2 + $0x38] sm:$0xff] %vm419_vm0, %v7169_v29  ;;  %4206 = vmatprep.subr.mxu0 %v7169_v29 }
 0x10c   : > { %v5045_v37 = vadd.f32 %v866_v61, %v670_v38  ;;  %v5047_v48 = vadd.f32 %v867_v11, %v671_v33  ;;  %429 = vst.msk [vmem:[#allocation2 + $0x40] sm:$0x3] %vm422_vm1, %v7169_v29  ;;  %423 = vst.msk [vmem:[#allocation2 + $0x10] sm:$0x3] %vm422_vm1, %v7169_v29 }
 0x10d   : > { %1025 = vperm.xlu0 %4351, %v4706_v31   ;;  %420 = vst.msk [vmem:[#allocation2] sm:$0xff] %vm419_vm0, %v7169_v29  ;;  %421 = vst.msk [vmem:[#allocation2 + $0x8] sm:$0xff] %vm419_vm0, %v7169_v29 }
 0x10e   : > { %4314 = vset.pattern.permute.xlu1 %v7219_v17  ;;  %v5051_v0 = vpop.permute.xlu1 %901  ;;  %v5053_v32 = vpop.permute.xlu0 %1309  ;;  %424 = vst.msk [vmem:[#allocation2 + $0x18] sm:$0xff] %vm419_vm0, %v7169_v29  ;;  %425 = vst.msk [vmem:[#allocation2 + $0x20] sm:$0xff] %vm419_vm0, %v7169_v29 }
 0x10f   : > { %1317 = vperm.xlu1 %4314, %v4613_v8   ;;  %426 = vst.msk [vmem:[#allocation2 + $0x28] sm:$0x3] %vm422_vm1, %v7169_v29  ;;  %432 = vst.msk [vmem:[#allocation2 + $0x58] sm:$0x3] %vm422_vm1, %v7169_v29 }
 0x110   : > { %430 = vst.msk [vmem:[#allocation2 + $0x48] sm:$0xff] %vm419_vm0, %v7169_v29  ;;  %431 = vst.msk [vmem:[#allocation2 + $0x50] sm:$0xff] %vm419_vm0, %v7169_v29 }
 0x111   : > { %4400 = vset.pattern.permute.xlu0 %v7213_v39  ;;  %433 = vst.msk [vmem:[#allocation2 + $0x60] sm:$0xff] %vm419_vm0, %v7169_v29  ;;  %434 = vst.msk [vmem:[#allocation2 + $0x68] sm:$0xff] %vm419_vm0, %v7169_v29 }
 0x112   : > { %v5057_v63 = vpop.permute.xlu1 %909  ;;  %1097 = vperm.xlu0 %4400, %v4589_v2   ;;  %v5060_v50 = vpop.permute.xlu0 %1321  ;;  %435 = vst.msk [vmem:[#allocation2 + $0x70] sm:$0x3] %vm422_vm1, %v7169_v29  ;;  %438 = vst.msk [vmem:[#allocation2 + $0x88] sm:$0x3] %vm422_vm1, %v7169_v29 }
 0x113   : > { %4315 = vset.pattern.permute.xlu1 %v7232_v42  ;;  %436 = vst.msk [vmem:[#allocation2 + $0x78] sm:$0xff] %vm419_vm0, %v7169_v29  ;;  %437 = vst.msk [vmem:[#allocation2 + $0x80] sm:$0xff] %vm419_vm0, %v7169_v29 }
 0x114   : > { %1509 = vperm.xlu1 %4315, %v4602_v5   ;;  %439 = vst.msk [vmem:[#allocation2 + $0x90] sm:$0xff] %vm419_vm0, %v7169_v29  ;;  %440 = vst.msk [vmem:[#allocation2 + $0x98] sm:$0xff] %vm419_vm0, %v7169_v29 }
 0x115   : > { %441 = vst.msk [vmem:[#allocation2 + $0xa0] sm:$0x3] %vm422_vm1, %v7169_v29  ;;  %444 = vst.msk [vmem:[#allocation2 + $0xb8] sm:$0x3] %vm422_vm1, %v7169_v29 }
 0x116   : > { %v5064_v59 = vpop.permute.xlu1 %913  ;;  %1105 = vperm.xlu0 %4400, %v4586_v1   ;;  %v5067_v15 = vpop.permute.xlu0 %1333  ;;  %442 = vst.msk [vmem:[#allocation2 + $0xa8] sm:$0xff] %vm419_vm0, %v7169_v29  ;;  %443 = vst.msk [vmem:[#allocation2 + $0xb0] sm:$0xff] %vm419_vm0, %v7169_v29 }
 0x117   : > { %7239 = vst [vmem:[#allocation39_spill] sm:$0xff] %v5067_v15  ;;  %445 = vst.msk [vmem:[#allocation2 + $0xc0] sm:$0xff] %vm419_vm0, %v7169_v29  ;;  %v7264_v15 = vld [vmem:[#allocation8_spill] sm:$0xff] }
 0x118   : > { %4316 = vset.pattern.permute.xlu1 %v7227_v9  ;;  %446 = vst.msk [vmem:[#allocation2 + $0xc8] sm:$0xff] %vm419_vm0, %v7169_v29  ;;  %448 = vst.msk [vmem:[#allocation2 + $0xd8] sm:$0xff] %vm419_vm0, %v7169_v29 }
 0x119   : > { %1893 = vperm.xlu1 %4316, %v4594_v3   ;;  %447 = vst.msk [vmem:[#allocation2 + $0xd0] sm:$0x3] %vm422_vm1, %v7169_v29  ;;  %450 = vst.msk [vmem:[#allocation2 + $0xe8] sm:$0x3] %vm422_vm1, %v7169_v29 }
 0x11a   : > { %v5071_v46 = vpop.permute.xlu1 %921  ;;  %1113 = vperm.xlu0 %4400, %v4605_v6   ;;  %v5074_v43 = vpop.permute.xlu0 %1345  ;;  %449 = vst.msk [vmem:[#allocation2 + $0xe0] sm:$0xff] %vm419_vm0, %v7169_v29  ;;  %451 = vst.msk [vmem:[#allocation2 + $0xf0] sm:$0xff] %vm419_vm0, %v7169_v29 }
 0x11b   : > { %7240 = vst [vmem:[#allocation40_spill] sm:$0xff] %v5074_v43  ;;  %452 = vst.msk [vmem:[#allocation2 + $0xf8] sm:$0xff] %vm419_vm0, %v7169_v29 }
 0x11c   : > { %453 = vst.msk [vmem:[#allocation2 + $0x100] sm:$0x3] %vm422_vm1, %v7169_v29  ;;  %456 = vst.msk [vmem:[#allocation2 + $0x118] sm:$0x3] %vm422_vm1, %v7169_v29 }
 0x11d   : > { %4317 = vset.pattern.permute.xlu1 %v7213_v39  ;;  %454 = vst.msk [vmem:[#allocation2 + $0x108] sm:$0xff] %vm419_vm0, %v7169_v29  ;;  %455 = vst.msk [vmem:[#allocation2 + $0x110] sm:$0xff] %vm419_vm0, %v7169_v29 }
 0x11e   : > { %1129 = vperm.xlu1 %4317, %v4621_v10   ;;  %v5078_v38 = vpop.permute.xlu1 %929  ;;  %1125 = vperm.xlu0 %4400, %v4610_v7   ;;  %v5081_v1 = vpop.permute.xlu0 %1357  ;;  %457 = vst.msk [vmem:[#allocation2 + $0x120] sm:$0xff] %vm419_vm0, %v7169_v29  ;;  %458 = vst.msk [vmem:[#allocation2 + $0x128] sm:$0xff] %vm419_vm0, %v7169_v29 }
 0x11f   : > { %7241 = vst [vmem:[#allocation41_spill] sm:$0xff] %v5081_v1  ;;  %459 = vst.msk [vmem:[#allocation2 + $0x130] sm:$0x3] %vm422_vm1, %v7169_v29 }
 0x120   : > { %460 = vst.msk [vmem:[#allocation2 + $0x138] sm:$0xff] %vm419_vm0, %v7169_v29  ;;  %461 = vst.msk [vmem:[#allocation2 + $0x140] sm:$0xff] %vm419_vm0, %v7169_v29 }
 0x121   : > { %462 = vst.msk [vmem:[#allocation2 + $0x148] sm:$0x3] %vm422_vm1, %v7169_v29  ;;  %465 = vst.msk [vmem:[#allocation2 + $0x160] sm:$0x3] %vm422_vm1, %v7169_v29 }
 0x122   : > { %4318 = vset.pattern.permute.xlu1 %v7232_v42  ;;  %v5084_v57 = vpop.permute.xlu1 %937  ;;  %1137 = vperm.xlu0 %4400, %v4629_v12   ;;  %463 = vst.msk [vmem:[#allocation2 + $0x150] sm:$0xff] %vm419_vm0, %v7169_v29  ;;  %464 = vst.msk [vmem:[#allocation2 + $0x158] sm:$0xff] %vm419_vm0, %v7169_v29 }
 0x123   : > { %7242 = vst [vmem:[#allocation42_spill] sm:$0xff] %v5084_v57  ;;  %1513 = vperm.xlu1 %4318, %v4613_v8   ;;  %v5088_v3 = vpop.permute.xlu0 %1885  ;;  %466 = vst.msk [vmem:[#allocation2 + $0x168] sm:$0xff] %vm419_vm0, %v7169_v29 }
 0x124   : > { %7243 = vst [vmem:[#allocation43_spill] sm:$0xff] %v5088_v3  ;;  %467 = vst.msk [vmem:[#allocation2 + $0x170] sm:$0xff] %vm419_vm0, %v7169_v29  ;;  %v7267_v3 = vld [vmem:[#allocation9_spill] sm:$0xff] }
 0x125   : > { %468 = vst.msk [vmem:[#allocation2 + $0x178] sm:$0x3] %vm422_vm1, %v7169_v29  ;;  %471 = vst.msk [vmem:[#allocation2 + $0x190] sm:$0x3] %vm422_vm1, %v7169_v29 }
 0x126   : > { %469 = vst.msk [vmem:[#allocation2 + $0x180] sm:$0xff] %vm419_vm0, %v7169_v29  ;;  %470 = vst.msk [vmem:[#allocation2 + $0x188] sm:$0xff] %vm419_vm0, %v7169_v29  ;;  %v5199_v33 = vpop.permute.xlu1 %945  ;;  %1149 = vperm.xlu0 %4400, %v4634_v13  }
 0x127   : > { %472 = vst.msk [vmem:[#allocation2 + $0x198] sm:$0xff] %vm419_vm0, %v7169_v29  ;;  %473 = vst.msk [vmem:[#allocation2 + $0x1a0] sm:$0xff] %vm419_vm0, %v7169_v29  ;;  %4319 = vset.pattern.permute.xlu1 %v7235_v34  ;;  %v5203_v61 = vpop.permute.xlu0 %1897 }
 0x128   : > { %474 = vst.msk [vmem:[#allocation2 + $0x1a8] sm:$0x3] %vm422_vm1, %v7169_v29  ;;  %7244 = vst [vmem:[#allocation44_spill] sm:$0xff] %v5199_v33  ;;  %1705 = vperm.xlu1 %4319, %v4602_v5  }
 0x129   : > { %7245 = vst [vmem:[#allocation45_spill] sm:$0xff] %v5203_v61 }
 0x12a   : > { %v5206_v11 = vpop.permute.xlu1 %953  ;;  %1161 = vperm.xlu0 %4400, %v4653_v18  }
 0x12b   : > { %v5209_v56 = vpop.permute.xlu0 %1909 }
 0x12c   : > { %7246 = vst [vmem:[#allocation46_spill] sm:$0xff] %v5209_v56  ;;  %4320 = vset.pattern.permute.xlu1 %v7213_v39 }
 0x12d   : > { %1133 = vperm.xlu1 %4320, %v7247_v53  }
 0x12e   : > { %v5213_v29 = vpop.permute.xlu1 %961  ;;  %1221 = vperm.xlu0 %4400, %v4706_v31  }
 0x12f   : > { %7248 = vst [vmem:[#allocation4_spill] sm:$0xff] %v5213_v29  ;;  %v5216_v54 = vpop.permute.xlu0 %1921 }
 0x130   : > { %7249 = vst [vmem:[#allocation47_spill] sm:$0xff] %v5216_v54 }
 0x131   : > { %4321 = vset.pattern.permute.xlu1 %v7219_v17 }
 0x132   : > { %1325 = vperm.xlu1 %4321, %v4621_v10   ;;  %v5220_v51 = vpop.permute.xlu1 %969  ;;  %4405 = vset.pattern.permute.xlu0 %v7235_v34 }
 0x133   : > { %7250 = vst [vmem:[#allocation48_spill] sm:$0xff] %v5220_v51  ;;  %1689 = vperm.xlu0 %4405, %v7251_v52   ;;  %v5224_v1 = vpop.permute.xlu0 %1933 }
 0x134   : > { %7252 = vst [vmem:[#allocation3_spill] sm:$0xff] %v5224_v1 }
 0x136   : > { %4322 = vset.pattern.permute.xlu1 %v7235_v34  ;;  %v5227_v14 = vpop.permute.xlu1 %977 }
 0x137   : > { %7253 = vst [vmem:[#allocation49_spill] sm:$0xff] %v5227_v14  ;;  %1709 = vperm.xlu1 %4322, %v4613_v8   ;;  %1701 = vperm.xlu0 %4405, %v4605_v6  }
 0x138   : > { %v5231_v31 = vpop.permute.xlu0 %905 }
 0x13b   : > { %4323 = vset.pattern.permute.xlu1 %v7227_v9  ;;  %v5234_v29 = vpop.permute.xlu1 %1101  ;;  %1713 = vperm.xlu0 %4405, %v4610_v7  }
 0x13c   : > { %1901 = vperm.xlu1 %4323, %v4602_v5   ;;  %v5238_v51 = vpop.permute.xlu0 %917 }
 0x13f   : > { %1725 = vperm.xlu0 %4405, %v4629_v12  }
 0x140   : > { %4324 = vset.pattern.permute.xlu1 %v7219_v17  ;;  %v5242_v14 = vpop.permute.xlu1 %1293  ;;  %v5244_v45 = vpop.permute.xlu0 %925 }
 0x141   : > { %1329 = vperm.xlu1 %4324, %v7247_v53  }
 0x143   : > { %1737 = vperm.xlu0 %4405, %v4634_v13  }
 0x144   : > { %v5248_v19 = vpop.permute.xlu1 %1297  ;;  %v5250_v33 = vpop.permute.xlu0 %933 }
 0x145   : > { %7254 = vst [vmem:[#allocation50_spill] sm:$0xff] %v5250_v33  ;;  %4325 = vset.pattern.permute.xlu1 %v7232_v42  ;;  %v7256_v33 = vld [vmem:[#allocation5_spill] sm:$0xff] }
 0x146   : > { %1521 = vperm.xlu1 %4325, %v4621_v10  }
 0x147   : > { %1797 = vperm.xlu0 %4405, %v4701_v30  }
 0x148   : > { %v5255_v5 = vpop.permute.xlu0 %941 }
 0x149   : > { %v5257_v36 = vpop.permute.xlu1 %1109 }
 0x14a   : > { %4326 = vset.pattern.permute.xlu1 %v7227_v9 }
 0x14b   : > { %1905 = vperm.xlu1 %4326, %v4613_v8   ;;  %4408 = vset.pattern.permute.xlu0 %v7232_v42 }
 0x14c   : > { %1489 = vperm.xlu0 %4408, %v4589_v2   ;;  %v5263_v57 = vpop.permute.xlu0 %949 }
 0x14d   : > { %7255 = vst [vmem:[#allocation51_spill] sm:$0xff] %v5263_v57 }
 0x14e   : > { %v5265_v16 = vpop.permute.xlu1 %1301 }
 0x14f   : > { %4327 = vset.pattern.permute.xlu1 %v7213_v39 }
 0x150   : > { %1141 = vperm.xlu1 %4327, %v7256_v33   ;;  %1493 = vperm.xlu0 %4408, %v7251_v52   ;;  %v5270_v30 = vpop.permute.xlu0 %957 }
 0x151   : > { %7257 = vst [vmem:[#allocation5_spill] sm:$0xff] %v5270_v30 }
 0x153   : > { %v5272_v1 = vpop.permute.xlu1 %1685 }
 0x154   : > { %4328 = vset.pattern.permute.xlu1 %v7232_v42  ;;  %1505 = vperm.xlu0 %4408, %v4605_v6   ;;  %v5276_v8 = vpop.permute.xlu0 %965  ;;  %v7260_v6 = vld [vmem:[#allocation6_spill] sm:$0xff] }
 0x155   : > { %1525 = vperm.xlu1 %4328, %v7247_v53  }
 0x158   : > { %v5279_v2 = vpop.permute.xlu1 %1305  ;;  %1517 = vperm.xlu0 %4408, %v4610_v7   ;;  %v5282_v57 = vpop.permute.xlu0 %973 }
 0x159   : > { %7258 = vst [vmem:[#allocation52_spill] sm:$0xff] %v5282_v57  ;;  %4329 = vset.pattern.permute.xlu1 %v7235_v34  ;;  %v7171_v57 = vsub.s32 2, %v4845_v35 }
 0x15a   : > { %1717 = vperm.xlu1 %4329, %v4621_v10  }
 0x15c   : > { %1529 = vperm.xlu0 %4408, %v4629_v12   ;;  %v5287_v52 = vpop.permute.xlu0 %981 }
 0x15d   : > { %7259 = vst [vmem:[#allocation53_spill] sm:$0xff] %v5287_v52  ;;  %v5289_v30 = vpop.permute.xlu1 %1497  ;;  %v7263_v52 = vld [vmem:[#allocation20_spill] sm:$0xff] }
 0x15e   : > { %4330 = vset.pattern.permute.xlu1 %v7213_v39  ;;  %v5307_v43 = vrot.slane %v7263_v52, %v7171_v57 }
 0x15f   : > { %1145 = vperm.xlu1 %4330, %v7260_v6  }
 0x160   : > { %1541 = vperm.xlu0 %4408, %v4634_v13   ;;  %v5294_v54 = vpop.permute.xlu0 %985 }
 0x161   : > { %7261 = vst [vmem:[#allocation6_spill] sm:$0xff] %v5294_v54 }
 0x162   : > { %v5296_v7 = vpop.permute.xlu1 %1881 }
 0x163   : > { %4331 = vset.pattern.permute.xlu1 %v7219_v17 }
 0x164   : > { %1337 = vperm.xlu1 %4331, %v7256_v33   ;;  %1553 = vperm.xlu0 %4408, %v4653_v18   ;;  %v5302_v12 = vpop.permute.xlu0 %989 }
 0x165   : > { %7262 = vst [vmem:[#allocation54_spill] sm:$0xff] %v5302_v12 }
 0x167   : > { %v5309_v13 = vpop.permute.xlu1 %1117 }
 0x168   : > { %4332 = vset.pattern.permute.xlu1 %v7235_v34  ;;  %v994_v54 = vpop.permute.xlu0 %993  ;;  %1557 = vperm.xlu0 %4408, %v7264_v15  }
 0x169   : > { %v1055_v56 = vmul.f32 %v5307_v43, %v994_v54  ;;  %1721 = vperm.xlu1 %4332, %v7247_v53  }
 0x16b   : > { %v5316_v18 = vadd.f32 %v1055_v56, %v4999_v55 }
 0x16c   : > { %v5318_v12 = vpop.permute.xlu1 %1501  ;;  %v998_v61 = vpop.permute.xlu0 %997  ;;  %1561 = vperm.xlu0 %4408, %v4661_v20  }
 0x16d   : > { %7265 = vst [vmem:[#allocation20_spill] sm:$0xff] %v5316_v18  ;;  %v1056_v57 = vmul.f32 %v5307_v43, %v998_v61  ;;  %4333 = vset.pattern.permute.xlu1 %v7227_v9  ;;  %v5460_v18 = vld [vmem:[%s4583_s22 + $0xe0] sm:$0xff] }
 0x16e   : > { %1913 = vperm.xlu1 %4333, %v4621_v10  }
 0x16f   : > { %v5325_v15 = vadd.f32 %v1056_v57, %v5009_v58 }
 0x170   : > { %v1002_v54 = vpop.permute.xlu0 %1001  ;;  %1565 = vperm.xlu0 %4408, %v7267_v3  }
 0x171   : > { %7266 = vst [vmem:[#allocation8_spill] sm:$0xff] %v5325_v15  ;;  %v1057_v53 = vmul.f32 %v5307_v43, %v1002_v54  ;;  %v5329_v56 = vpop.permute.xlu1 %1693  ;;  %v4424_v54 = vld [vmem:[%s4583_s22 + $0x48] sm:$0xff] }
 0x172   : > { %4334 = vset.pattern.permute.xlu1 %v7219_v17 }
 0x173   : > { %v5333_v20 = vadd.f32 %v1057_v53, %v5011_v41  ;;  %1341 = vperm.xlu1 %4334, %v7260_v6  }
 0x174   : > { %v1006_v55 = vpop.permute.xlu0 %1005  ;;  %1569 = vperm.xlu0 %4408, %v4669_v22  }
 0x175   : > { %7268 = vst [vmem:[#allocation9_spill] sm:$0xff] %v5333_v20  ;;  %v1058_v10 = vmul.f32 %v5307_v43, %v1006_v55  ;;  %v7272_v55 = vld [vmem:[#allocation7_spill] sm:$0xff] }
 0x176   : > { %v5338_v58 = vpop.permute.xlu1 %1121 }
 0x177   : > { %v5341_v57 = vadd.f32 %v1058_v10, %v5021_v60  ;;  %4335 = vset.pattern.permute.xlu1 %v7232_v42 }
 0x178   : > { %1533 = vperm.xlu1 %4335, %v7256_v33   ;;  %v1010_v3 = vpop.permute.xlu0 %1009  ;;  %1573 = vperm.xlu0 %4408, %v4666_v21  }
 0x179   : > { %7269 = vst [vmem:[#allocation55_spill] sm:$0xff] %v5341_v57  ;;  %v1059_v41 = vmul.f32 %v5307_v43, %v1010_v3 }
 0x17b   : > { %v5348_v61 = vadd.f32 %v1059_v41, %v5023_v28  ;;  %v5350_v22 = vpop.permute.xlu1 %1313 }
 0x17c   : > { %4336 = vset.pattern.permute.xlu1 %v7227_v9  ;;  %v1014_v6 = vpop.permute.xlu0 %1013  ;;  %1577 = vperm.xlu0 %4408, %v4677_v24  }
 0x17d   : > { %7270 = vst [vmem:[#allocation56_spill] sm:$0xff] %v5348_v61  ;;  %v1060_v60 = vmul.f32 %v5307_v43, %v1014_v6  ;;  %1917 = vperm.xlu1 %4336, %v4424_v54   ;;  %v7274_v6 = vld [vmem:[#allocation22_spill] sm:$0xff] }
 0x17f   : > { %v5357_v33 = vadd.f32 %v1060_v60, %v5034_v62  ;;  %v7172_v62 = vsub.s32 3, %v4845_v35  ;;  %v839_v60 = vmul.f32 %v4879_v4, %v7274_v6 }
 0x180   : > { %v1698_v21 = vpop.permute.xlu1 %1697  ;;  %v1018_v53 = vpop.permute.xlu0 %1017  ;;  %1581 = vperm.xlu0 %4408, %v4674_v23   ;;  %v7173_v23 = vsub.s32 4, %v4845_v35 }
 0x181   : > { %7271 = vst [vmem:[#allocation57_spill] sm:$0xff] %v5357_v33  ;;  %v1061_v28 = vmul.f32 %v5307_v43, %v1018_v53  ;;  %4337 = vset.pattern.permute.xlu1 %v7213_v39  ;;  %v1034_v33 = vmul.f32 %v5307_v43, %v5057_v63 }
 0x182   : > { %1153 = vperm.xlu1 %4337, %v7272_v55   ;;  %v1035_v55 = vmul.f32 %v5307_v43, %v5064_v59  ;;  %v5397_v6 = vrot.slane %v7263_v52, %v7173_v23  ;;  %v5415_v23 = vld [vmem:[%s4583_s22 + $0xd0] sm:$0xff] }
 0x183   : > { %v5364_v24 = vadd.f32 %v1061_v28, %v5036_v27  ;;  %v5379_v27 = vld [vmem:[%s4583_s22 + $0x60] sm:$0xff] }
 0x184   : > { %v1022_v10 = vpop.permute.xlu0 %1021  ;;  %1585 = vperm.xlu0 %4408, %v4685_v26   ;;  %v7276_v26 = vld [vmem:[#allocation12_spill] sm:$0xff] }
 0x185   : > { %7273 = vst [vmem:[#allocation7_spill] sm:$0xff] %v5364_v24  ;;  %v1062_v3 = vmul.f32 %v5307_v43, %v1022_v10  ;;  %v5369_v41 = vpop.permute.xlu1 %1889  ;;  %v643_v53 = vmul.f32 %v4870_v40, %v7276_v26  ;;  %v7277_v10 = vld [vmem:[#allocation21_spill] sm:$0xff]  ;;  %v5411_v24 = vld [vmem:[%s4583_s22 + $0x58] sm:$0xff]  ;;  %7282 = vst [vmem:[#allocation12_spill] sm:$0xff] %v5460_v18 }
 0x186   : > { %4338 = vset.pattern.permute.xlu1 %v7232_v42 }
 0x187   : > { %v5376_v54 = vadd.f32 %v1062_v3, %v5045_v37  ;;  %1537 = vperm.xlu1 %4338, %v5379_v27   ;;  %v5390_v37 = vrot.slane %v7263_v52, %v7172_v62 }
 0x188   : > { %v1026_v28 = vpop.permute.xlu0 %1025  ;;  %1589 = vperm.xlu0 %4408, %v4682_v25   ;;  %v871_v25 = vadd.f32 %v839_v60, %v643_v53  ;;  %v1427_v60 = vmul.f32 %v5397_v6, %v5279_v2 }
 0x189   : > { %7275 = vst [vmem:[#allocation22_spill] sm:$0xff] %v5376_v54  ;;  %v1063_v3 = vmul.f32 %v5307_v43, %v1026_v28  ;;  %v1231_v59 = vmul.f32 %v5390_v37, %v5257_v36  ;;  %v838_v28 = vmul.f32 %v4879_v4, %v7277_v10 }
 0x18a   : > { %v5399_v26 = vpop.permute.xlu1 %1317  ;;  %v1067_v36 = vadd.f32 %v1035_v55, %v871_v25  ;;  %v7280_v25 = vsub.s32 6, %v4845_v35 }
 0x18b   : > { %v5405_v62 = vadd.f32 %v1063_v3, %v5047_v48  ;;  %4339 = vset.pattern.permute.xlu1 %v7235_v34  ;;  %v7278_v48 = vsub.s32 5, %v4845_v35  ;;  %v7279_v3 = vld [vmem:[#allocation10_spill] sm:$0xff] }
 0x18c   : > { %1729 = vperm.xlu1 %4339, %v5411_v24   ;;  %1593 = vperm.xlu0 %4408, %v5415_v23   ;;  %v642_v54 = vmul.f32 %v4870_v40, %v7279_v3  ;;  %v1263_v55 = vadd.f32 %v1231_v59, %v1067_v36  ;;  %v5435_v2 = vrot.slane %v7263_v52, %v7280_v25  ;;  %v5443_v3 = vld [vmem:[%s4583_s22 + $0xd8] sm:$0xff] }
 0x18d   : > { %v5423_v53 = vrot.slane %v7263_v52, %v7278_v48  ;;  %v5425_v10 = vpop.permute.xlu0 %1097  ;;  %v5448_v36 = vld [vmem:[%s4583_s22 + $0x78] sm:$0xff] }
 0x18e   : > { %v870_v20 = vadd.f32 %v838_v28, %v642_v54  ;;  %v1459_v63 = vadd.f32 %v1427_v60, %v1263_v55  ;;  %v1819_v59 = vmul.f32 %v5435_v2, %v1698_v21  ;;  %v7281_v54 = vsub.s32 7, %v4845_v35 }
 0x18f   : > { %v1623_v48 = vmul.f32 %v5423_v53, %v5318_v12  ;;  %v5439_v57 = vpop.permute.xlu1 %1509  ;;  %v1426_v60 = vmul.f32 %v5397_v6, %v5265_v16  ;;  %v5472_v16 = vld [vmem:[%s7130_s2] ss:$0 sm:$0xff] }
 0x190   : > { %4340 = vset.pattern.permute.xlu1 %v7213_v39  ;;  %1597 = vperm.xlu0 %4408, %v5443_v3   ;;  %v1066_v61 = vadd.f32 %v1034_v33, %v870_v20  ;;  %v5455_v28 = vrot.slane %v7263_v52, %v7281_v54  ;;  %v1622_v52 = vmul.f32 %v5423_v53, %v5289_v30 }
 0x191   : > { %1157 = vperm.xlu1 %4340, %v5448_v36   ;;  %v1106_v25 = vpop.permute.xlu0 %1105  ;;  %v1655_v15 = vadd.f32 %v1623_v48, %v1459_v63  ;;  %v5475_v48 = vld [vmem:[%s4583_s22 + $0x70] sm:$0xff]  ;;  %v1818_v63 = vmul.f32 %v5435_v2, %v5329_v56 }
 0x192   : > { %v1230_v12 = vmul.f32 %v5390_v37, %v1106_v25 }
 0x193   : > { %v1851_v20 = vadd.f32 %v1819_v59, %v1655_v15 }
 0x194   : > { %v1262_v55 = vadd.f32 %v1230_v12, %v1066_v61  ;;  %v1894_v21 = vpop.permute.xlu1 %1893  ;;  %1601 = vperm.xlu0 %4408, %v5460_v18   ;;  %v4432_v12 = vld [vmem:[%s4583_s22 + $0xf0] sm:$0xff]  ;;  %v5506_v18 = vld [vmem:[%s4583_s22 + $0xe8] sm:$0xff] }
 0x195   : > { %v2015_v33 = vmul.f32 %v5455_v28, %v1894_v21  ;;  %4341 = vset.pattern.permute.xlu1 %v7219_v17  ;;  %v5465_v25 = vpop.permute.xlu0 %1113  ;;  %7283 = vst [vmem:[#allocation21_spill] sm:$0xff] %v5506_v18 }
 0x196   : > { %v1458_v61 = vadd.f32 %v1426_v60, %v1262_v55  ;;  %1349 = vperm.xlu1 %4341, %v5475_v48   ;;  %v1042_v60 = vmul.f32 %v5307_v43, %v5255_v5  ;;  %v2014_v55 = vmul.f32 %v5455_v28, %v5369_v41 }
 0x197   : > { %v2047_v15 = vadd.f32 %v2015_v33, %v1851_v20  ;;  %v4433_v33 = vld [vmem:[%s4583_s22 + $0xf8] sm:$0xff] }
 0x198   : > { %v1654_v59 = vadd.f32 %v1622_v52, %v1458_v61  ;;  %1609 = vperm.xlu0 %4408, %v4432_v12   ;;  %v1074_v5 = vadd.f32 %v1042_v60, %v4921_v47  ;;  %v1048_v60 = vmul.f32 %v5307_v43, %v5276_v8 }
 0x199   : > { %v2086_v30 = vadd.f32 %v5472_v16, %v2047_v15  ;;  %v5482_v54 = vpop.permute.xlu1 %1129  ;;  %v5484_v21 = vpop.permute.xlu0 %1125  ;;  %v1045_v15 = vmul.f32 %v5307_v43, %v5206_v11 }
 0x19a   : > { %v1850_v35 = vadd.f32 %v1818_v63, %v1654_v59  ;;  %4342 = vset.pattern.permute.xlu1 %v7235_v34 }
 0x19b   : > { %v2118_v20 = vadd.f32 3.0, %v2086_v30  ;;  %1733 = vperm.xlu1 %4342, %v5379_v27   ;;  %v1077_v47 = vadd.f32 %v1045_v15, %v4936_v44  ;;  %v1080_v44 = vadd.f32 %v1048_v60, %v4958_v49  ;;  %v1037_v60 = vmul.f32 %v5307_v43, %v5071_v46 }
 0x19c   : > { %v2046_v56 = vadd.f32 %v2014_v55, %v1850_v35  ;;  %1613 = vperm.xlu0 %4408, %v4433_v33   ;;  %v1429_v46 = vmul.f32 %v5397_v6, %v5350_v22 }
 0x19d   : > { %v2150_v52 = vmax.f32 %v2118_v20, 0.0  ;;  %v1138_v61 = vpop.permute.xlu0 %1137 }
 0x19e   : > { %v2085_v12 = vadd.f32 %v5472_v16, %v2046_v56  ;;  %v1238_v41 = vmul.f32 %v5390_v37, %v1138_v61  ;;  %v5498_v63 = vpop.permute.xlu1 %1513 }
 0x19f   : > { %v2182_v59 = vmin.f32 %v2150_v52, 6.0  ;;  %4343 = vset.pattern.permute.xlu1 %v7227_v9 }
 0x1a0   : > { %v2117_v35 = vadd.f32 3.0, %v2085_v12  ;;  %v5501_v55 = vadd.f32 %v1238_v41, %v1074_v5  ;;  %1925 = vperm.xlu1 %4343, %v5411_v24   ;;  %4414 = vset.pattern.permute.xlu0 %v7227_v9 }
 0x1a1   : > { %v2214_v20 = vmul.f32 0.16666667, %v2182_v59  ;;  %v1150_v11 = vpop.permute.xlu0 %1149  ;;  %1997 = vperm.xlu0 %4414, %v5506_v18  }
 0x1a2   : > { %v2149_v56 = vmax.f32 %v2117_v35, 0.0  ;;  %v1241_v52 = vmul.f32 %v5390_v37, %v1150_v11 }
 0x1a3   : > { %v2246_v61 = vmul.f32 %v2214_v20, %v2086_v30  ;;  %v1706_v5 = vpop.permute.xlu1 %1705 }
 0x1a4   : > { %v2181_v41 = vmin.f32 %v2149_v56, 6.0  ;;  %v5513_v24 = vadd.f32 %v1241_v52, %v1077_v47  ;;  %4344 = vset.pattern.permute.xlu1 %v7219_v17  ;;  %v7284_v47 = vmov 1   ;;  %v7285_v56 = vld [vmem:[#allocation23_spill] sm:$0xff] }
 0x1a5   : > { %2279 = vst.msk [vmem:[#allocation2 + $0x39] sm:$0xff] %vm419_vm0, %v2246_v61  ;;  %1353 = vperm.xlu1 %4344, %v5448_v36   ;;  %v1162_v59 = vpop.permute.xlu0 %1161  ;;  %2005 = vperm.xlu0 %4414, %v4433_v33   ;;  %v841_v52 = vmul.f32 %v4879_v4, %v7285_v56  ;;  %v7286_v33 = vld [vmem:[#allocation14_spill] sm:$0xff]  ;;  %v1821_v56 = vmul.f32 %v5435_v2, %v1706_v5  ;;  %v7290_v5 = vld [vmem:[#allocation11_spill] sm:$0xff] }
 0x1a6   : > { %v2213_v15 = vmul.f32 0.16666667, %v2181_v41  ;;  %v1244_v8 = vmul.f32 %v5390_v37, %v1162_v59 }
 0x1a8   : > { %v2245_v35 = vmul.f32 %v2213_v15, %v2085_v12  ;;  %v5520_v11 = vadd.f32 %v1244_v8, %v1080_v44  ;;  %v5522_v30 = vpop.permute.xlu1 %1133  ;;  %v645_v12 = vmul.f32 %v4870_v40, %v7286_v33  ;;  %v1233_v44 = vmul.f32 %v5390_v37, %v5309_v13 }
 0x1a9   : > { %4345 = vset.pattern.permute.xlu1 %v7232_v42  ;;  %v1222_v20 = vpop.permute.xlu0 %1221  ;;  %4417 = vset.pattern.permute.xlu0 %v7284_v47 }
 0x1aa   : > { %2278 = vst.msk [vmem:[#allocation2 + $0x31] sm:$0xff] %vm419_vm0, %v2245_v35  ;;  %v1259_v49 = vmul.f32 %v5390_v37, %v1222_v20  ;;  %1545 = vperm.xlu1 %4345, %v5475_v48   ;;  %v873_v59 = vadd.f32 %v841_v52, %v645_v12  ;;  %v5555_v52 = vld [vmem:[%s4583_s22 + $0x88] sm:$0xff] }
 0x1ac   : > { %v5536_v61 = vadd.f32 %v1259_v49, %v5405_v62  ;;  %v1069_v8 = vadd.f32 %v1037_v60, %v873_v59  ;;  %v1625_v62 = vmul.f32 %v5423_v53, %v5439_v57  ;;  %v7288_v57 = vld [vmem:[#allocation15_spill] sm:$0xff]  ;;  %v7289_v59 = vld [vmem:[#allocation25_spill] sm:$0xff] }
 0x1ad   : > { %v5538_v41 = vpop.permute.xlu1 %1325  ;;  %v646_v60 = vmul.f32 %v4870_v40, %v7288_v57 }
 0x1ae   : > { %7287 = vst [vmem:[#allocation10_spill] sm:$0xff] %v5536_v61  ;;  %4346 = vset.pattern.permute.xlu1 %v7227_v9  ;;  %v5543_v15 = vpop.permute.xlu0 %1689  ;;  %v1265_v35 = vadd.f32 %v1233_v44, %v1069_v8  ;;  %v842_v44 = vmul.f32 %v4879_v4, %v7289_v59  ;;  %v640_v8 = vmul.f32 %v4870_v40, %v7290_v5 }
 0x1af   : > { %1929 = vperm.xlu1 %4346, %v5379_v27   ;;  %v1234_v59 = vmul.f32 %v5390_v37, %v5338_v58  ;;  %v7293_v58 = vld [vmem:[#allocation17_spill] sm:$0xff] }
 0x1b0   : > { %v1461_v13 = vadd.f32 %v1429_v46, %v1265_v35  ;;  %v7291_v46 = vld [vmem:[#allocation18_spill] sm:$0xff]  ;;  %v874_v57 = vadd.f32 %v842_v44, %v646_v60  ;;  %v7292_v60 = vld [vmem:[#allocation13_spill] sm:$0xff]  ;;  %v837_v61 = vmul.f32 %v4879_v4, %v7293_v58 }
 0x1b1   : > { %v836_v35 = vmul.f32 %v4879_v4, %v7291_v46  ;;  %v1032_v46 = vmul.f32 %v5307_v43, %v5051_v0  ;;  %v641_v44 = vmul.f32 %v4870_v40, %v7292_v60 }
 0x1b2   : > { %v1710_v20 = vpop.permute.xlu1 %1709  ;;  %v5550_v47 = vpop.permute.xlu0 %1701  ;;  %v1657_v27 = vadd.f32 %v1625_v62, %v1461_v13 }
 0x1b3   : > { %4347 = vset.pattern.permute.xlu1 %v7213_v39  ;;  %v868_v5 = vadd.f32 %v836_v35, %v640_v8  ;;  %v1228_v8 = vmul.f32 %v5390_v37, %v5425_v10  ;;  %v1822_v60 = vmul.f32 %v5435_v2, %v1710_v20  ;;  %v5605_v10 = vld [vmem:[%s4583_s22 + $0x90] sm:$0xff]  ;;  %v1036_v20 = vmul.f32 %v5307_v43, %v5238_v51 }
 0x1b4   : > { %1165 = vperm.xlu1 %4347, %v5555_v52   ;;  %v1853_v33 = vadd.f32 %v1821_v56, %v1657_v27  ;;  %v1038_v56 = vmul.f32 %v5307_v43, %v5244_v45 }
 0x1b6   : > { %v5558_v49 = vpop.permute.xlu0 %1713  ;;  %v1070_v45 = vadd.f32 %v1038_v56, %v874_v57  ;;  %v1064_v56 = vadd.f32 %v1032_v46, %v868_v5  ;;  %v1424_v46 = vmul.f32 %v5397_v6, %v5242_v14  ;;  %v1039_v14 = vmul.f32 %v5307_v43, %v5078_v38 }
 0x1b7   : > { %v1902_v22 = vpop.permute.xlu1 %1901 }
 0x1b8   : > { %v2017_v12 = vmul.f32 %v5455_v28, %v1902_v22  ;;  %4349 = vset.pattern.permute.xlu1 %v7232_v42  ;;  %v1266_v35 = vadd.f32 %v1234_v59, %v1070_v45  ;;  %v1626_v42 = vmul.f32 %v5423_v53, %v5498_v63  ;;  %v869_v59 = vadd.f32 %v837_v61, %v641_v44 }
 0x1b9   : > { %1549 = vperm.xlu1 %4349, %v5448_v36   ;;  %v1260_v63 = vadd.f32 %v1228_v8, %v1064_v56  ;;  %v1816_v8 = vmul.f32 %v5435_v2, %v5272_v1  ;;  %v1232_v56 = vmul.f32 %v5390_v37, %v5465_v25  ;;  %v1428_v25 = vmul.f32 %v5397_v6, %v5053_v32 }
 0x1ba   : > { %v2049_v62 = vadd.f32 %v2017_v12, %v1853_v33  ;;  %v5571_v13 = vpop.permute.xlu0 %1725 }
 0x1bc   : > { %v2088_v27 = vadd.f32 %v5472_v16, %v2049_v62  ;;  %v5576_v22 = vpop.permute.xlu1 %1329  ;;  %v1430_v62 = vmul.f32 %v5397_v6, %v5399_v26  ;;  %v1033_v26 = vmul.f32 %v5307_v43, %v5231_v31  ;;  %v1229_v31 = vmul.f32 %v5390_v37, %v5234_v29 }
 0x1bd   : > { %4350 = vset.pattern.permute.xlu1 %v7235_v34  ;;  %v1456_v29 = vadd.f32 %v1424_v46, %v1260_v63 }
 0x1be   : > { %v2120_v33 = vadd.f32 3.0, %v2088_v27  ;;  %1741 = vperm.xlu1 %4350, %v5475_v48   ;;  %v5584_v12 = vpop.permute.xlu0 %1737  ;;  %v1462_v4 = vadd.f32 %v1430_v62, %v1266_v35  ;;  %v1065_v5 = vadd.f32 %v1033_v26, %v869_v59 }
 0x1c0   : > { %v2152_v0 = vmax.f32 %v2120_v33, 0.0  ;;  %v1658_v45 = vadd.f32 %v1626_v42, %v1462_v4  ;;  %v1425_v42 = vmul.f32 %v5397_v6, %v5248_v19  ;;  %v7295_v19 = vld [vmem:[#allocation24_spill] sm:$0xff]  ;;  %v1235_v4 = vmul.f32 %v5390_v37, %v5484_v21 }
 0x1c1   : > { %v5596_v18 = vpop.permute.xlu1 %1521 }
 0x1c2   : > { %v2184_v57 = vmin.f32 %v2152_v0, 6.0  ;;  %4352 = vset.pattern.permute.xlu1 %v7213_v39  ;;  %v5601_v40 = vpop.permute.xlu0 %1797  ;;  %v1854_v62 = vadd.f32 %v1822_v60, %v1658_v45 }
 0x1c3   : > { %7294 = vst [vmem:[#allocation23_spill] sm:$0xff] %v5601_v40  ;;  %1169 = vperm.xlu1 %4352, %v5605_v10  }
 0x1c4   : > { %v2216_v33 = vmul.f32 0.16666667, %v2184_v57  ;;  %v1068_v57 = vadd.f32 %v1036_v20, %v7295_v19 }
 0x1c6   : > { %v2248_v58 = vmul.f32 %v2216_v33, %v2088_v27  ;;  %v1906_v0 = vpop.permute.xlu1 %1905  ;;  %v1261_v27 = vadd.f32 %v1229_v31, %v1065_v5  ;;  %v2012_v33 = vmul.f32 %v5455_v28, %v5296_v7  ;;  %v7296_v5 = vld [vmem:[#allocation26_spill] sm:$0xff]  ;;  %v1264_v46 = vadd.f32 %v1232_v56, %v1068_v57 }
 0x1c7   : > { %v2018_v35 = vmul.f32 %v5455_v28, %v1906_v0  ;;  %4353 = vset.pattern.permute.xlu1 %v7219_v17  ;;  %v1490_v61 = vpop.permute.xlu0 %1489  ;;  %v1071_v31 = vadd.f32 %v1039_v14, %v7296_v5  ;;  %v1431_v7 = vmul.f32 %v5397_v6, %v5060_v50 }
 0x1c8   : > { %2281 = vst.msk [vmem:[#allocation2 + $0x51] sm:$0xff] %vm419_vm0, %v2248_v58  ;;  %v1620_v44 = vmul.f32 %v5423_v53, %v1490_v61  ;;  %1361 = vperm.xlu1 %4353, %v5555_v52   ;;  %v1457_v38 = vadd.f32 %v1425_v42, %v1261_v27  ;;  %v1817_v58 = vmul.f32 %v5435_v2, %v5543_v15  ;;  %v7297_v42 = vld [vmem:[#allocation43_spill] sm:$0xff] }
 0x1c9   : > { %v2050_v51 = vadd.f32 %v2018_v35, %v1854_v62  ;;  %v1267_v62 = vadd.f32 %v1235_v4, %v1071_v31  ;;  %v2013_v32 = vmul.f32 %v5455_v28, %v7297_v42  ;;  %v1820_v15 = vmul.f32 %v5435_v2, %v5550_v47 }
 0x1ca   : > { %v1652_v26 = vadd.f32 %v1620_v44, %v1456_v29  ;;  %v1460_v27 = vadd.f32 %v1428_v25, %v1264_v46 }
 0x1cb   : > { %v2089_v60 = vadd.f32 %v5472_v16, %v2050_v51  ;;  %v5631_v59 = vpop.permute.xlu1 %1141  ;;  %v1494_v63 = vpop.permute.xlu0 %1493  ;;  %v1463_v57 = vadd.f32 %v1431_v7, %v1267_v62 }
 0x1cc   : > { %v1848_v45 = vadd.f32 %v1816_v8, %v1652_v26  ;;  %v1621_v1 = vmul.f32 %v5423_v53, %v1494_v63  ;;  %4354 = vset.pattern.permute.xlu1 %v7235_v34  ;;  %v7298_v8 = vld [vmem:[#allocation45_spill] sm:$0xff]  ;;  %v1823_v63 = vmul.f32 %v5435_v2, %v5558_v49 }
 0x1cd   : > { %v2121_v21 = vadd.f32 3.0, %v2089_v60  ;;  %1745 = vperm.xlu1 %4354, %v5448_v36   ;;  %v2016_v56 = vmul.f32 %v5455_v28, %v7298_v8 }
 0x1ce   : > { %v2044_v0 = vadd.f32 %v2012_v33, %v1848_v45  ;;  %v1653_v20 = vadd.f32 %v1621_v1, %v1457_v38 }
 0x1cf   : > { %v2153_v35 = vmax.f32 %v2121_v21, 0.0  ;;  %v1506_v61 = vpop.permute.xlu0 %1505 }
 0x1d0   : > { %v5647_v29 = vpop.permute.xlu1 %1525  ;;  %v2083_v14 = vadd.f32 %v5472_v16, %v2044_v0  ;;  %v1849_v51 = vadd.f32 %v1817_v58, %v1653_v20  ;;  %v1624_v50 = vmul.f32 %v5423_v53, %v1506_v61  ;;  %v5668_v58 = vld [vmem:[%s4583_s22 + $0x98] sm:$0xff] }
 0x1d1   : > { %v2185_v44 = vmin.f32 %v2153_v35, 6.0  ;;  %4355 = vset.pattern.permute.xlu1 %v7227_v9 }
 0x1d2   : > { %1937 = vperm.xlu1 %4355, %v5475_v48   ;;  %v2115_v19 = vadd.f32 3.0, %v2083_v14  ;;  %v2045_v38 = vadd.f32 %v2013_v32, %v1849_v51  ;;  %v1656_v33 = vadd.f32 %v1624_v50, %v1460_v27  ;;  %v7299_v48 = vld [vmem:[#allocation46_spill] sm:$0xff]  ;;  %v7300_v50 = vld [vmem:[#allocation39_spill] sm:$0xff] }
 0x1d3   : > { %v2217_v26 = vmul.f32 0.16666667, %v2185_v44  ;;  %v1518_v4 = vpop.permute.xlu0 %1517  ;;  %v2019_v5 = vmul.f32 %v5455_v28, %v7299_v48  ;;  %v1434_v8 = vmul.f32 %v5397_v6, %v7300_v50 }
 0x1d4   : > { %v1627_v47 = vmul.f32 %v5423_v53, %v1518_v4  ;;  %v2147_v1 = vmax.f32 %v2115_v19, 0.0  ;;  %v2084_v31 = vadd.f32 %v5472_v16, %v2045_v38  ;;  %v1852_v21 = vadd.f32 %v1820_v15, %v1656_v33 }
 0x1d5   : > { %v2249_v45 = vmul.f32 %v2217_v26, %v2089_v60  ;;  %v5660_v25 = vpop.permute.xlu1 %1717  ;;  %v1466_v33 = vadd.f32 %v1434_v8, %v5501_v55 }
 0x1d6   : > { %v1659_v46 = vadd.f32 %v1627_v47, %v1463_v57  ;;  %4356 = vset.pattern.permute.xlu1 %v7213_v39  ;;  %v2179_v49 = vmin.f32 %v2147_v1, 6.0  ;;  %v2116_v60 = vadd.f32 3.0, %v2084_v31  ;;  %v2048_v0 = vadd.f32 %v2016_v56, %v1852_v21  ;;  %v7301_v1 = vld [vmem:[#allocation40_spill] sm:$0xff] }
 0x1d7   : > { %2282 = vst.msk [vmem:[#allocation2 + $0x61] sm:$0xff] %vm419_vm0, %v2249_v45  ;;  %1173 = vperm.xlu1 %4356, %v5668_v58   ;;  %v1530_v44 = vpop.permute.xlu0 %1529  ;;  %v4438_v45 = vld [vmem:[%s4583_s22 + $0x80] sm:$0xff]  ;;  %v1437_v48 = vmul.f32 %v5397_v6, %v7301_v1  ;;  %v1826_v21 = vmul.f32 %v5435_v2, %v5571_v13  ;;  %v7306_v1 = vld [vmem:[#allocation42_spill] sm:$0xff] }
 0x1d8   : > { %v1855_v20 = vadd.f32 %v1823_v63, %v1659_v46  ;;  %v2211_v7 = vmul.f32 0.16666667, %v2179_v49  ;;  %v2148_v62 = vmax.f32 %v2116_v60, 0.0  ;;  %v2087_v35 = vadd.f32 %v5472_v16, %v2048_v0 }
 0x1da   : > { %v2051_v61 = vadd.f32 %v2019_v5, %v1855_v20  ;;  %v5672_v42 = vpop.permute.xlu1 %1145  ;;  %v2243_v32 = vmul.f32 %v2211_v7, %v2083_v14  ;;  %v2180_v15 = vmin.f32 %v2148_v62, 6.0  ;;  %v2119_v51 = vadd.f32 3.0, %v2087_v35  ;;  %v7302_v7 = vld [vmem:[#allocation47_spill] sm:$0xff] }
 0x1db   : > { %4357 = vset.pattern.permute.xlu1 %v7219_v17  ;;  %v1630_v14 = vmul.f32 %v5423_v53, %v1530_v44  ;;  %v1542_v47 = vpop.permute.xlu0 %1541  ;;  %v1469_v20 = vadd.f32 %v1437_v48, %v5513_v24  ;;  %v2022_v62 = vmul.f32 %v5455_v28, %v7302_v7  ;;  %v1041_v48 = vmul.f32 %v5307_v43, %v7306_v1 }
 0x1dc   : > { %v2090_v27 = vadd.f32 %v5472_v16, %v2051_v61  ;;  %1365 = vperm.xlu1 %4357, %v5605_v10   ;;  %2276 = vst.msk [vmem:[#allocation2 + $0x19] sm:$0xff] %vm419_vm0, %v2243_v32  ;;  %v2212_v56 = vmul.f32 0.16666667, %v2180_v15  ;;  %v2151_v26 = vmax.f32 %v2119_v51, 0.0  ;;  %v1633_v60 = vmul.f32 %v5423_v53, %v1542_v47  ;;  %v5703_v51 = vld [vmem:[%s4583_s22 + $0xa0] sm:$0xff] }
 0x1dd   : > { %v1432_v47 = vmul.f32 %v5397_v6, %v5538_v41  ;;  %v1824_v41 = vmul.f32 %v5435_v2, %v5660_v25 }
 0x1de   : > { %v2122_v19 = vadd.f32 3.0, %v2090_v27  ;;  %v2244_v4 = vmul.f32 %v2212_v56, %v2084_v31  ;;  %v2183_v63 = vmin.f32 %v2151_v26, 6.0  ;;  %v1662_v31 = vadd.f32 %v1630_v14, %v1466_v33  ;;  %v7304_v56 = vld [vmem:[#allocation50_spill] sm:$0xff] }
 0x1df   : > { %v5681_v57 = vpop.permute.xlu1 %1337  ;;  %v1665_v32 = vadd.f32 %v1633_v60, %v1469_v20  ;;  %v1040_v26 = vmul.f32 %v5307_v43, %v7304_v56 }
 0x1e0   : > { %4358 = vset.pattern.permute.xlu1 %v7235_v34  ;;  %v2154_v38 = vmax.f32 %v2122_v19, 0.0  ;;  %2277 = vst.msk [vmem:[#allocation2 + $0x21] sm:$0xff] %vm419_vm0, %v2244_v4  ;;  %v2215_v5 = vmul.f32 0.16666667, %v2183_v63  ;;  %v1858_v13 = vadd.f32 %v1826_v21, %v1662_v31  ;;  %v1236_v4 = vmul.f32 %v5390_v37, %v5482_v54 }
 0x1e1   : > { %1749 = vperm.xlu1 %4358, %v4438_v45  }
 0x1e2   : > { %v2186_v46 = vmin.f32 %v2154_v38, 6.0  ;;  %v2247_v49 = vmul.f32 %v2215_v5, %v2087_v35  ;;  %v1829_v35 = vmul.f32 %v5435_v2, %v5584_v12  ;;  %v2054_v15 = vadd.f32 %v2022_v62, %v1858_v13  ;;  %v7305_v38 = vld [vmem:[#allocation27_spill] sm:$0xff] }
 0x1e3   : > { %v1072_v33 = vadd.f32 %v1040_v26, %v7305_v38  ;;  %v1433_v62 = vmul.f32 %v5397_v6, %v5576_v22 }
 0x1e4   : > { %v1722_v0 = vpop.permute.xlu1 %1721  ;;  %2280 = vst.msk [vmem:[#allocation2 + $0x49] sm:$0xff] %vm419_vm0, %v2247_v49  ;;  %v2218_v55 = vmul.f32 0.16666667, %v2186_v46  ;;  %v1861_v50 = vadd.f32 %v1829_v35, %v1665_v32  ;;  %v2093_v12 = vadd.f32 %v5472_v16, %v2054_v15  ;;  %v1628_v46 = vmul.f32 %v5423_v53, %v5596_v18 }
 0x1e5   : > { %4359 = vset.pattern.permute.xlu1 %v7227_v9  ;;  %v1268_v21 = vadd.f32 %v1236_v4, %v1072_v33  ;;  %v1237_v49 = vmul.f32 %v5390_v37, %v5522_v30  ;;  %v1629_v30 = vmul.f32 %v5423_v53, %v5647_v29 }
 0x1e6   : > { %1941 = vperm.xlu1 %4359, %v5448_v36   ;;  %v2250_v61 = vmul.f32 %v2218_v55, %v2090_v27  ;;  %v7303_v36 = vld [vmem:[#allocation3_spill] sm:$0xff]  ;;  %v2125_v19 = vadd.f32 3.0, %v2093_v12  ;;  %v7307_v55 = vld [vmem:[#allocation28_spill] sm:$0xff] }
 0x1e7   : > { %v2025_v24 = vmul.f32 %v5455_v28, %v7303_v36  ;;  %v1464_v60 = vadd.f32 %v1432_v47, %v1268_v21  ;;  %v1073_v20 = vadd.f32 %v1041_v48, %v7307_v55  ;;  %v5766_v55 = vld [vmem:[%s4583_s22 + $0xb0] sm:$0xff] }
 0x1e8   : > { %2283 = vst.msk [vmem:[#allocation2 + $0x69] sm:$0xff] %vm419_vm0, %v2250_v61  ;;  %v2157_v5 = vmax.f32 %v2125_v19, 0.0 }
 0x1e9   : > { %v1914_v44 = vpop.permute.xlu1 %1913  ;;  %v2057_v27 = vadd.f32 %v2025_v24, %v1861_v50  ;;  %v1660_v18 = vadd.f32 %v1628_v46, %v1464_v60  ;;  %v1269_v32 = vadd.f32 %v1237_v49, %v1073_v20  ;;  %v1825_v24 = vmul.f32 %v5435_v2, %v1722_v0  ;;  %v7308_v20 = vld [vmem:[#allocation44_spill] sm:$0xff] }
 0x1ea   : > { %4360 = vset.pattern.permute.xlu1 %v7213_v39  ;;  %v2189_v7 = vmin.f32 %v2157_v5, 6.0  ;;  %v2020_v35 = vmul.f32 %v5455_v28, %v1914_v44 }
 0x1eb   : > { %1177 = vperm.xlu1 %4360, %v5703_v51   ;;  %v2096_v63 = vadd.f32 %v5472_v16, %v2057_v27  ;;  %v1856_v15 = vadd.f32 %v1824_v41, %v1660_v18  ;;  %v1465_v36 = vadd.f32 %v1433_v62, %v1269_v32  ;;  %v1239_v62 = vmul.f32 %v5390_v37, %v5631_v59  ;;  %v7309_v18 = vld [vmem:[#allocation29_spill] sm:$0xff] }
 0x1ec   : > { %v2221_v25 = vmul.f32 0.16666667, %v2189_v7  ;;  %v1043_v7 = vmul.f32 %v5307_v43, %v7308_v20 }
 0x1ed   : > { %v2128_v54 = vadd.f32 3.0, %v2096_v63  ;;  %v2052_v50 = vadd.f32 %v2020_v35, %v1856_v15  ;;  %v1661_v27 = vadd.f32 %v1629_v30, %v1465_v36  ;;  %v1435_v35 = vmul.f32 %v5397_v6, %v5681_v57 }
 0x1ee   : > { %v5708_v8 = vpop.permute.xlu1 %1341  ;;  %v2253_v44 = vmul.f32 %v2221_v25, %v2093_v12 }
 0x1ef   : > { %4361 = vset.pattern.permute.xlu1 %v7219_v17  ;;  %v2160_v13 = vmax.f32 %v2128_v54, 0.0  ;;  %v2091_v26 = vadd.f32 %v5472_v16, %v2052_v50  ;;  %v1857_v38 = vadd.f32 %v1825_v24, %v1661_v27  ;;  %v7310_v24 = vld [vmem:[#allocation51_spill] sm:$0xff] }
 0x1f0   : > { %1369 = vperm.xlu1 %4361, %v5668_v58   ;;  %2286 = vst.msk [vmem:[#allocation2 + $0x91] sm:$0xff] %vm419_vm0, %v2253_v44  ;;  %v1044_v57 = vmul.f32 %v5307_v43, %v7310_v24 }
 0x1f1   : > { %v2192_v22 = vmin.f32 %v2160_v13, 6.0  ;;  %v2123_v33 = vadd.f32 3.0, %v2091_v26  ;;  %v1075_v13 = vadd.f32 %v1043_v7, %v7309_v18 }
 0x1f3   : > { %v5715_v14 = vpop.permute.xlu1 %1533  ;;  %v2224_v56 = vmul.f32 0.16666667, %v2192_v22  ;;  %v2155_v0 = vmax.f32 %v2123_v33, 0.0  ;;  %v1271_v32 = vadd.f32 %v1239_v62, %v1075_v13 }
 0x1f4   : > { %4362 = vset.pattern.permute.xlu1 %v7235_v34  ;;  %v1631_v30 = vmul.f32 %v5423_v53, %v5715_v14  ;;  %v1240_v14 = vmul.f32 %v5390_v37, %v5672_v42 }
 0x1f5   : > { %1753 = vperm.xlu1 %4362, %v5555_v52   ;;  %v2256_v4 = vmul.f32 %v2224_v56, %v2096_v63  ;;  %v2187_v1 = vmin.f32 %v2155_v0, 6.0  ;;  %v1467_v25 = vadd.f32 %v1435_v35, %v1271_v32  ;;  %v7311_v56 = vld [vmem:[#allocation30_spill] sm:$0xff]  ;;  %v5817_v35 = vld [vmem:[%s4583_s22 + $0xc0] sm:$0xff] }
 0x1f7   : > { %2289 = vst.msk [vmem:[#allocation2 + $0xb1] sm:$0xff] %vm419_vm0, %v2256_v4  ;;  %v2219_v5 = vmul.f32 0.16666667, %v2187_v1  ;;  %v1663_v59 = vadd.f32 %v1631_v30, %v1467_v25  ;;  %v5801_v1 = vld [vmem:[%s4583_s22 + $0xb8] sm:$0xff] }
 0x1f8   : > { %v1918_v31 = vpop.permute.xlu1 %1917 }
 0x1f9   : > { %4363 = vset.pattern.permute.xlu1 %v7227_v9  ;;  %v2021_v29 = vmul.f32 %v5455_v28, %v1918_v31  ;;  %v2251_v63 = vmul.f32 %v2219_v5, %v2091_v26  ;;  %v1076_v26 = vadd.f32 %v1044_v57, %v7311_v56 }
 0x1fa   : > { %1945 = vperm.xlu1 %4363, %v4438_v45   ;;  %v5744_v45 = vld [vmem:[%s4583_s22 + $0xa8] sm:$0xff] }
 0x1fb   : > { %v2053_v12 = vadd.f32 %v2021_v29, %v1857_v38  ;;  %2284 = vst.msk [vmem:[#allocation2 + $0x79] sm:$0xff] %vm419_vm0, %v2251_v63  ;;  %v1436_v29 = vmul.f32 %v5397_v6, %v5708_v8  ;;  %v1272_v38 = vadd.f32 %v1240_v14, %v1076_v26 }
 0x1fd   : > { %v5738_v61 = vpop.permute.xlu1 %1153  ;;  %v2092_v48 = vadd.f32 %v5472_v16, %v2053_v12  ;;  %v1468_v42 = vadd.f32 %v1436_v29, %v1272_v38  ;;  %v5843_v38 = vld [vmem:[%s4583_s22 + $0xc8] sm:$0xff] }
 0x1fe   : > { %4364 = vset.pattern.permute.xlu1 %v7213_v39 }
 0x1ff   : > { %1181 = vperm.xlu1 %4364, %v5744_v45   ;;  %v2124_v21 = vadd.f32 3.0, %v2092_v48 }
 0x201   : > { %v2156_v46 = vmax.f32 %v2124_v21, 0.0 }
 0x202   : > { %v1538_v19 = vpop.permute.xlu1 %1537 }
 0x203   : > { %4365 = vset.pattern.permute.xlu1 %v7219_v17  ;;  %v2188_v31 = vmin.f32 %v2156_v46, 6.0  ;;  %v1632_v33 = vmul.f32 %v5423_v53, %v1538_v19 }
 0x204   : > { %1373 = vperm.xlu1 %4365, %v5703_v51  }
 0x205   : > { %v2220_v49 = vmul.f32 0.16666667, %v2188_v31 }
 0x207   : > { %v1730_v47 = vpop.permute.xlu1 %1729  ;;  %v2252_v41 = vmul.f32 %v2220_v49, %v2092_v48  ;;  %v1664_v48 = vadd.f32 %v1632_v33, %v1468_v42 }
 0x208   : > { %4366 = vset.pattern.permute.xlu1 %v7235_v34  ;;  %v1827_v36 = vmul.f32 %v5435_v2, %v1730_v47 }
 0x209   : > { %1757 = vperm.xlu1 %4366, %v5605_v10   ;;  %2285 = vst.msk [vmem:[#allocation2 + $0x81] sm:$0xff] %vm419_vm0, %v2252_v41 }
 0x20a   : > { %v1859_v50 = vadd.f32 %v1827_v36, %v1663_v59  ;;  %v1242_v36 = vmul.f32 %v5390_v37, %v5738_v61  ;;  %v7313_v59 = vld [vmem:[#allocation31_spill] sm:$0xff] }
 0x20c   : > { %v5757_v54 = vpop.permute.xlu1 %1157 }
 0x20d   : > { %4367 = vset.pattern.permute.xlu1 %v7227_v9 }
 0x20e   : > { %1949 = vperm.xlu1 %4367, %v5555_v52  }
 0x211   : > { %v5762_v60 = vpop.permute.xlu1 %1349 }
 0x212   : > { %4368 = vset.pattern.permute.xlu1 %v7213_v39  ;;  %v1438_v24 = vmul.f32 %v5397_v6, %v5762_v60 }
 0x213   : > { %1185 = vperm.xlu1 %4368, %v5766_v55  }
 0x216   : > { %v1734_v52 = vpop.permute.xlu1 %1733 }
 0x217   : > { %4369 = vset.pattern.permute.xlu1 %v7219_v17  ;;  %v1828_v47 = vmul.f32 %v5435_v2, %v1734_v52 }
 0x218   : > { %1377 = vperm.xlu1 %4369, %v5744_v45  }
 0x219   : > { %v1860_v21 = vadd.f32 %v1828_v47, %v1664_v48  ;;  %v1243_v48 = vmul.f32 %v5390_v37, %v5757_v54 }
 0x21b   : > { %v1926_v15 = vpop.permute.xlu1 %1925 }
 0x21c   : > { %4370 = vset.pattern.permute.xlu1 %v7235_v34  ;;  %v2023_v22 = vmul.f32 %v5455_v28, %v1926_v15  ;;  %v7312_v15 = vld [vmem:[#allocation5_spill] sm:$0xff] }
 0x21d   : > { %1761 = vperm.xlu1 %4370, %v5668_v58  }
 0x21e   : > { %v2055_v27 = vadd.f32 %v2023_v22, %v1859_v50 }
 0x220   : > { %v5787_v44 = vpop.permute.xlu1 %1353  ;;  %v2094_v4 = vadd.f32 %v5472_v16, %v2055_v27 }
 0x221   : > { %4371 = vset.pattern.permute.xlu1 %v7227_v9 }
 0x222   : > { %1953 = vperm.xlu1 %4371, %v5605_v10   ;;  %v2126_v12 = vadd.f32 3.0, %v2094_v4 }
 0x224   : > { %v2158_v10 = vmax.f32 %v2126_v12, 0.0 }
 0x225   : > { %v1546_v0 = vpop.permute.xlu1 %1545 }
 0x226   : > { %4372 = vset.pattern.permute.xlu1 %v7213_v39  ;;  %v2190_v5 = vmin.f32 %v2158_v10, 6.0  ;;  %v1634_v50 = vmul.f32 %v5423_v53, %v1546_v0 }
 0x227   : > { %1189 = vperm.xlu1 %4372, %v5801_v1  }
 0x228   : > { %v2222_v19 = vmul.f32 0.16666667, %v2190_v5 }
 0x22a   : > { %v1930_v8 = vpop.permute.xlu1 %1929  ;;  %v2254_v31 = vmul.f32 %v2222_v19, %v2094_v4 }
 0x22b   : > { %v2024_v63 = vmul.f32 %v5455_v28, %v1930_v8  ;;  %4373 = vset.pattern.permute.xlu1 %v7219_v17  ;;  %v7315_v8 = vld [vmem:[#allocation32_spill] sm:$0xff] }
 0x22c   : > { %1381 = vperm.xlu1 %4373, %v5766_v55   ;;  %2287 = vst.msk [vmem:[#allocation2 + $0x99] sm:$0xff] %vm419_vm0, %v2254_v31 }
 0x22d   : > { %v2056_v46 = vadd.f32 %v2024_v63, %v1860_v21  ;;  %v1439_v63 = vmul.f32 %v5397_v6, %v5787_v44 }
 0x22f   : > { %v2095_v49 = vadd.f32 %v5472_v16, %v2056_v46  ;;  %v5808_v41 = vpop.permute.xlu1 %1165 }
 0x230   : > { %4374 = vset.pattern.permute.xlu1 %v7235_v34 }
 0x231   : > { %v2127_v20 = vadd.f32 3.0, %v2095_v49  ;;  %1765 = vperm.xlu1 %4374, %v5703_v51  }
 0x233   : > { %v2159_v7 = vmax.f32 %v2127_v20, 0.0 }
 0x234   : > { %v1550_v62 = vpop.permute.xlu1 %1549 }
 0x235   : > { %v2191_v52 = vmin.f32 %v2159_v7, 6.0  ;;  %4375 = vset.pattern.permute.xlu1 %v7227_v9  ;;  %v1635_v31 = vmul.f32 %v5423_v53, %v1550_v62 }
 0x236   : > { %1957 = vperm.xlu1 %4375, %v5668_v58   ;;  %v1046_v58 = vmul.f32 %v5307_v43, %v7312_v15 }
 0x237   : > { %v2223_v18 = vmul.f32 0.16666667, %v2191_v52 }
 0x238   : > { %v1078_v22 = vadd.f32 %v1046_v58, %v7313_v59  ;;  %v1554_v59 = vpop.permute.xlu0 %1553 }
 0x239   : > { %v1742_v13 = vpop.permute.xlu1 %1741  ;;  %v2255_v32 = vmul.f32 %v2223_v18, %v2095_v49 }
 0x23a   : > { %4376 = vset.pattern.permute.xlu1 %v7213_v39  ;;  %v1274_v57 = vadd.f32 %v1242_v36, %v1078_v22  ;;  %v1830_v56 = vmul.f32 %v5435_v2, %v1742_v13 }
 0x23b   : > { %1193 = vperm.xlu1 %4376, %v5817_v35   ;;  %2288 = vst.msk [vmem:[#allocation2 + $0xa9] sm:$0xff] %vm419_vm0, %v2255_v32 }
 0x23c   : > { %v1470_v27 = vadd.f32 %v1438_v24, %v1274_v57  ;;  %v7316_v24 = vld [vmem:[#allocation41_spill] sm:$0xff] }
 0x23d   : > { %v1440_v57 = vmul.f32 %v5397_v6, %v7316_v24 }
 0x23e   : > { %v5821_v30 = vpop.permute.xlu1 %1169  ;;  %v1666_v61 = vadd.f32 %v1634_v50, %v1470_v27 }
 0x23f   : > { %4377 = vset.pattern.permute.xlu1 %v7219_v17 }
 0x240   : > { %1385 = vperm.xlu1 %4377, %v5801_v1   ;;  %v1862_v29 = vadd.f32 %v1830_v56, %v1666_v61  ;;  %v1472_v61 = vadd.f32 %v1440_v57, %v5520_v11 }
 0x243   : > { %v5827_v25 = vpop.permute.xlu1 %1361 }
 0x244   : > { %4378 = vset.pattern.permute.xlu1 %v7235_v34 }
 0x245   : > { %1769 = vperm.xlu1 %4378, %v5744_v45  }
 0x248   : > { %v1746_v14 = vpop.permute.xlu1 %1745 }
 0x249   : > { %4379 = vset.pattern.permute.xlu1 %v7227_v9  ;;  %v1831_v54 = vmul.f32 %v5435_v2, %v1746_v14  ;;  %v1636_v14 = vmul.f32 %v5423_v53, %v1554_v59  ;;  %v7320_v59 = vld [vmem:[#allocation52_spill] sm:$0xff] }
 0x24a   : > { %1961 = vperm.xlu1 %4379, %v5703_v51   ;;  %v7314_v51 = vld [vmem:[#allocation4_spill] sm:$0xff] }
 0x24b   : > { %v1047_v42 = vmul.f32 %v5307_v43, %v7314_v51 }
 0x24d   : > { %v1938_v26 = vpop.permute.xlu1 %1937  ;;  %v1079_v21 = vadd.f32 %v1047_v42, %v7315_v8  ;;  %v7317_v42 = vld [vmem:[#allocation48_spill] sm:$0xff]  ;;  %v7318_v8 = vld [vmem:[#allocation33_spill] sm:$0xff] }
 0x24e   : > { %v2026_v4 = vmul.f32 %v5455_v28, %v1938_v26  ;;  %4380 = vset.pattern.permute.xlu1 %v7213_v39 }
 0x24f   : > { %1197 = vperm.xlu1 %4380, %v5843_v38   ;;  %v1275_v46 = vadd.f32 %v1243_v48, %v1079_v21  ;;  %v1441_v21 = vmul.f32 %v5397_v6, %v5827_v25 }
 0x250   : > { %v2058_v60 = vadd.f32 %v2026_v4, %v1862_v29  ;;  %v1668_v29 = vadd.f32 %v1636_v14, %v1472_v61 }
 0x251   : > { %v1471_v7 = vadd.f32 %v1439_v63, %v1275_v46  ;;  %v1558_v63 = vpop.permute.xlu0 %1557 }
 0x252   : > { %v2097_v33 = vadd.f32 %v5472_v16, %v2058_v60  ;;  %v5847_v0 = vpop.permute.xlu1 %1173 }
 0x253   : > { %4381 = vset.pattern.permute.xlu1 %v7219_v17  ;;  %v1667_v52 = vadd.f32 %v1635_v31, %v1471_v7 }
 0x254   : > { %v2129_v12 = vadd.f32 3.0, %v2097_v33  ;;  %1389 = vperm.xlu1 %4381, %v5817_v35  }
 0x255   : > { %v1863_v13 = vadd.f32 %v1831_v54, %v1667_v52 }
 0x256   : > { %v2161_v47 = vmax.f32 %v2129_v12, 0.0 }
 0x257   : > { %v5853_v10 = vpop.permute.xlu1 %1365 }
 0x258   : > { %v2193_v5 = vmin.f32 %v2161_v47, 6.0  ;;  %4382 = vset.pattern.permute.xlu1 %v7235_v34  ;;  %v1245_v47 = vmul.f32 %v5390_v37, %v5808_v41 }
 0x259   : > { %1773 = vperm.xlu1 %4382, %v5766_v55  }
 0x25a   : > { %v2225_v19 = vmul.f32 0.16666667, %v2193_v5 }
 0x25c   : > { %v2257_v49 = vmul.f32 %v2225_v19, %v2097_v33  ;;  %v1750_v20 = vpop.permute.xlu1 %1749 }
 0x25d   : > { %4383 = vset.pattern.permute.xlu1 %v7227_v9  ;;  %v1832_v26 = vmul.f32 %v5435_v2, %v1750_v20 }
 0x25e   : > { %2290 = vst.msk [vmem:[#allocation2 + $0xc1] sm:$0xff] %vm419_vm0, %v2257_v49  ;;  %1965 = vperm.xlu1 %4383, %v5744_v45   ;;  %v1637_v49 = vmul.f32 %v5423_v53, %v1558_v63  ;;  %v1247_v63 = vmul.f32 %v5390_v37, %v5847_v0 }
 0x25f   : > { %v1864_v60 = vadd.f32 %v1832_v26, %v1668_v29  ;;  %v1562_v26 = vpop.permute.xlu0 %1561 }
 0x261   : > { %v1942_v18 = vpop.permute.xlu1 %1941 }
 0x262   : > { %v2027_v44 = vmul.f32 %v5455_v28, %v1942_v18  ;;  %4384 = vset.pattern.permute.xlu1 %v7213_v39 }
 0x263   : > { %1201 = vperm.xlu1 %4384, %v5415_v23   ;;  %v1566_v0 = vpop.permute.xlu0 %1565 }
 0x264   : > { %v2059_v62 = vadd.f32 %v2027_v44, %v1863_v13  ;;  %v7319_v44 = vld [vmem:[#allocation12_spill] sm:$0xff] }
 0x266   : > { %v5870_v32 = vpop.permute.xlu1 %1177  ;;  %v2098_v15 = vadd.f32 %v5472_v16, %v2059_v62 }
 0x267   : > { %4385 = vset.pattern.permute.xlu1 %v7219_v17 }
 0x268   : > { %1393 = vperm.xlu1 %4385, %v5843_v38   ;;  %v2130_v58 = vadd.f32 3.0, %v2098_v15 }
 0x26a   : > { %v2162_v45 = vmax.f32 %v2130_v58, 0.0 }
 0x26b   : > { %v5875_v36 = vpop.permute.xlu1 %1369 }
 0x26c   : > { %4386 = vset.pattern.permute.xlu1 %v7235_v34  ;;  %v2194_v22 = vmin.f32 %v2162_v45, 6.0  ;;  %v5919_v45 = vld [vmem:[%s4583_s22 + $0xd8] sm:$0xff] }
 0x26d   : > { %1777 = vperm.xlu1 %4386, %v5801_v1  }
 0x26e   : > { %v2226_v50 = vmul.f32 0.16666667, %v2194_v22  ;;  %v1050_v22 = vmul.f32 %v5307_v43, %v7320_v59 }
 0x270   : > { %v1754_v27 = vpop.permute.xlu1 %1753  ;;  %v2258_v56 = vmul.f32 %v2226_v50, %v2098_v15  ;;  %v1246_v50 = vmul.f32 %v5390_v37, %v5821_v30  ;;  %v1638_v30 = vmul.f32 %v5423_v53, %v1562_v26  ;;  %v7328_v26 = vld [vmem:[#allocation16_spill] sm:$0xff] }
 0x271   : > { %4387 = vset.pattern.permute.xlu1 %v7227_v9  ;;  %v1833_v7 = vmul.f32 %v5435_v2, %v1754_v27 }
 0x272   : > { %1969 = vperm.xlu1 %4387, %v5766_v55   ;;  %2291 = vst.msk [vmem:[#allocation2 + $0xc9] sm:$0xff] %vm419_vm0, %v2258_v56  ;;  %v1049_v55 = vmul.f32 %v5307_v43, %v7317_v42  ;;  %v1442_v56 = vmul.f32 %v5397_v6, %v5853_v10 }
 0x275   : > { %v1946_v4 = vpop.permute.xlu1 %1945 }
 0x276   : > { %v2028_v33 = vmul.f32 %v5455_v28, %v1946_v4  ;;  %4388 = vset.pattern.permute.xlu1 %v7213_v39 }
 0x277   : > { %1205 = vperm.xlu1 %4388, %v5443_v3   ;;  %v1081_v3 = vadd.f32 %v1049_v55, %v7318_v8  ;;  %v7322_v55 = vld [vmem:[#allocation21_spill] sm:$0xff] }
 0x278   : > { %v2060_v12 = vadd.f32 %v2028_v33, %v1864_v60 }
 0x279   : > { %v1277_v46 = vadd.f32 %v1245_v47, %v1081_v3  ;;  %v7323_v3 = vld [vmem:[#allocation49_spill] sm:$0xff] }
 0x27a   : > { %v5890_v51 = vpop.permute.xlu1 %1181  ;;  %v2099_v11 = vadd.f32 %v5472_v16, %v2060_v12 }
 0x27b   : > { %4389 = vset.pattern.permute.xlu1 %v7219_v17 }
 0x27c   : > { %1397 = vperm.xlu1 %4389, %v5415_v23   ;;  %v2131_v48 = vadd.f32 3.0, %v2099_v11  ;;  %v1473_v23 = vadd.f32 %v1441_v21, %v1277_v46  ;;  %v1051_v21 = vmul.f32 %v5307_v43, %v7323_v3 }
 0x27e   : > { %v2163_v19 = vmax.f32 %v2131_v48, 0.0  ;;  %v1669_v54 = vadd.f32 %v1637_v49, %v1473_v23  ;;  %v7324_v49 = vld [vmem:[#allocation35_spill] sm:$0xff] }
 0x27f   : > { %v5899_v5 = vpop.permute.xlu1 %1373 }
 0x280   : > { %4390 = vset.pattern.permute.xlu1 %v7235_v34  ;;  %v2195_v31 = vmin.f32 %v2163_v19, 6.0  ;;  %v1865_v18 = vadd.f32 %v1833_v7, %v1669_v54  ;;  %v5953_v19 = vld [vmem:[%s7130_s2] ss:$0 sm:$0xff] }
 0x281   : > { %1781 = vperm.xlu1 %4390, %v5817_v35  }
 0x282   : > { %v2227_v20 = vmul.f32 0.16666667, %v2195_v31 }
 0x284   : > { %v1758_v41 = vpop.permute.xlu1 %1757  ;;  %v2259_v25 = vmul.f32 %v2227_v20, %v2099_v11  ;;  %v1443_v20 = vmul.f32 %v5397_v6, %v5875_v36 }
 0x285   : > { %4391 = vset.pattern.permute.xlu1 %v7227_v9  ;;  %v1834_v12 = vmul.f32 %v5435_v2, %v1758_v41  ;;  %v1083_v41 = vadd.f32 %v1051_v21, %v7324_v49  ;;  %v7331_v49 = vld [vmem:[#allocation53_spill] sm:$0xff] }
 0x286   : > { %1973 = vperm.xlu1 %4391, %v5801_v1   ;;  %2292 = vst.msk [vmem:[#allocation2 + $0xd9] sm:$0xff] %vm419_vm0, %v2259_v25  ;;  %v7325_v25 = vld [vmem:[#allocation20_spill] sm:$0xff] }
 0x289   : > { %v1950_v52 = vpop.permute.xlu1 %1949 }
 0x28a   : > { %v2029_v13 = vmul.f32 %v5455_v28, %v1950_v52  ;;  %4392 = vset.pattern.permute.xlu1 %v7213_v39  ;;  %v5967_v52 = vld [vmem:[%s4583_s22 + $0xd0] sm:$0xff] }
 0x28b   : > { %1209 = vperm.xlu1 %4392, %v7319_v44  }
 0x28c   : > { %v2061_v62 = vadd.f32 %v2029_v13, %v1865_v18  ;;  %v1279_v18 = vadd.f32 %v1247_v63, %v1083_v41  ;;  %v1052_v41 = vmul.f32 %v5307_v43, %v7331_v49 }
 0x28e   : > { %v2100_v15 = vadd.f32 %v5472_v16, %v2061_v62  ;;  %v5915_v58 = vpop.permute.xlu1 %1185  ;;  %v7321_v16 = vld [vmem:[#allocation34_spill] sm:$0xff]  ;;  %v1475_v44 = vadd.f32 %v1443_v20, %v1279_v18  ;;  %v1639_v62 = vmul.f32 %v5423_v53, %v1566_v0  ;;  %v2312_v20 = vld [vmem:[#allocation2 + $0x18] sm:$0xff] }
 0x28f   : > { %4393 = vset.pattern.permute.xlu1 %v7219_v17  ;;  %v1082_v27 = vadd.f32 %v1050_v22, %v7321_v16  ;;  %v5979_v22 = vld [vmem:[%s7131_s3] sm:$0xff]  ;;  %v2411_v16 = vld [vmem:[#allocation2 + $0x9] sm:$0xff] }
 0x290   : > { %v2132_v1 = vadd.f32 3.0, %v2100_v15  ;;  %1401 = vperm.xlu1 %4393, %v5919_v45  }
 0x291   : > { %v1278_v29 = vadd.f32 %v1246_v50, %v1082_v27 }
 0x292   : > { %v2164_v24 = vmax.f32 %v2132_v1, 0.0 }
 0x293   : > { %v5924_v57 = vpop.permute.xlu1 %1377  ;;  %v1474_v33 = vadd.f32 %v1442_v56, %v1278_v29  ;;  %v7327_v56 = vld [vmem:[#allocation19_spill] sm:$0xff]  ;;  %v7329_v29 = vsub.s32 1, %v7328_v26 }
 0x294   : > { %v2196_v14 = vmin.f32 %v2164_v24, 6.0  ;;  %4394 = vset.pattern.permute.xlu1 %v7235_v34  ;;  %v1671_v24 = vadd.f32 %v1639_v62, %v1475_v44  ;;  %v2313_v44 = vld [vmem:[#allocation2 + $0x20] sm:$0xff]  ;;  %v7332_v62 = vld [vmem:[#allocation8_spill] sm:$0xff] }
 0x295   : > { %1785 = vperm.xlu1 %4394, %v5843_v38   ;;  %v1670_v42 = vadd.f32 %v1638_v30, %v1474_v33  ;;  %v2310_v33 = vld [vmem:[#allocation2] sm:$0xff] }
 0x296   : > { %v2228_v61 = vmul.f32 0.16666667, %v2196_v14  ;;  %v2311_v14 = vld [vmem:[#allocation2 + $0x8] sm:$0xff] }
 0x297   : > { %v1866_v47 = vadd.f32 %v1834_v12, %v1670_v42  ;;  %v2410_v30 = vld [vmem:[#allocation2 + $0x1] sm:$0xff]  ;;  %v5994_v12 = vld [vmem:[%s4583_s22 + $0xf0] sm:$0xff] }
 0x298   : > { %v2260_v4 = vmul.f32 %v2228_v61, %v2100_v15  ;;  %v1762_v60 = vpop.permute.xlu1 %1761  ;;  %v5983_v61 = vrot.slane %v5979_v22, %v7327_v56  ;;  %v7341_v56 = vld [vmem:[#allocation37_spill] sm:$0xff] }
 0x299   : > { %4395 = vset.pattern.permute.xlu1 %v7227_v9  ;;  %v1835_v36 = vmul.f32 %v5435_v2, %v1762_v60 }
 0x29a   : > { %2293 = vst.msk [vmem:[#allocation2 + $0xe1] sm:$0xff] %vm419_vm0, %v2260_v4  ;;  %1977 = vperm.xlu1 %4395, %v5817_v35   ;;  %v5945_v35 = vld [vmem:[%s4583_s22 + $0xe0] sm:$0xff]  ;;  %v5988_v4 = vrot.slane %v5979_v22, %v7329_v29  ;;  %v2348_v29 = vmul.f32 %v5983_v61, %v2312_v20 }
 0x29c   : > { %v2447_v42 = vmul.f32 %v5988_v4, %v2411_v16  ;;  %v2446_v3 = vmul.f32 %v5988_v4, %v2410_v30  ;;  %v7334_v16 = vsub.s32 3, %v7328_v26  ;;  %v7335_v30 = vld [vmem:[#allocation36_spill] sm:$0xff] }
 0x29d   : > { %v1954_v11 = vpop.permute.xlu1 %1953 }
 0x29e   : > { %v2030_v10 = vmul.f32 %v5455_v28, %v1954_v11  ;;  %4396 = vset.pattern.permute.xlu1 %v7213_v39  ;;  %v2347_v11 = vmul.f32 %v5983_v61, %v2311_v14  ;;  %v1248_v14 = vmul.f32 %v5390_v37, %v5870_v32  ;;  %v1444_v32 = vmul.f32 %v5397_v6, %v5899_v5 }
 0x29f   : > { %1213 = vperm.xlu1 %4396, %v7322_v55   ;;  %v2511_v55 = vld [vmem:[#allocation2 + $0xa] sm:$0xff]  ;;  %v7336_v5 = vsub.s32 4, %v7328_v26 }
 0x2a0   : > { %v2062_v48 = vadd.f32 %v2030_v10, %v1866_v47  ;;  %v7330_v47 = vsub.s32 2, %v7328_v26  ;;  %v2479_v0 = vadd.f32 %v2447_v42, %v2347_v11  ;;  %v1084_v11 = vadd.f32 %v1052_v41, %v7335_v30 }
 0x2a2   : > { %v1190_v8 = vpop.permute.xlu1 %1189  ;;  %v2101_v46 = vadd.f32 %v5953_v19, %v2062_v48  ;;  %v6002_v48 = vrot.slane %v5979_v22, %v7330_v47  ;;  %v1280_v49 = vadd.f32 %v1248_v14, %v1084_v11  ;;  %v7337_v14 = vsub.s32 5, %v7328_v26 }
 0x2a3   : > { %4397 = vset.pattern.permute.xlu1 %v7219_v17  ;;  %v1251_v31 = vmul.f32 %v5390_v37, %v1190_v8  ;;  %v2346_v8 = vmul.f32 %v5983_v61, %v2310_v33 }
 0x2a4   : > { %1405 = vperm.xlu1 %4397, %v5945_v35   ;;  %v2133_v7 = vadd.f32 3.0, %v2101_v46 }
 0x2a5   : > { %v5964_v54 = vadd.f32 %v1251_v31, %v7325_v25  ;;  %v2547_v25 = vmul.f32 %v6002_v48, %v2511_v55 }
 0x2a6   : > { %v2165_v13 = vmax.f32 %v2133_v7, 0.0  ;;  %v2412_v7 = vld [vmem:[#allocation2 + $0x19] sm:$0xff] }
 0x2a7   : > { %v5957_v23 = vpop.permute.xlu1 %1381  ;;  %7326 = vst [vmem:[#allocation14_spill] sm:$0xff] %v5964_v54  ;;  %v2579_v42 = vadd.f32 %v2547_v25, %v2479_v0  ;;  %v6044_v25 = vrot.slane %v5979_v22, %v7336_v5  ;;  %v2515_v5 = vld [vmem:[#allocation2 + $0x3a] sm:$0xff]  ;;  %v6119_v54 = vld [vmem:[#allocation2 + $0x49] sm:$0xff] }
 0x2a8   : > { %4398 = vset.pattern.permute.xlu1 %v7235_v34  ;;  %v2197_v15 = vmin.f32 %v2165_v13, 6.0  ;;  %v6013_v13 = vld [vmem:[%s4583_s22 + $0xe8] sm:$0xff] }
 0x2a9   : > { %1789 = vperm.xlu1 %4398, %v5967_v52  }
 0x2aa   : > { %v2229_v59 = vmul.f32 0.16666667, %v2197_v15 }
 0x2ac   : > { %v5971_v1 = vpop.permute.xlu1 %1765  ;;  %v2261_v50 = vmul.f32 %v2229_v59, %v2101_v46  ;;  %v2510_v46 = vld [vmem:[#allocation2 + $0x2] sm:$0xff] }
 0x2ad   : > { %4399 = vset.pattern.permute.xlu1 %v7227_v9  ;;  %v2546_v59 = vmul.f32 %v6002_v48, %v2510_v46 }
 0x2ae   : > { %1981 = vperm.xlu1 %4399, %v5843_v38   ;;  %v1867_v38 = vadd.f32 %v1835_v36, %v1671_v24  ;;  %2294 = vst.msk [vmem:[#allocation2 + $0xf1] sm:$0xff] %vm419_vm0, %v2261_v50  ;;  %v2478_v36 = vadd.f32 %v2446_v3, %v2346_v8  ;;  %v2413_v24 = vld [vmem:[#allocation2 + $0x21] sm:$0xff]  ;;  %v1570_v3 = vpop.permute.xlu0 %1569 }
 0x2af   : > { %v2512_v50 = vld [vmem:[#allocation2 + $0x1a] sm:$0xff]  ;;  %v2449_v55 = vmul.f32 %v5988_v4, %v2413_v24 }
 0x2b0   : > { %v2548_v47 = vmul.f32 %v6002_v48, %v2512_v50  ;;  %v2578_v46 = vadd.f32 %v2546_v59, %v2478_v36 }
 0x2b1   : > { %v1958_v27 = vpop.permute.xlu1 %1957 }
 0x2b2   : > { %v2031_v60 = vmul.f32 %v5455_v28, %v1958_v27  ;;  %4401 = vset.pattern.permute.xlu1 %v7213_v39  ;;  %v6025_v27 = vrot.slane %v5979_v22, %v7334_v16  ;;  %v1476_v16 = vadd.f32 %v1444_v32, %v1280_v49  ;;  %v6062_v32 = vld [vmem:[#allocation2 + $0x31] sm:$0xff] }
 0x2b3   : > { %1217 = vperm.xlu1 %4401, %v5994_v12   ;;  %v2748_v39 = vmul.f32 %v6044_v25, %v6062_v32 }
 0x2b4   : > { %v2063_v10 = vadd.f32 %v2031_v60, %v1867_v38  ;;  %v2448_v38 = vmul.f32 %v5988_v4, %v2412_v7  ;;  %v2647_v8 = vmul.f32 %v6025_v27, %v2313_v44 }
 0x2b6   : > { %v2102_v21 = vadd.f32 %v5953_v19, %v2063_v10  ;;  %v1194_v63 = vpop.permute.xlu1 %1193  ;;  %v2349_v10 = vmul.f32 %v5983_v61, %v2313_v44  ;;  %v2480_v41 = vadd.f32 %v2448_v38, %v2348_v29  ;;  %v1640_v44 = vmul.f32 %v5423_v53, %v1570_v3 }
 0x2b7   : > { %v1252_v31 = vmul.f32 %v5390_v37, %v1194_v63  ;;  %4402 = vset.pattern.permute.xlu1 %v7219_v17  ;;  %v2679_v59 = vadd.f32 %v2647_v8, %v2579_v42  ;;  %v6055_v29 = vrot.slane %v5979_v22, %v7337_v14  ;;  %v7338_v38 = vsub.s32 6, %v7328_v26 }
 0x2b8   : > { %v2134_v18 = vadd.f32 3.0, %v2102_v21  ;;  %1409 = vperm.xlu1 %4402, %v6013_v13   ;;  %v2481_v30 = vadd.f32 %v2449_v55, %v2349_v10  ;;  %v2580_v36 = vadd.f32 %v2548_v47, %v2480_v41  ;;  %v1836_v10 = vmul.f32 %v5435_v2, %v5971_v1  ;;  %v2315_v1 = vld [vmem:[#allocation2 + $0x38] sm:$0xff] }
 0x2b9   : > { %v6017_v15 = vadd.f32 %v1252_v31, %v7332_v62  ;;  %v2646_v31 = vmul.f32 %v6025_v27, %v2312_v20  ;;  %v2513_v62 = vld [vmem:[#allocation2 + $0x22] sm:$0xff]  ;;  %v6060_v11 = vrot.slane %v5979_v22, %v7338_v38  ;;  %v2747_v8 = vmul.f32 %v6044_v25, %v2413_v24  ;;  %v2415_v41 = vld [vmem:[#allocation2 + $0x39] sm:$0xff] }
 0x2ba   : > { %v2166_v60 = vmax.f32 %v2134_v18, 0.0  ;;  %v6046_v18 = vld [vmem:[#allocation2 + $0x30] sm:$0xff]  ;;  %v2549_v47 = vmul.f32 %v6002_v48, %v2513_v62  ;;  %v1672_v49 = vadd.f32 %v1640_v44, %v1476_v16  ;;  %v2649_v44 = vmul.f32 %v6025_v27, %v2315_v1 }
 0x2bb   : > { %7333 = vst [vmem:[#allocation15_spill] sm:$0xff] %v6017_v15  ;;  %v6029_v33 = vpop.permute.xlu1 %1385  ;;  %v2678_v3 = vadd.f32 %v2646_v31, %v2578_v46  ;;  %v2648_v55 = vmul.f32 %v6025_v27, %v6046_v18  ;;  %v2746_v31 = vmul.f32 %v6044_v25, %v2412_v7  ;;  %v2514_v16 = vld [vmem:[#allocation2 + $0x32] sm:$0xff] }
 0x2bc   : > { %4403 = vset.pattern.permute.xlu1 %v7235_v34  ;;  %v2198_v63 = vmin.f32 %v2166_v60, 6.0  ;;  %v2581_v24 = vadd.f32 %v2549_v47, %v2481_v30  ;;  %v2847_v30 = vmul.f32 %v6055_v29, %v2513_v62  ;;  %v2848_v15 = vmul.f32 %v6055_v29, %v2514_v16 }
 0x2bd   : > { %1793 = vperm.xlu1 %4403, %v5919_v45   ;;  %v2680_v14 = vadd.f32 %v2648_v55, %v2580_v36  ;;  %v2351_v36 = vmul.f32 %v5983_v61, %v2315_v1 }
 0x2be   : > { %v2230_v0 = vmul.f32 0.16666667, %v2198_v63  ;;  %v7340_v63 = vsub.s32 7, %v7328_v26  ;;  %v2778_v26 = vadd.f32 %v2746_v31, %v2678_v3  ;;  %v6096_v3 = vld [vmem:[#allocation2 + $0x48] sm:$0xff]  ;;  %v2681_v55 = vadd.f32 %v2649_v44, %v2581_v24 }
 0x2bf   : > { %v2780_v62 = vadd.f32 %v2748_v39, %v2680_v14  ;;  %v2749_v31 = vmul.f32 %v6044_v25, %v2415_v41  ;;  %v7342_v39 = vmov 5   ;;  %v2947_v14 = vmul.f32 %v6060_v11, %v6046_v18 }
 0x2c0   : > { %v6049_v60 = vpop.permute.xlu1 %1769  ;;  %v2262_v20 = vmul.f32 %v2230_v0, %v2102_v21  ;;  %v7339_v21 = vld [vmem:[#allocation6_spill] sm:$0xff]  ;;  %v6077_v46 = vrot.slane %v5979_v22, %v7340_v63  ;;  %v2450_v0 = vmul.f32 %v5988_v4, %v6062_v32  ;;  %v2846_v22 = vmul.f32 %v6055_v29, %v2512_v50 }
 0x2c1   : > { %4404 = vset.pattern.permute.xlu1 %v7227_v9  ;;  %v1053_v42 = vmul.f32 %v5307_v43, %v7339_v21  ;;  %v1868_v21 = vadd.f32 %v1836_v10, %v1672_v49  ;;  %v2451_v50 = vmul.f32 %v5988_v4, %v2415_v41  ;;  %v2849_v49 = vmul.f32 %v6055_v29, %v2515_v5 }
 0x2c2   : > { %1985 = vperm.xlu1 %4404, %v5967_v52   ;;  %2295 = vst.msk [vmem:[#allocation2 + $0xf9] sm:$0xff] %vm419_vm0, %v2262_v20  ;;  %v2350_v52 = vmul.f32 %v5983_v61, %v6046_v18  ;;  %v2779_v20 = vadd.f32 %v2747_v8, %v2679_v59  ;;  %v2551_v59 = vmul.f32 %v6002_v48, %v2515_v5 }
 0x2c3   : > { %v1085_v7 = vadd.f32 %v1053_v42, %v7341_v56  ;;  %v6101_v56 = vld [vmem:[%s7131_s3 + $0x8] ss:$0 sm:$0xff]  ;;  %v2550_v8 = vmul.f32 %v6002_v48, %v2514_v16  ;;  %v2483_v24 = vadd.f32 %v2451_v50, %v2351_v36  ;;  %v2781_v44 = vadd.f32 %v2749_v31, %v2681_v55  ;;  %v6138_v31 = vld [vmem:[#allocation2 + $0x4a] sm:$0xff] }
 0x2c4   : > { %v2482_v42 = vadd.f32 %v2450_v0, %v2350_v52  ;;  %v2879_v47 = vadd.f32 %v2847_v30, %v2779_v20  ;;  %v2650_v52 = vmul.f32 %v6025_v27, %v6096_v3  ;;  %v3048_v20 = vmul.f32 %v6077_v46, %v2415_v41 }
 0x2c5   : > { %v1962_v38 = vpop.permute.xlu1 %1961  ;;  %v2880_v30 = vadd.f32 %v2848_v15, %v2780_v62  ;;  %v1249_v18 = vmul.f32 %v5390_v37, %v5890_v51  ;;  %v3147_v41 = vmul.f32 %v6101_v56, %v2514_v16  ;;  %v2949_v50 = vmul.f32 %v6060_v11, %v6096_v3  ;;  %v2417_v51 = vld [vmem:[#allocation2 + $0x51] sm:$0xff] }
 0x2c6   : > { %v2032_v63 = vmul.f32 %v5455_v28, %v1962_v38  ;;  %4406 = vset.pattern.permute.xlu1 %v7219_v17  ;;  %v2878_v38 = vadd.f32 %v2846_v22, %v2778_v26  ;;  %v3148_v26 = vmul.f32 %v6101_v56, %v2515_v5  ;;  %v2583_v55 = vadd.f32 %v2551_v59, %v2483_v24 }
 0x2c7   : > { %1413 = vperm.xlu1 %4406, %v5994_v12  }
 0x2c8   : > { %v2064_v10 = vadd.f32 %v2032_v63, %v1868_v21  ;;  %v2948_v21 = vmul.f32 %v6060_v11, %v2315_v1  ;;  %v6108_v63 = vld [vmem:[#allocation2 + $0x50] sm:$0xff]  ;;  %v2582_v1 = vadd.f32 %v2550_v8, %v2482_v42  ;;  %v2881_v8 = vadd.f32 %v2849_v49, %v2781_v44 }
 0x2c9   : > { %v2651_v36 = vmul.f32 %v6025_v27, %v6108_v63  ;;  %v3049_v49 = vmul.f32 %v6077_v46, %v6119_v54 }
 0x2ca   : > { %v1198_v40 = vpop.permute.xlu1 %1197  ;;  %v2103_v0 = vadd.f32 %v5953_v19, %v2064_v10  ;;  %v2980_v22 = vadd.f32 %v2948_v21, %v2879_v47  ;;  %v3047_v10 = vmul.f32 %v6077_v46, %v6062_v32  ;;  %v2682_v5 = vadd.f32 %v2650_v52, %v2582_v1  ;;  %v1574_v21 = vpop.permute.xlu0 %1573  ;;  %v7344_v1 = vld [vmem:[#allocation9_spill] sm:$0xff] }
 0x2cb   : > { %4407 = vset.pattern.permute.xlu1 %v7342_v39  ;;  %v2979_v39 = vadd.f32 %v2947_v14, %v2878_v38  ;;  %v2750_v32 = vmul.f32 %v6044_v25, %v6119_v54  ;;  %v1445_v47 = vmul.f32 %v5397_v6, %v5924_v57  ;;  %v1253_v62 = vmul.f32 %v5390_v37, %v1198_v40 }
 0x2cc   : > { %1605 = vperm.xlu1 %4407, %v6013_v13   ;;  %v2135_v42 = vadd.f32 3.0, %v2103_v0  ;;  %v3080_v16 = vadd.f32 %v3048_v20, %v2980_v22  ;;  %v2981_v38 = vadd.f32 %v2949_v50, %v2880_v30  ;;  %v2683_v24 = vadd.f32 %v2651_v36, %v2583_v55  ;;  %v2517_v30 = vld [vmem:[#allocation2 + $0x52] sm:$0xff] }
 0x2cd   : > { %v3079_v59 = vadd.f32 %v3047_v10, %v2979_v39  ;;  %v1281_v14 = vadd.f32 %v1249_v18, %v1085_v7  ;;  %v2782_v57 = vadd.f32 %v2750_v32, %v2682_v5  ;;  %v2950_v40 = vmul.f32 %v6060_v11, %v6108_v63  ;;  %v6154_v10 = vld [vmem:[#allocation2 + $0x60] sm:$0xff] }
 0x2ce   : > { %v2167_v52 = vmax.f32 %v2135_v42, 0.0  ;;  %v2751_v22 = vmul.f32 %v6044_v25, %v2417_v51  ;;  %v1641_v7 = vmul.f32 %v5423_v53, %v1574_v21  ;;  %v3180_v36 = vadd.f32 %v3148_v26, %v3080_v16 }
 0x2cf   : > { %v6130_v15 = vpop.permute.xlu1 %1389  ;;  %v1477_v39 = vadd.f32 %v1445_v47, %v1281_v14  ;;  %v2982_v18 = vadd.f32 %v2950_v40, %v2881_v8  ;;  %v3081_v5 = vadd.f32 %v3049_v49, %v2981_v38  ;;  %v3050_v42 = vmul.f32 %v6077_v46, %v2417_v51  ;;  %v6161_v47 = vld [vmem:[%s4583_s22 + $0xf8] sm:$0xff]  ;;  %v7345_v8 = vld [vmem:[#allocation54_spill] sm:$0xff] }
 0x2d0   : > { %7343 = vst [vmem:[#allocation25_spill] sm:$0xff] %v6130_v15  ;;  %4409 = vset.pattern.permute.xlu1 %v7227_v9  ;;  %v6142_v15 = vadd.f32 %v1253_v62, %v7344_v1  ;;  %v2199_v20 = vmin.f32 %v2167_v52, 6.0  ;;  %v3179_v55 = vadd.f32 %v3147_v41, %v3079_v59  ;;  %v1837_v32 = vmul.f32 %v5435_v2, %v6049_v60  ;;  %v6174_v60 = vld [vmem:[%s7132_s4] ss:$0 sm:$0xff] }
 0x2d1   : > { %1989 = vperm.xlu1 %4409, %v5919_v45   ;;  %v2850_v45 = vmul.f32 %v6055_v29, %v6138_v31  ;;  %v2783_v62 = vadd.f32 %v2751_v22, %v2683_v24  ;;  %v3149_v26 = vmul.f32 %v6101_v56, %v6138_v31  ;;  %v1054_v38 = vmul.f32 %v5307_v43, %v7345_v8  ;;  %v6176_v24 = vld [vmem:[#allocation2 + $0x61] sm:$0xff] }
 0x2d2   : > { %v2231_v50 = vmul.f32 0.16666667, %v2199_v20  ;;  %v2851_v52 = vmul.f32 %v6055_v29, %v2517_v30  ;;  %v2951_v41 = vmul.f32 %v6060_v11, %v6154_v10  ;;  %v1673_v59 = vadd.f32 %v1641_v7, %v1477_v39  ;;  %v2319_v20 = vld [vmem:[#allocation2 + $0x68] sm:$0xff] }
 0x2d3   : > { %v2882_v21 = vadd.f32 %v2850_v45, %v2782_v57  ;;  %v6179_v14 = vadd.f32 %v6174_v60, %v3180_v36  ;;  %v3082_v43 = vadd.f32 %v3050_v42, %v2982_v18  ;;  %v3181_v1 = vadd.f32 %v3149_v26, %v3081_v5 }
 0x2d4   : > { %v6152_v44 = vpop.permute.xlu1 %1773  ;;  %v2263_v16 = vmul.f32 %v2231_v50, %v2103_v0  ;;  %v2352_v0 = vmul.f32 %v5983_v61, %v6096_v3  ;;  %v2353_v40 = vmul.f32 %v5983_v61, %v6108_v63  ;;  %v2452_v49 = vmul.f32 %v5988_v4, %v6119_v54 }
 0x2d5   : > { %4410 = vset.pattern.permute.xlu1 %v7219_v17  ;;  %7346 = vst [vmem:[#allocation11_spill] sm:$0xff] %v6179_v14  ;;  %v1869_v22 = vadd.f32 %v1837_v32, %v1673_v59  ;;  %v3150_v39 = vmul.f32 %v6101_v56, %v2517_v30  ;;  %v6192_v3 = vadd.f32 %v6174_v60, %v3179_v55  ;;  %v3251_v5 = vsel %vm419_vm0, %v6179_v14, 0.0  ;;  %v7349_v32 = vld [vmem:[#allocation38_spill] sm:$0xff] }
 0x2d6   : > { %1417 = vperm.xlu1 %4410, %v6161_v47   ;;  %2296 = vst.msk [vmem:[#allocation2 + $0x109] sm:$0xff] %vm419_vm0, %v2263_v16  ;;  %v2983_v7 = vadd.f32 %v2951_v41, %v2882_v21  ;;  %v2883_v36 = vadd.f32 %v2851_v52, %v2783_v62  ;;  %v2453_v63 = vmul.f32 %v5988_v4, %v2417_v51  ;;  %v6205_v16 = vld [vmem:[#allocation2 + $0x62] sm:$0xff] }
 0x2d7   : > { %7347 = vst [vmem:[#allocation18_spill] sm:$0xff] %v6192_v3  ;;  %v3051_v54 = vmul.f32 %v6077_v46, %v6176_v24  ;;  %v3182_v50 = vadd.f32 %v3150_v39, %v3082_v43  ;;  %v6201_v42 = vadd.f32 %v6174_v60, %v3181_v1  ;;  %v2952_v55 = vmul.f32 %v6060_v11, %v2319_v20 }
 0x2d8   : > { %v1086_v21 = vadd.f32 %v1054_v38, %v7349_v32  ;;  %v2484_v62 = vadd.f32 %v2452_v49, %v2352_v0  ;;  %v2485_v26 = vadd.f32 %v2453_v63, %v2353_v40  ;;  %v3250_v52 = vsel %vm419_vm0, %v6192_v3, 0.0 }
 0x2d9   : > { %v1966_v57 = vpop.permute.xlu1 %1965  ;;  %7348 = vst [vmem:[#allocation13_spill] sm:$0xff] %v6201_v42  ;;  %v3083_v41 = vadd.f32 %v3051_v54, %v2983_v7  ;;  %v2984_v59 = vadd.f32 %v2952_v55, %v2883_v36  ;;  %v2553_v1 = vmul.f32 %v6002_v48, %v2517_v30  ;;  %v3252_v38 = vadd.f32 %v3251_v5, %v3250_v52  ;;  %v2519_v30 = vld [vmem:[#allocation2 + $0x6a] sm:$0xff] }
 0x2da   : > { %v2033_v45 = vmul.f32 %v5455_v28, %v1966_v57  ;;  %4411 = vset.pattern.permute.xlu1 %v7235_v34  ;;  %v2552_v0 = vmul.f32 %v6002_v48, %v6138_v31  ;;  %v6217_v40 = vadd.f32 %v6174_v60, %v3182_v50  ;;  %v3253_v49 = vsel %vm419_vm0, %v6201_v42, 0.0  ;;  %v7351_v36 = vld [vmem:[#allocation55_spill] sm:$0xff] }
 0x2db   : > { %1801 = vperm.xlu1 %4411, %v6013_v13   ;;  %v2419_v13 = vld [vmem:[#allocation2 + $0x69] sm:$0xff]  ;;  %v1250_v7 = vmul.f32 %v5390_v37, %v5915_v58  ;;  %v2653_v54 = vmul.f32 %v6025_v27, %v2319_v20  ;;  %v2354_v55 = vmul.f32 %v5983_v61, %v6154_v10  ;;  %v3254_v32 = vadd.f32 %v3253_v49, %v3252_v38 }
 0x2dc   : > { %v2065_v18 = vadd.f32 %v2033_v45, %v1869_v22  ;;  %7350 = vst [vmem:[#allocation17_spill] sm:$0xff] %v6217_v40  ;;  %v3052_v22 = vmul.f32 %v6077_v46, %v2419_v13  ;;  %v3151_v45 = vmul.f32 %v6101_v56, %v6205_v16  ;;  %v2584_v39 = vadd.f32 %v2552_v0, %v2484_v62 }
 0x2dd   : > { %v1446_v62 = vmul.f32 %v5397_v6, %v5957_v23  ;;  %v2454_v58 = vmul.f32 %v5988_v4, %v6176_v24  ;;  %v3255_v52 = vsel %vm419_vm0, %v6217_v40, 0.0  ;;  %v2455_v23 = vmul.f32 %v5988_v4, %v2419_v13 }
 0x2de   : > { %v2104_v51 = vadd.f32 %v5953_v19, %v2065_v18  ;;  %v1202_v8 = vpop.permute.xlu1 %1201  ;;  %v3084_v18 = vadd.f32 %v3052_v22, %v2984_v59  ;;  %v3183_v5 = vadd.f32 %v3151_v45, %v3083_v41  ;;  %v3152_v41 = vmul.f32 %v6101_v56, %v2519_v30  ;;  %v1578_v59 = vpop.permute.xlu0 %1577 }
 0x2df   : > { %v1254_v43 = vmul.f32 %v5390_v37, %v1202_v8  ;;  %4412 = vset.pattern.permute.xlu1 %v7227_v9  ;;  %v2753_v42 = vmul.f32 %v6044_v25, %v2419_v13 }
 0x2e0   : > { %v2136_v57 = vadd.f32 3.0, %v2104_v51  ;;  %1993 = vperm.xlu1 %4412, %v5945_v35   ;;  %v2585_v35 = vadd.f32 %v2553_v1, %v2485_v26  ;;  %v2652_v26 = vmul.f32 %v6025_v27, %v6154_v10  ;;  %v1282_v1 = vadd.f32 %v1250_v7, %v1086_v21  ;;  %v2320_v7 = vld [vmem:[#allocation2 + $0x78] sm:$0xff] }
 0x2e1   : > { %v6227_v63 = vadd.f32 %v1254_v43, %v7351_v36  ;;  %v2355_v43 = vmul.f32 %v5983_v61, %v2319_v20  ;;  %v3184_v49 = vadd.f32 %v3152_v41, %v3084_v18  ;;  %v6248_v22 = vadd.f32 %v6174_v60, %v3183_v5  ;;  %v2422_v41 = vld [vmem:[#allocation2 + $0x91] sm:$0xff] }
 0x2e2   : > { %v2168_v31 = vmax.f32 %v2136_v57, 0.0  ;;  %v2684_v0 = vadd.f32 %v2652_v26, %v2584_v39  ;;  %v2685_v57 = vadd.f32 %v2653_v54, %v2585_v35  ;;  %v3256_v10 = vadd.f32 %v3255_v52, %v3254_v32  ;;  %v2322_v52 = vld [vmem:[#allocation2 + $0x90] sm:$0xff] }
 0x2e3   : > { %v6230_v50 = vpop.permute.xlu1 %1393  ;;  %7352 = vst [vmem:[#allocation24_spill] sm:$0xff] %v6248_v22  ;;  %v1478_v45 = vadd.f32 %v1446_v62, %v1282_v1  ;;  %v2752_v20 = vmul.f32 %v6044_v25, %v6176_v24  ;;  %v2487_v21 = vadd.f32 %v2455_v23, %v2355_v43  ;;  %v2554_v39 = vmul.f32 %v6002_v48, %v6205_v16  ;;  %v2321_v23 = vld [vmem:[#allocation2 + $0x80] sm:$0xff] }
 0x2e4   : > { %v2200_v8 = vmin.f32 %v2168_v31, 6.0  ;;  %4413 = vset.pattern.permute.xlu1 %v7235_v34  ;;  %v1642_v31 = vmul.f32 %v5423_v53, %v1578_v59  ;;  %v1838_v35 = vmul.f32 %v5435_v2, %v6152_v44  ;;  %v6263_v54 = vadd.f32 %v6174_v60, %v3184_v49 }
 0x2e5   : > { %1805 = vperm.xlu1 %4413, %v5994_v12   ;;  %v3257_v24 = vsel %vm419_vm0, %v6248_v22, 0.0  ;;  %v2784_v13 = vadd.f32 %v2752_v20, %v2684_v0  ;;  %v2486_v18 = vadd.f32 %v2454_v58, %v2354_v55  ;;  %v2555_v32 = vmul.f32 %v6002_v48, %v2519_v30  ;;  %v7355_v22 = vld [vmem:[#allocation56_spill] sm:$0xff] }
 0x2e6   : > { %v2232_v38 = vmul.f32 0.16666667, %v2200_v8  ;;  %7353 = vst [vmem:[#allocation26_spill] sm:$0xff] %v6263_v54  ;;  %v1674_v5 = vadd.f32 %v1642_v31, %v1478_v45  ;;  %v2852_v62 = vmul.f32 %v6055_v29, %v6205_v16  ;;  %v2853_v44 = vmul.f32 %v6055_v29, %v2519_v30  ;;  %v2420_v8 = vld [vmem:[#allocation2 + $0x79] sm:$0xff] }
 0x2e7   : > { %v2586_v59 = vadd.f32 %v2554_v39, %v2486_v18  ;;  %v3259_v58 = vsel %vm419_vm0, %v6263_v54, 0.0  ;;  %v2520_v30 = vld [vmem:[#allocation2 + $0x7a] sm:$0xff]  ;;  %v2587_v1 = vadd.f32 %v2555_v32, %v2487_v21  ;;  %v2356_v0 = vmul.f32 %v5983_v61, %v2320_v7 }
 0x2e8   : > { %v2264_v36 = vmul.f32 %v2232_v38, %v2104_v51  ;;  %v6251_v40 = vpop.permute.xlu1 %1777  ;;  %v2785_v51 = vadd.f32 %v2753_v42, %v2685_v57  ;;  %v2654_v42 = vmul.f32 %v6025_v27, %v2320_v7  ;;  %v1870_v43 = vadd.f32 %v1838_v35, %v1674_v5  ;;  %v2421_v21 = vld [vmem:[#allocation2 + $0x81] sm:$0xff] }
 0x2e9   : > { %1809 = vperm.xlu1 %4413, %v6161_v47   ;;  %v3258_v47 = vadd.f32 %v3257_v24, %v3256_v10  ;;  %v2884_v16 = vadd.f32 %v2852_v62, %v2784_v13  ;;  %v2456_v57 = vmul.f32 %v5988_v4, %v2420_v8  ;;  %v2358_v45 = vmul.f32 %v5983_v61, %v2322_v52 }
 0x2ea   : > { %2297 = vst.msk [vmem:[#allocation2 + $0x111] sm:$0xff] %vm419_vm0, %v2264_v36  ;;  %v2885_v38 = vadd.f32 %v2853_v44, %v2785_v51  ;;  %v2458_v31 = vmul.f32 %v5988_v4, %v2422_v41  ;;  %v2953_v36 = vmul.f32 %v6060_v11, %v2320_v7  ;;  %v2656_v20 = vmul.f32 %v6025_v27, %v2322_v52 }
 0x2eb   : > { %v6279_v49 = vadd.f32 %v3259_v58, %v3258_v47  ;;  %v6286_v39 = vmul.f32 %v6044_v25, %v2422_v41  ;;  %v2556_v35 = vmul.f32 %v6002_v48, %v2520_v30  ;;  %v2655_v51 = vmul.f32 %v6025_v27, %v2321_v23 }
 0x2ec   : > { %v7354_v13 = vmov 0   ;;  %v2955_v18 = vmul.f32 %v6060_v11, %v2322_v52  ;;  %v2754_v47 = vmul.f32 %v6044_v25, %v2420_v8  ;;  %v2854_v5 = vmul.f32 %v6055_v29, %v2520_v30 }
 0x2ed   : > { %4415 = vset.pattern.permute.xlu1 %v7227_v9  ;;  %v1970_v26 = vpop.permute.xlu1 %1969  ;;  %v2954_v7 = vmul.f32 %v6060_v11, %v2321_v23  ;;  %v6296_v32 = vmul.f32 %v6077_v46, %v2422_v41  ;;  %v2488_v62 = vadd.f32 %v2456_v57, %v2356_v0  ;;  %v2457_v52 = vmul.f32 %v5988_v4, %v2421_v21 }
 0x2ee   : > { %v2034_v55 = vmul.f32 %v5455_v28, %v1970_v26  ;;  %2001 = vperm.xlu1 %4415, %v5994_v12   ;;  %v2686_v12 = vadd.f32 %v2654_v42, %v2586_v59  ;;  %v2985_v59 = vadd.f32 %v2953_v36, %v2884_v16  ;;  %v3053_v41 = vmul.f32 %v6077_v46, %v2420_v8 }
 0x2ef   : > { %v2588_v58 = vadd.f32 %v2556_v35, %v2488_v62  ;;  %v2986_v57 = vadd.f32 %v2954_v7, %v2885_v38  ;;  %v2755_v16 = vmul.f32 %v6044_v25, %v2421_v21  ;;  %v3054_v8 = vmul.f32 %v6077_v46, %v2421_v21  ;;  %v1582_v38 = vpop.permute.xlu0 %1581 }
 0x2f0   : > { %v2066_v10 = vadd.f32 %v2034_v55, %v1870_v43  ;;  %v2786_v26 = vadd.f32 %v2754_v47, %v2686_v12  ;;  %v2357_v43 = vmul.f32 %v5983_v61, %v2321_v23  ;;  %v2521_v55 = vld [vmem:[#allocation2 + $0x82] sm:$0xff]  ;;  %v6310_v23 = vadd.f32 %v2458_v31, %v2358_v45  ;;  %v6316_v47 = vld [vmem:[#allocation2 + $0xb1] sm:$0xff] }
 0x2f1   : > { %v1447_v12 = vmul.f32 %v5397_v6, %v6029_v33  ;;  %v3085_v36 = vadd.f32 %v3053_v41, %v2985_v59  ;;  %v3323_v45 = vld [vmem:[%s7133_s5 + $0x10] sm:$0xff]  ;;  %v3322_v33 = vld [vmem:[%s7133_s5 + $0x8] sm:$0xff]  ;;  %v3086_v31 = vadd.f32 %v3054_v8, %v2986_v57  ;;  %v7356_v21 = vmov 0.0  }
 0x2f2   : > { %v1206_v24 = vpop.permute.xlu1 %1205  ;;  %4416 = vset.pattern.permute.xlu1 %v7354_v13  ;;  %v2105_v44 = vadd.f32 %v5953_v19, %v2066_v10  ;;  %v2687_v13 = vadd.f32 %v2655_v51, %v2587_v1  ;;  %v2886_v0 = vadd.f32 %v2854_v5, %v2786_v26  ;;  %v3153_v10 = vmul.f32 %v6101_v56, %v2520_v30  ;;  %v2323_v51 = vld [vmem:[#allocation2 + $0x98] sm:$0xff]  ;;  %v7357_v26 = vld [vmem:[#allocation14_spill] sm:$0xff] }
 0x2f3   : > { %v1255_v42 = vmul.f32 %v5390_v37, %v1206_v24  ;;  %v2489_v35 = vadd.f32 %v2457_v52, %v2357_v43  ;;  %v2688_v30 = vadd.f32 %v2656_v20, %v2588_v58  ;;  %4207 = vmatpush3.msra.mxu0 %v3323_v45  ;;  %4212 = vmatprep.mubr.msk.f32.mxu0 %vm4504_vm2, %v7356_v21 }
 0x2f4   : > { %v2137_v54 = vadd.f32 3.0, %v2105_v44  ;;  %v2787_v5 = vadd.f32 %v2755_v16, %v2687_v13  ;;  %v3185_v62 = vadd.f32 %v3153_v10, %v3085_v36  ;;  %v2657_v20 = vmul.f32 %v6025_v27, %v2323_v51  ;;  %4208 = vmatprep.subr.mxu0 %v7356_v21  ;;  %v6341_v10 = vld [vmem:[#allocation2 + $0xa8] sm:$0xff] }
 0x2f5   : > { %v6303_v14 = vadd.f32 %v1255_v42, %v7355_v22  ;;  %v2557_v22 = vmul.f32 %v6002_v48, %v2521_v55  ;;  %v2522_v42 = vld [vmem:[#allocation2 + $0x92] sm:$0xff]  ;;  %v1479_v59 = vadd.f32 %v1447_v12, %v7357_v26  ;;  %v1643_v43 = vmul.f32 %v5423_v53, %v1582_v38  ;;  %4209 = vmatpush3.msra.mxu0 %v3322_v33 }
 0x2f6   : > { %v2169_v1 = vmax.f32 %v2137_v54, 0.0  ;;  %v2987_v54 = vadd.f32 %v2955_v18, %v2886_v0  ;;  %v3321_v18 = vld [vmem:[%s7133_s5] sm:$0xff]  ;;  %v6336_v13 = vmul.f32 %v6044_v25, %v6316_v47  ;;  %v2855_v41 = vmul.f32 %v6055_v29, %v2521_v55  ;;  %4210 = vmatprep.subr.mxu0 %v7356_v21 }
 0x2f7   : > { %v6307_v24 = vpop.permute.xlu1 %1397  ;;  %v3154_v0 = vmul.f32 %v6101_v56, %v2521_v55  ;;  %v2956_v57 = vmul.f32 %v6060_v11, %v2323_v51  ;;  %v2589_v16 = vadd.f32 %v2557_v22, %v2489_v35  ;;  %v2423_v12 = vld [vmem:[#allocation2 + $0x99] sm:$0xff]  ;;  %v1839_v36 = vmul.f32 %v5435_v2, %v6251_v40  ;;  %4211 = vmatpush3.msra.mxu0 %v3321_v18  ;;  %v2424_v18 = vld [vmem:[#allocation2 + $0xa9] sm:$0xff] }
 0x2f8   : > { %v2201_v7 = vmin.f32 %v2169_v1, 6.0  ;;  %v2856_v1 = vmul.f32 %v6055_v29, %v2522_v42  ;;  %v2887_v38 = vadd.f32 %v2855_v41, %v2787_v5  ;;  %v6348_v45 = vadd.f32 %v6174_v60, %v3185_v62  ;;  %v2523_v5 = vld [vmem:[#allocation2 + $0x9a] sm:$0xff] }
 0x2f9   : > { %v2788_v55 = vadd.f32 %v6286_v39, %v2688_v30  ;;  %v2689_v26 = vadd.f32 %v2657_v20, %v2589_v16  ;;  %v3087_v35 = vadd.f32 %v6296_v32, %v2987_v54  ;;  %v2957_v22 = vmul.f32 %v6060_v11, %v6341_v10 }
 0x2fa   : > { %v2233_v52 = vmul.f32 0.16666667, %v2201_v7  ;;  %v3186_v7 = vadd.f32 %v3154_v0, %v3086_v31  ;;  %7358 = vst [vmem:[#allocation43_spill] sm:$0xff] %v6348_v45  ;;  %v1675_v33 = vadd.f32 %v1643_v43, %v1479_v59  ;;  %v2359_v40 = vmul.f32 %v5983_v61, %v2323_v51 }
 0x2fb   : > { %v2757_v31 = vmul.f32 %v6044_v25, %v2423_v12  ;;  %v2988_v62 = vadd.f32 %v2956_v57, %v2887_v38  ;;  %v2888_v39 = vadd.f32 %v2856_v1, %v2788_v55  ;;  %v3155_v30 = vmul.f32 %v6101_v56, %v2522_v42 }
 0x2fc   : > { %v6328_v58 = vpop.permute.xlu1 %1781  ;;  %v2265_v8 = vmul.f32 %v2233_v52, %v2105_v44  ;;  %v2459_v44 = vmul.f32 %v5988_v4, %v2423_v12  ;;  %v1871_v20 = vadd.f32 %v1839_v36, %v1675_v33  ;;  %v6361_v54 = vadd.f32 %v6174_v60, %v3186_v7  ;;  %v6367_v52 = vld [vmem:[#allocation2 + $0xb0] sm:$0xff] }
 0x2fd   : > { %v3261_v59 = vsel %vm419_vm0, %v6348_v45, 0.0  ;;  %v2558_v51 = vmul.f32 %v6002_v48, %v2522_v42  ;;  %v3056_v43 = vmul.f32 %v6077_v46, %v2423_v12  ;;  %v2559_v41 = vmul.f32 %v6002_v48, %v2523_v5 }
 0x2fe   : > { %2298 = vst.msk [vmem:[#allocation2 + $0x121] sm:$0xff] %vm419_vm0, %v2265_v8  ;;  %7359 = vst [vmem:[#allocation45_spill] sm:$0xff] %v6361_v54  ;;  %v2789_v0 = vadd.f32 %v2757_v31, %v2689_v26  ;;  %v2989_v57 = vadd.f32 %v2957_v22, %v2888_v39  ;;  %v2491_v1 = vadd.f32 %v2459_v44, %v2359_v40  ;;  %v2524_v40 = vld [vmem:[#allocation2 + $0xaa] sm:$0xff] }
 0x2ff   : > { %v2857_v36 = vmul.f32 %v6055_v29, %v2523_v5  ;;  %v3088_v8 = vadd.f32 %v3056_v43, %v2988_v62  ;;  %v2658_v38 = vmul.f32 %v6025_v27, %v6341_v10  ;;  %v3187_v7 = vadd.f32 %v3155_v30, %v3087_v35  ;;  %v2525_v62 = vld [vmem:[#allocation2 + $0xb2] sm:$0xff]  ;;  %v7360_v43 = vld [vmem:[#allocation57_spill] sm:$0xff] }
 0x300   : > { %v2958_v42 = vmul.f32 %v6060_v11, %v6367_v52  ;;  %v3057_v12 = vmul.f32 %v6077_v46, %v2424_v18  ;;  %v2590_v26 = vadd.f32 %v2558_v51, %v6310_v23  ;;  %v3156_v22 = vmul.f32 %v6101_v56, %v2523_v5 }
 0x301   : > { %v1974_v21 = vpop.permute.xlu1 %1973  ;;  %v2659_v44 = vmul.f32 %v6025_v27, %v6367_v52  ;;  %v3263_v35 = vsel %vm419_vm0, %v6361_v54, 0.0  ;;  %v6388_v5 = vadd.f32 %v6174_v60, %v3187_v7  ;;  %v2859_v45 = vmul.f32 %v6055_v29, %v2525_v62 }
 0x302   : > { %v2035_v32 = vmul.f32 %v5455_v28, %v1974_v21  ;;  %v2889_v21 = vadd.f32 %v2857_v36, %v2789_v0  ;;  %v3089_v39 = vadd.f32 %v3057_v12, %v2989_v57  ;;  %v3262_v54 = vadd.f32 %v3261_v59, %v6279_v49  ;;  %v1586_v59 = vpop.permute.xlu0 %1585 }
 0x303   : > { %7361 = vst [vmem:[#allocation46_spill] sm:$0xff] %v6388_v5  ;;  %v2758_v57 = vmul.f32 %v6044_v25, %v2424_v18  ;;  %v3158_v12 = vmul.f32 %v6101_v56, %v2525_v62 }
 0x304   : > { %v2067_v16 = vadd.f32 %v2035_v32, %v1871_v20  ;;  %v2591_v20 = vadd.f32 %v2559_v41, %v2491_v1  ;;  %v2690_v32 = vadd.f32 %v2658_v38, %v2590_v26  ;;  %v2990_v51 = vadd.f32 %v2958_v42, %v2889_v21  ;;  %v7362_v38 = vld [vmem:[#allocation25_spill] sm:$0xff] }
 0x305   : > { %v3058_v1 = vmul.f32 %v6077_v46, %v6316_v47  ;;  %v1448_v7 = vmul.f32 %v5397_v6, %v7362_v38  ;;  %v3264_v26 = vadd.f32 %v3263_v35, %v3262_v54  ;;  %v2858_v54 = vmul.f32 %v6055_v29, %v2524_v40 }
 0x306   : > { %v2106_v55 = vadd.f32 %v5953_v19, %v2067_v16  ;;  %v1210_v33 = vpop.permute.xlu1 %1209  ;;  %v3188_v19 = vadd.f32 %v3156_v22, %v3088_v8  ;;  %v3157_v16 = vmul.f32 %v6101_v56, %v2524_v40  ;;  %v2691_v0 = vadd.f32 %v2659_v44, %v2591_v20  ;;  %v2326_v8 = vld [vmem:[#allocation2 + $0xc0] sm:$0xff] }
 0x307   : > { %v1256_v31 = vmul.f32 %v5390_v37, %v1210_v33  ;;  %v2790_v49 = vadd.f32 %v2758_v57, %v2690_v32  ;;  %v3265_v44 = vsel %vm419_vm0, %v6388_v5, 0.0  ;;  %v3090_v21 = vadd.f32 %v3058_v1, %v2990_v51  ;;  %v7365_v32 = vld [vmem:[#allocation15_spill] sm:$0xff] }
 0x308   : > { %v2138_v30 = vadd.f32 3.0, %v2106_v55  ;;  %v3189_v36 = vadd.f32 %v3157_v16, %v3089_v39  ;;  %v6402_v22 = vadd.f32 %v6174_v60, %v3188_v19  ;;  %v6408_v39 = vld [vmem:[#allocation2 + $0xc8] sm:$0xff]  ;;  %v2460_v20 = vmul.f32 %v5988_v4, %v2424_v18 }
 0x309   : > { %v6385_v23 = vadd.f32 %v1256_v31, %v7360_v43  ;;  %v2360_v31 = vmul.f32 %v5983_v61, %v6341_v10  ;;  %v2791_v43 = vadd.f32 %v6336_v13, %v2691_v0  ;;  %v2959_v35 = vmul.f32 %v6060_v11, %v2326_v8 }
 0x30a   : > { %v2170_v33 = vmax.f32 %v2138_v30, 0.0  ;;  %7363 = vst [vmem:[#allocation39_spill] sm:$0xff] %v6402_v22  ;;  %v6415_v19 = vadd.f32 %v6174_v60, %v3189_v36  ;;  %v1480_v16 = vadd.f32 %v1448_v7, %v7365_v32  ;;  %v3267_v57 = vsel %vm419_vm0, %v6402_v22, 0.0  ;;  %v2426_v7 = vld [vmem:[#allocation2 + $0xc1] sm:$0xff] }
 0x30b   : > { %v6394_v41 = vpop.permute.xlu1 %1401  ;;  %v2361_v13 = vmul.f32 %v5983_v61, %v6367_v52  ;;  %v2890_v18 = vadd.f32 %v2858_v54, %v2790_v49  ;;  %v2960_v0 = vmul.f32 %v6060_v11, %v6408_v39  ;;  %v2461_v1 = vmul.f32 %v5988_v4, %v6316_v47  ;;  %v1590_v54 = vpop.permute.xlu0 %1589 }
 0x30c   : > { %v2202_v42 = vmin.f32 %v2170_v33, 6.0  ;;  %7364 = vst [vmem:[#allocation40_spill] sm:$0xff] %v6415_v19  ;;  %v1644_v33 = vmul.f32 %v5423_v53, %v1586_v59  ;;  %v3266_v36 = vadd.f32 %v3265_v44, %v3264_v26  ;;  %v3190_v38 = vadd.f32 %v3158_v12, %v3090_v21  ;;  %v2427_v12 = vld [vmem:[#allocation2 + $0xc9] sm:$0xff] }
 0x30d   : > { %v2561_v59 = vmul.f32 %v6002_v48, %v2525_v62  ;;  %v2991_v52 = vadd.f32 %v2959_v35, %v2890_v18  ;;  %v2891_v49 = vadd.f32 %v2859_v45, %v2791_v43  ;;  %v2560_v22 = vmul.f32 %v6002_v48, %v2524_v40  ;;  %v2527_v18 = vld [vmem:[#allocation2 + $0xca] sm:$0xff] }
 0x30e   : > { %v2234_v30 = vmul.f32 0.16666667, %v2202_v42  ;;  %v2526_v42 = vld [vmem:[#allocation2 + $0xc2] sm:$0xff]  ;;  %v3268_v32 = vadd.f32 %v3267_v57, %v3266_v36  ;;  %v3269_v47 = vsel %vm419_vm0, %v6415_v19, 0.0  ;;  %v1676_v26 = vadd.f32 %v1644_v33, %v1480_v16 }
 0x30f   : > { %v2493_v44 = vadd.f32 %v2461_v1, %v2361_v13  ;;  %v3059_v21 = vmul.f32 %v6077_v46, %v2426_v7  ;;  %v6439_v62 = vadd.f32 %v6174_v60, %v3190_v38  ;;  %v2660_v45 = vmul.f32 %v6025_v27, %v2326_v8  ;;  %v6444_v33 = vpop.permute.xlu0 %1593 }
 0x310   : > { %v2266_v10 = vmul.f32 %v2234_v30, %v2106_v55  ;;  %v6419_v51 = vpop.permute.xlu1 %1785  ;;  %v1840_v55 = vmul.f32 %v5435_v2, %v6328_v58  ;;  %v2492_v30 = vadd.f32 %v2460_v20, %v2360_v31  ;;  %v2992_v58 = vadd.f32 %v2960_v0, %v2891_v49  ;;  %v7367_v49 = vld [vmem:[#allocation23_spill] sm:$0xff] }
 0x311   : > { %7366 = vst [vmem:[#allocation47_spill] sm:$0xff] %v6439_v62  ;;  %v3270_v43 = vadd.f32 %v3269_v47, %v3268_v32  ;;  %v3091_v35 = vadd.f32 %v3059_v21, %v2991_v52  ;;  %v3060_v16 = vmul.f32 %v6077_v46, %v2427_v12  ;;  %v2362_v57 = vmul.f32 %v5983_v61, %v2326_v8 }
 0x312   : > { %2299 = vst.msk [vmem:[#allocation2 + $0x129] sm:$0xff] %vm419_vm0, %v2266_v10  ;;  %v3159_v10 = vmul.f32 %v6101_v56, %v2526_v42  ;;  %v1872_v31 = vadd.f32 %v1840_v55, %v1676_v26  ;;  %v2592_v20 = vadd.f32 %v2560_v22, %v2492_v30  ;;  %v2462_v13 = vmul.f32 %v5988_v4, %v2426_v7  ;;  %v6453_v22 = vld [vmem:[%s7130_s2] ss:$0 sm:$0xff] }
 0x313   : > { %v2661_v0 = vmul.f32 %v6025_v27, %v6408_v39  ;;  %v3092_v36 = vadd.f32 %v3060_v16, %v2992_v58  ;;  %v3271_v8 = vsel %vm419_vm0, %v6439_v62, 0.0  ;;  %v1844_v32 = vmul.f32 %v5435_v2, %v7367_v49  ;;  %v6463_v26 = vpop.permute.xlu0 %1597  ;;  %v2528_v62 = vld [vmem:[#allocation2 + $0xda] sm:$0xff] }
 0x314   : > { %v3191_v38 = vadd.f32 %v3159_v10, %v3091_v35  ;;  %v2692_v55 = vadd.f32 %v2660_v45, %v2592_v20  ;;  %v3160_v47 = vmul.f32 %v6101_v56, %v2527_v18  ;;  %v2760_v21 = vmul.f32 %v6044_v25, %v2426_v7 }
 0x315   : > { %v1978_v5 = vpop.permute.xlu1 %1977  ;;  %v2363_v45 = vmul.f32 %v5983_v61, %v6408_v39  ;;  %v2761_v16 = vmul.f32 %v6044_v25, %v2427_v12  ;;  %v2562_v7 = vmul.f32 %v6002_v48, %v2526_v42  ;;  %v2861_v39 = vmul.f32 %v6055_v29, %v2527_v18 }
 0x316   : > { %v2036_v40 = vmul.f32 %v5455_v28, %v1978_v5  ;;  %v2593_v5 = vadd.f32 %v2561_v59, %v2493_v44  ;;  %v3272_v59 = vadd.f32 %v3271_v8, %v3270_v43  ;;  %v2494_v44 = vadd.f32 %v2462_v13, %v2362_v57 }
 0x317   : > { %v6470_v20 = vadd.f32 %v6174_v60, %v3191_v38  ;;  %v2792_v35 = vadd.f32 %v2760_v21, %v2692_v55  ;;  %v1645_v43 = vmul.f32 %v5423_v53, %v1590_v54  ;;  %v2563_v13 = vmul.f32 %v6002_v48, %v2527_v18  ;;  %v1602_v21 = vpop.permute.xlu0 %1601 }
 0x318   : > { %v2068_v1 = vadd.f32 %v2036_v40, %v1872_v31  ;;  %v2693_v58 = vadd.f32 %v2661_v0, %v2593_v5  ;;  %v2463_v31 = vmul.f32 %v5988_v4, %v2427_v12  ;;  %v3192_v40 = vadd.f32 %v3160_v47, %v3092_v36  ;;  %v2329_v5 = vld [vmem:[#allocation2 + $0xe0] sm:$0xff] }
 0x319   : > { %7368 = vst [vmem:[#allocation3_spill] sm:$0xff] %v6470_v20  ;;  %v2860_v0 = vmul.f32 %v6055_v29, %v2526_v42  ;;  %v1449_v38 = vmul.f32 %v5397_v6, %v6230_v50  ;;  %v3273_v42 = vsel %vm419_vm0, %v6470_v20, 0.0  ;;  %v2962_v18 = vmul.f32 %v6060_v11, %v2329_v5 }
 0x31a   : > { %v2107_v30 = vadd.f32 %v6453_v22, %v2068_v1  ;;  %v6456_v52 = vpop.permute.xlu1 %1213  ;;  %v2328_v1 = vld [vmem:[#allocation2 + $0xd8] sm:$0xff]  ;;  %v2793_v8 = vadd.f32 %v2761_v16, %v2693_v58  ;;  %v2495_v49 = vadd.f32 %v2463_v31, %v2363_v45  ;;  %v6482_v54 = vadd.f32 %v6174_v60, %v3192_v40 }
 0x31b   : > { %v2961_v47 = vmul.f32 %v6060_v11, %v2328_v1  ;;  %v1648_v58 = vmul.f32 %v5423_v53, %v1602_v21  ;;  %v2594_v16 = vadd.f32 %v2562_v7, %v2494_v44  ;;  %v2662_v45 = vmul.f32 %v6025_v27, %v2328_v1 }
 0x31c   : > { %v2139_v10 = vadd.f32 3.0, %v2107_v30  ;;  %7369 = vst [vmem:[#allocation50_spill] sm:$0xff] %v6482_v54  ;;  %v2663_v31 = vmul.f32 %v6025_v27, %v2329_v5  ;;  %v2893_v40 = vadd.f32 %v2861_v39, %v2793_v8  ;;  %v1481_v19 = vadd.f32 %v1449_v38, %v6142_v15  ;;  %v6508_v38 = vld [vmem:[#allocation2 + $0xf0] sm:$0xff] }
 0x31d   : > { %v2595_v9 = vadd.f32 %v2563_v13, %v2495_v49  ;;  %v3274_v17 = vadd.f32 %v3273_v42, %v3272_v59  ;;  %v2364_v44 = vmul.f32 %v5983_v61, %v2328_v1  ;;  %v1841_v7 = vmul.f32 %v5435_v2, %v6419_v51 }
 0x31e   : > { %v2171_v57 = vmax.f32 %v2139_v10, 0.0  ;;  %v3161_v39 = vmul.f32 %v6101_v56, %v2528_v62  ;;  %v2862_v49 = vmul.f32 %v6055_v29, %v2528_v62 }
 0x31f   : > { %v1406_v36 = vpop.permute.xlu1 %1405  ;;  %v2695_v13 = vadd.f32 %v2663_v31, %v2595_v9 }
 0x320   : > { %v2203_v55 = vmin.f32 %v2171_v57, 6.0  ;;  %v1452_v12 = vmul.f32 %v5397_v6, %v1406_v36  ;;  %v2892_v57 = vadd.f32 %v2860_v0, %v2792_v35  ;;  %v2428_v36 = vld [vmem:[#allocation2 + $0xd9] sm:$0xff]  ;;  %v2994_v35 = vadd.f32 %v2962_v18, %v2893_v40 }
 0x321   : > { %v3061_v0 = vmul.f32 %v6077_v46, %v2428_v36  ;;  %v2464_v59 = vmul.f32 %v5988_v4, %v2428_v36  ;;  %v2762_v8 = vmul.f32 %v6044_v25, %v2428_v36  ;;  %v2331_v18 = vld [vmem:[#allocation2 + $0xf8] sm:$0xff] }
 0x322   : > { %v2235_v10 = vmul.f32 0.16666667, %v2203_v55  ;;  %v1484_v50 = vadd.f32 %v1452_v12, %v6385_v23  ;;  %v2993_v21 = vadd.f32 %v2961_v47, %v2892_v57  ;;  %v2429_v55 = vld [vmem:[#allocation2 + $0xe1] sm:$0xff]  ;;  %v3275_v23 = vsel %vm419_vm0, %v6482_v54, 0.0 }
 0x323   : > { %v3062_v1 = vmul.f32 %v6077_v46, %v2429_v55  ;;  %v1677_v12 = vadd.f32 %v1645_v43, %v1481_v19  ;;  %v2465_v47 = vmul.f32 %v5988_v4, %v2429_v55  ;;  %v2963_v19 = vmul.f32 %v6060_v11, %v6508_v38 }
 0x324   : > { %v2267_v3 = vmul.f32 %v2235_v10, %v2107_v30  ;;  %v1680_v20 = vadd.f32 %v1648_v58, %v1484_v50  ;;  %v6493_v34 = vpop.permute.xlu1 %1789  ;;  %v2694_v30 = vadd.f32 %v2662_v45, %v2594_v16  ;;  %v3093_v51 = vadd.f32 %v3061_v0, %v2993_v21  ;;  %v2530_v0 = vld [vmem:[#allocation2 + $0xf2] sm:$0xff] }
 0x325   : > { %v3094_v42 = vadd.f32 %v3062_v1, %v2994_v35  ;;  %v1873_v58 = vadd.f32 %v1841_v7, %v1677_v12  ;;  %v2564_v43 = vmul.f32 %v6002_v48, %v2528_v62  ;;  %v2964_v36 = vmul.f32 %v6060_v11, %v2331_v18 }
 0x326   : > { %2300 = vst.msk [vmem:[#allocation2 + $0x139] sm:$0xff] %vm419_vm0, %v2267_v3  ;;  %v6501_v15 = vadd.f32 %v1844_v32, %v1680_v20  ;;  %v2365_v3 = vmul.f32 %v5983_v61, %v2329_v5  ;;  %v2529_v32 = vld [vmem:[#allocation2 + $0xe2] sm:$0xff]  ;;  %v2763_v20 = vmul.f32 %v6044_v25, %v2429_v55  ;;  %v2794_v50 = vadd.f32 %v2762_v8, %v2694_v30  ;;  %v2430_v30 = vld [vmem:[#allocation2 + $0xf1] sm:$0xff] }
 0x327   : > { %v3193_v57 = vadd.f32 %v3161_v39, %v3093_v51  ;;  %v3162_v5 = vmul.f32 %v6101_v56, %v2529_v32  ;;  %v2863_v31 = vmul.f32 %v6055_v29, %v2529_v32  ;;  %v6521_v21 = vadd.f32 %v3275_v23, %v3274_v17 }
 0x328   : > { %v2795_v16 = vadd.f32 %v2763_v20, %v2695_v13  ;;  %v2894_v40 = vadd.f32 %v2862_v49, %v2794_v50  ;;  %v2496_v55 = vadd.f32 %v2464_v59, %v2364_v44  ;;  %v2497_v35 = vadd.f32 %v2465_v47, %v2365_v3  ;;  %v2431_v44 = vld [vmem:[#allocation2 + $0xf9] sm:$0xff]  ;;  %v6539_v49 = vld [vmem:[%s7131_s3 + $0x8] ss:$0 sm:$0xff] }
 0x329   : > { %v1982_v9 = vpop.permute.xlu1 %1981  ;;  %v3194_v7 = vadd.f32 %v3162_v5, %v3094_v42  ;;  %v2664_v56 = vmul.f32 %v6025_v27, %v6508_v38  ;;  %v6529_v1 = vadd.f32 %v6174_v60, %v3193_v57  ;;  %v2565_v17 = vmul.f32 %v6002_v48, %v2529_v32  ;;  %v2531_v5 = vld [vmem:[#allocation2 + $0xfa] sm:$0xff] }
 0x32a   : > { %v2037_v10 = vmul.f32 %v5455_v28, %v1982_v9  ;;  %v2895_v62 = vadd.f32 %v2863_v31, %v2795_v16  ;;  %v2995_v8 = vadd.f32 %v2963_v19, %v2894_v40  ;;  %v2596_v23 = vadd.f32 %v2564_v43, %v2496_v55 }
 0x32b   : > { %v1646_v59 = vmul.f32 %v5423_v53, %v6444_v33  ;;  %v3063_v51 = vmul.f32 %v6077_v46, %v2430_v30  ;;  %v2665_v3 = vmul.f32 %v6025_v27, %v2331_v18  ;;  %v3163_v9 = vmul.f32 %v6539_v49, %v2530_v0 }
 0x32c   : > { %v2069_v45 = vadd.f32 %v2037_v10, %v1873_v58  ;;  %v2996_v20 = vadd.f32 %v2964_v36, %v2895_v62  ;;  %v2597_v47 = vadd.f32 %v2565_v17, %v2497_v35  ;;  %v6544_v32 = vmul.f32 %v5423_v53, %v6463_v26  ;;  %v2332_v62 = vld [vmem:[#allocation2 + $0x108] sm:$0xff] }
 0x32d   : > { %v6547_v33 = vadd.f32 %v6174_v60, %v3194_v7  ;;  %v2696_v58 = vadd.f32 %v2664_v56, %v2596_v23  ;;  %v3095_v10 = vadd.f32 %v3063_v51, %v2995_v8  ;;  %v3064_v50 = vmul.f32 %v6077_v46, %v2431_v44 }
 0x32e   : > { %v2108_v13 = vadd.f32 %v6453_v22, %v2069_v45  ;;  %v6524_v39 = vpop.permute.xlu1 %1217  ;;  %v3277_v57 = vsel %vm419_vm0, %v6529_v1, 0.0  ;;  %v2367_v19 = vmul.f32 %v5983_v61, %v2331_v18  ;;  %v2467_v43 = vmul.f32 %v5988_v4, %v2431_v44 }
 0x32f   : > { %v1450_v26 = vmul.f32 %v5397_v6, %v6307_v24  ;;  %v2764_v31 = vmul.f32 %v6044_v25, %v2430_v30  ;;  %v2697_v40 = vadd.f32 %v2665_v3, %v2597_v47  ;;  %v3096_v36 = vadd.f32 %v3064_v50, %v2996_v20 }
 0x330   : > { %v2140_v12 = vadd.f32 3.0, %v2108_v13  ;;  %v3195_v55 = vadd.f32 %v3163_v9, %v3095_v10  ;;  %v2366_v35 = vmul.f32 %v5983_v61, %v6508_v38  ;;  %v2466_v7 = vmul.f32 %v5988_v4, %v2430_v30 }
 0x331   : > { %v3279_v18 = vsel %vm419_vm0, %v6547_v33, 0.0  ;;  %v2796_v8 = vadd.f32 %v2764_v31, %v2696_v58  ;;  %v2765_v17 = vmul.f32 %v6044_v25, %v2431_v44  ;;  %v2864_v24 = vmul.f32 %v6055_v29, %v2530_v0  ;;  %v2432_v31 = vld [vmem:[#allocation2 + $0x109] sm:$0xff] }
 0x332   : > { %v2172_v42 = vmax.f32 %v2140_v12, 0.0  ;;  %v3164_v23 = vmul.f32 %v6539_v49, %v2531_v5  ;;  %v6567_v12 = vld [vmem:[#allocation2 + $0x110] sm:$0xff]  ;;  %v2499_v51 = vadd.f32 %v2467_v43, %v2367_v19  ;;  %v2566_v3 = vmul.f32 %v6002_v48, %v2530_v0 }
 0x333   : > { %v6550_v16 = vpop.permute.xlu1 %1409  ;;  %v1482_v38 = vadd.f32 %v1450_v26, %v6227_v63  ;;  %v2797_v9 = vadd.f32 %v2765_v17, %v2697_v40  ;;  %v2965_v47 = vmul.f32 %v6060_v11, %v2332_v62  ;;  %v6575_v44 = vadd.f32 %v6174_v60, %v3195_v55  ;;  %v2532_v40 = vld [vmem:[#allocation2 + $0x10a] sm:$0xff]  ;;  %v1610_v55 = vpop.permute.xlu0 %1609 }
 0x334   : > { %v2204_v45 = vmin.f32 %v2172_v42, 6.0  ;;  %v3196_v42 = vadd.f32 %v3164_v23, %v3096_v36  ;;  %v2498_v58 = vadd.f32 %v2466_v7, %v2366_v35  ;;  %v2567_v10 = vmul.f32 %v6002_v48, %v2531_v5  ;;  %v2433_v7 = vld [vmem:[#allocation2 + $0x111] sm:$0xff] }
 0x335   : > { %v2667_v50 = vmul.f32 %v6025_v27, %v6567_v12  ;;  %v1842_v0 = vmul.f32 %v5435_v2, %v6493_v34  ;;  %v2865_v63 = vmul.f32 %v6055_v29, %v2531_v5  ;;  %v2666_v19 = vmul.f32 %v6025_v27, %v2332_v62 }
 0x336   : > { %v2236_v56 = vmul.f32 0.16666667, %v2204_v45  ;;  %v2966_v43 = vmul.f32 %v6060_v11, %v6567_v12  ;;  %v2598_v26 = vadd.f32 %v2566_v3, %v2498_v58  ;;  %v2599_v45 = vadd.f32 %v2567_v10, %v2499_v51  ;;  %v2533_v58 = vld [vmem:[#allocation2 + $0x112] sm:$0xff]  ;;  %v6601_v10 = vld [vmem:[#allocation2 + $0x120] sm:$0xff] }
 0x337   : > { %v1678_v36 = vadd.f32 %v1646_v59, %v1482_v38  ;;  %v3278_v35 = vadd.f32 %v3277_v57, %v6521_v21  ;;  %v6589_v5 = vadd.f32 %v6174_v60, %v3196_v42  ;;  %v3065_v59 = vmul.f32 %v6077_v46, %v2432_v31 }
 0x338   : > { %v2268_v30 = vmul.f32 %v2236_v56, %v2108_v13  ;;  %v6571_v20 = vpop.permute.xlu1 %1793  ;;  %v2896_v13 = vadd.f32 %v2864_v24, %v2796_v8  ;;  %v2897_v56 = vadd.f32 %v2865_v63, %v2797_v9  ;;  %v3281_v8 = vsel %vm419_vm0, %v6575_v44, 0.0 }
 0x339   : > { %7370 = vst [vmem:[#allocation27_spill] sm:$0xff] %v6589_v5  ;;  %v1874_v24 = vadd.f32 %v1842_v0, %v1678_v36  ;;  %v2699_v51 = vadd.f32 %v2667_v50, %v2599_v45  ;;  %v3280_v3 = vadd.f32 %v3279_v18, %v3278_v35  ;;  %v3165_v21 = vmul.f32 %v6539_v49, %v2532_v40  ;;  %v6603_v50 = vld [vmem:[#allocation2 + $0x128] sm:$0xff] }
 0x33a   : > { %2301 = vst.msk [vmem:[#allocation2 + $0x141] sm:$0xff] %vm419_vm0, %v2268_v30  ;;  %v2997_v17 = vadd.f32 %v2965_v47, %v2896_v13  ;;  %v2698_v30 = vadd.f32 %v2666_v19, %v2598_v26  ;;  %v2998_v38 = vadd.f32 %v2966_v43, %v2897_v56  ;;  %v2767_v57 = vmul.f32 %v6044_v25, %v2433_v7  ;;  %v1614_v43 = vpop.permute.xlu0 %1613 }
 0x33b   : > { %v6598_v9 = vmul.f32 %v5423_v53, %v1610_v55  ;;  %v3282_v47 = vadd.f32 %v3281_v8, %v3280_v3  ;;  %v2766_v42 = vmul.f32 %v6044_v25, %v2432_v31  ;;  %v3066_v18 = vmul.f32 %v6077_v46, %v2433_v7 }
 0x33c   : > { %v3097_v0 = vadd.f32 %v3065_v59, %v2997_v17  ;;  %v3283_v63 = vsel %vm419_vm0, %v6589_v5, 0.0  ;;  %v2368_v13 = vmul.f32 %v5983_v61, %v2332_v62  ;;  %v2866_v19 = vmul.f32 %v6055_v29, %v2532_v40 }
 0x33d   : > { %v1986_v34 = vpop.permute.xlu1 %1985  ;;  %v2799_v36 = vadd.f32 %v2767_v57, %v2699_v51  ;;  %v1451_v55 = vmul.f32 %v5397_v6, %v6394_v41  ;;  %v2798_v35 = vadd.f32 %v2766_v42, %v2698_v30  ;;  %v2867_v8 = vmul.f32 %v6055_v29, %v2533_v58  ;;  %v6628_v42 = vld [vmem:[#allocation2 + $0x129] sm:$0xff] }
 0x33e   : > { %v2038_v23 = vmul.f32 %v5455_v28, %v1986_v34  ;;  %v3098_v34 = vadd.f32 %v3066_v18, %v2998_v38  ;;  %v3197_v56 = vadd.f32 %v3165_v21, %v3097_v0  ;;  %v2967_v62 = vmul.f32 %v6060_v11, %v6601_v10  ;;  %v1998_v38 = vpop.permute.xlu0 %1997  ;;  %v6630_v18 = vld [vmem:[#allocation2 + $0x122] sm:$0xff] }
 0x33f   : > { %v2369_v51 = vmul.f32 %v5983_v61, %v6567_v12  ;;  %v2469_v3 = vmul.f32 %v5988_v4, %v2433_v7  ;;  %v3166_v41 = vmul.f32 %v6539_v49, %v2533_v58  ;;  %v6626_v30 = vmul.f32 %v5423_v53, %v1614_v43  ;;  %v6636_v7 = vld [vmem:[%s7132_s4] ss:$0 sm:$0xff] }
 0x340   : > { %v2070_v60 = vadd.f32 %v2038_v23, %v1874_v24  ;;  %v2968_v24 = vmul.f32 %v6060_v11, %v6603_v50  ;;  %v2468_v23 = vmul.f32 %v5988_v4, %v2432_v31  ;;  %v2898_v21 = vadd.f32 %v2866_v19, %v2798_v35 }
 0x341   : > { %v2899_v57 = vadd.f32 %v2867_v8, %v2799_v36  ;;  %v1483_v31 = vadd.f32 %v1451_v55, %v6303_v14  ;;  %v3198_v12 = vadd.f32 %v3166_v41, %v3098_v34  ;;  %v6639_v43 = vadd.f32 %v6636_v7, %v3197_v56 }
 0x342   : > { %v2109_v26 = vadd.f32 %v6453_v22, %v2070_v60  ;;  %v6611_v45 = vpop.permute.xlu1 %1413  ;;  %v2434_v60 = vld [vmem:[#allocation2 + $0x121] sm:$0xff]  ;;  %v2568_v19 = vmul.f32 %v6002_v48, %v2532_v40  ;;  %v2999_v35 = vadd.f32 %v2967_v62, %v2898_v21  ;;  %v2500_v54 = vadd.f32 %v2468_v23, %v2368_v13  ;;  %v2535_v13 = vld [vmem:[#allocation2 + $0x12a] sm:$0xff] }
 0x343   : > { %v3000_v8 = vadd.f32 %v2968_v24, %v2899_v57  ;;  %v1843_v14 = vmul.f32 %v5435_v2, %v6571_v20  ;;  %v6645_v55 = vmul.f32 %v5455_v28, %v1998_v38  ;;  %v2501_v34 = vadd.f32 %v2469_v3, %v2369_v51 }
 0x344   : > { %v2141_v17 = vadd.f32 3.0, %v2109_v26  ;;  %v3067_v5 = vmul.f32 %v6077_v46, %v2434_v60  ;;  %v3068_v56 = vmul.f32 %v6077_v46, %v6628_v42  ;;  %v3167_v40 = vmul.f32 %v6539_v49, %v6630_v18 }
 0x345   : > { %v6655_v20 = vadd.f32 %v6636_v7, %v3198_v12  ;;  %v3285_v62 = vsel %vm419_vm0, %v6639_v43, 0.0  ;;  %v2600_v51 = vadd.f32 %v2568_v19, %v2500_v54  ;;  %v2668_v38 = vmul.f32 %v6025_v27, %v6601_v10 }
 0x346   : > { %v2173_v59 = vmax.f32 %v2141_v17, 0.0  ;;  %v3284_v17 = vadd.f32 %v3283_v63, %v3282_v47  ;;  %v2569_v47 = vmul.f32 %v6002_v48, %v2533_v58  ;;  %v1679_v63 = vadd.f32 %v6544_v32, %v1483_v31  ;;  %v2006_v32 = vpop.permute.xlu0 %2005 }
 0x347   : > { %v1606_v0 = vpop.permute.xlu1 %1605  ;;  %v3099_v3 = vadd.f32 %v3067_v5, %v2999_v35  ;;  %v2669_v31 = vmul.f32 %v6025_v27, %v6603_v50  ;;  %v3168_v12 = vmul.f32 %v6539_v49, %v2535_v13  ;;  %v2370_v54 = vmul.f32 %v5983_v61, %v6601_v10 }
 0x348   : > { %v2205_v36 = vmin.f32 %v2173_v59, 6.0  ;;  %v3100_v59 = vadd.f32 %v3068_v56, %v3000_v8  ;;  %v1875_v21 = vadd.f32 %v1843_v14, %v1679_v63  ;;  %v2601_v57 = vadd.f32 %v2569_v47, %v2501_v34 }
 0x349   : > { %v1257_v5 = vmul.f32 %v5390_v37, %v6456_v52  ;;  %v3287_v35 = vsel %vm419_vm0, %v6655_v20, 0.0  ;;  %v2470_v8 = vmul.f32 %v5988_v4, %v2434_v60  ;;  %v2371_v14 = vmul.f32 %v5983_v61, %v6603_v50 }
 0x34a   : > { %v2237_v41 = vmul.f32 0.16666667, %v2205_v36  ;;  %v3286_v36 = vadd.f32 %v3285_v62, %v3284_v17  ;;  %v2471_v34 = vmul.f32 %v5988_v4, %v6628_v42  ;;  %v1453_v17 = vmul.f32 %v5397_v6, %v6550_v16 }
 0x34b   : > { %v6681_v52 = vmul.f32 %v5455_v28, %v2006_v32  ;;  %v2570_v47 = vmul.f32 %v6002_v48, %v6630_v18  ;;  %v2701_v63 = vadd.f32 %v2669_v31, %v2601_v57 }
 0x34c   : > { %v2269_v24 = vmul.f32 %v2237_v41, %v2109_v26  ;;  %v1990_v23 = vpop.permute.xlu1 %1989  ;;  %v3199_v26 = vadd.f32 %v3167_v40, %v3099_v3  ;;  %v3200_v41 = vadd.f32 %v3168_v12, %v3100_v59  ;;  %v2700_v40 = vadd.f32 %v2668_v38, %v2600_v51  ;;  %v2337_v12 = vld [vmem:[#allocation2 + $0x140] sm:$0xff] }
 0x34d   : > { %v2039_v58 = vmul.f32 %v5455_v28, %v1990_v23  ;;  %v3288_v62 = vadd.f32 %v3287_v35, %v3286_v36  ;;  %v1649_v3 = vmul.f32 %v5423_v53, %v1606_v0  ;;  %v2768_v59 = vmul.f32 %v6044_v25, %v2434_v60 }
 0x34e   : > { %2302 = vst.msk [vmem:[#allocation2 + $0x151] sm:$0xff] %vm419_vm0, %v2269_v24  ;;  %v6686_v50 = vadd.f32 %v6636_v7, %v3199_v26  ;;  %v7371_v24 = vld [vmem:[#allocation7_spill] sm:$0xff]  ;;  %v2503_v32 = vadd.f32 %v2471_v34, %v2371_v14  ;;  %v2769_v51 = vmul.f32 %v6044_v25, %v6628_v42  ;;  %v6694_v38 = vadd.f32 %v6636_v7, %v3200_v41 }
 0x34f   : > { %v2071_v19 = vadd.f32 %v2039_v58, %v1875_v21  ;;  %v1289_v23 = vadd.f32 %v1257_v5, %v7371_v24  ;;  %v2336_v21 = vld [vmem:[#allocation2 + $0x138] sm:$0xff]  ;;  %v2502_v58 = vadd.f32 %v2470_v8, %v2370_v54  ;;  %v2800_v26 = vadd.f32 %v2768_v59, %v2700_v40 }
 0x350   : > { %v2868_v36 = vmul.f32 %v6055_v29, %v6630_v18  ;;  %v2571_v0 = vmul.f32 %v6002_v48, %v2535_v13  ;;  %v2801_v5 = vadd.f32 %v2769_v51, %v2701_v63  ;;  %v3289_v54 = vsel %vm419_vm0, %v6686_v50, 0.0  ;;  %v2436_v8 = vld [vmem:[#allocation2 + $0x139] sm:$0xff] }
 0x351   : > { %v2110_v10 = vadd.f32 %v6453_v22, %v2071_v19  ;;  %v1418_v56 = vpop.permute.xlu1 %1417  ;;  %v1485_v57 = vadd.f32 %v1453_v17, %v1289_v23  ;;  %v2602_v60 = vadd.f32 %v2570_v47, %v2502_v58  ;;  %v2969_v14 = vmul.f32 %v6060_v11, %v2336_v21 }
 0x352   : > { %v2603_v34 = vadd.f32 %v2571_v0, %v2503_v32  ;;  %v2869_v41 = vmul.f32 %v6055_v29, %v2535_v13  ;;  %v2970_v18 = vmul.f32 %v6060_v11, %v2337_v12  ;;  %v3291_v17 = vsel %vm419_vm0, %v6694_v38, 0.0 }
 0x353   : > { %v2142_v16 = vadd.f32 3.0, %v2110_v10  ;;  %v1681_v19 = vadd.f32 %v1649_v3, %v1485_v57  ;;  %v2900_v63 = vadd.f32 %v2868_v36, %v2800_v26  ;;  %v3290_v24 = vadd.f32 %v3289_v54, %v3288_v62  ;;  %v2437_v57 = vld [vmem:[#allocation2 + $0x141] sm:$0xff] }
 0x354   : > { %v2372_v23 = vmul.f32 %v5983_v61, %v2336_v21  ;;  %v2472_v3 = vmul.f32 %v5988_v4, %v2436_v8  ;;  %v2670_v59 = vmul.f32 %v6025_v27, %v2336_v21  ;;  %v2901_v58 = vadd.f32 %v2869_v41, %v2801_v5 }
 0x355   : > { %v2174_v31 = vmax.f32 %v2142_v16, 0.0  ;;  %v2536_v16 = vld [vmem:[#allocation2 + $0x13a] sm:$0xff]  ;;  %v1258_v26 = vmul.f32 %v5390_v37, %v6524_v39  ;;  %v2770_v36 = vmul.f32 %v6044_v25, %v2436_v8  ;;  %v1455_v21 = vmul.f32 %v5397_v6, %v1418_v56 }
 0x356   : > { %v1802_v53 = vpop.permute.xlu1 %1801  ;;  %v3002_v0 = vadd.f32 %v2970_v18, %v2901_v58  ;;  %v3169_v5 = vmul.f32 %v6539_v49, %v2536_v16  ;;  %v3070_v37 = vmul.f32 %v6077_v46, %v2437_v57  ;;  %v2671_v41 = vmul.f32 %v6025_v27, %v2337_v12 }
 0x357   : > { %v2206_v42 = vmin.f32 %v2174_v31, 6.0  ;;  %v1845_v35 = vmul.f32 %v5435_v2, %v1802_v53  ;;  %v3001_v31 = vadd.f32 %v2969_v14, %v2900_v63  ;;  %v6711_v53 = vadd.f32 %v3291_v17, %v3290_v24  ;;  %v2537_v14 = vld [vmem:[#allocation2 + $0x142] sm:$0xff] }
 0x358   : > { %v1454_v56 = vmul.f32 %v5397_v6, %v6611_v45  ;;  %v7373_v63 = vld [vmem:[#allocation10_spill] sm:$0xff]  ;;  %v2572_v58 = vmul.f32 %v6002_v48, %v2536_v16  ;;  %v2573_v6 = vmul.f32 %v6002_v48, %v2537_v14  ;;  %v2703_v45 = vadd.f32 %v2671_v41, %v2603_v34 }
 0x359   : > { %v2238_v40 = vmul.f32 0.16666667, %v2206_v42  ;;  %v1877_v47 = vadd.f32 %v1845_v35, %v1681_v19  ;;  %v2504_v19 = vadd.f32 %v2472_v3, %v2372_v23  ;;  %v2702_v42 = vadd.f32 %v2670_v59, %v2602_v60 }
 0x35a   : > { %v2373_v35 = vmul.f32 %v5983_v61, %v2337_v12  ;;  %v1487_v24 = vadd.f32 %v1455_v21, %v7373_v63 }
 0x35b   : > { %v2270_v32 = vmul.f32 %v2238_v40, %v2110_v10  ;;  %v2073_v13 = vadd.f32 %v6645_v55, %v1877_v47  ;;  %v1994_v51 = vpop.permute.xlu1 %1993  ;;  %v3069_v55 = vmul.f32 %v6077_v46, %v2436_v8  ;;  %v2473_v40 = vmul.f32 %v5988_v4, %v2437_v57  ;;  %v7372_v47 = vld [vmem:[#allocation22_spill] sm:$0xff] }
 0x35c   : > { %v2040_v62 = vmul.f32 %v5455_v28, %v1994_v51  ;;  %v1290_v60 = vadd.f32 %v1258_v26, %v7372_v47  ;;  %v2802_v12 = vadd.f32 %v2770_v36, %v2702_v42  ;;  %v2771_v51 = vmul.f32 %v6044_v25, %v2437_v57 }
 0x35d   : > { %2303 = vst.msk [vmem:[#allocation2 + $0x159] sm:$0xff] %vm419_vm0, %v2270_v32  ;;  %v2112_v10 = vadd.f32 %v6453_v22, %v2073_v13  ;;  %v3101_v18 = vadd.f32 %v3069_v55, %v3001_v31  ;;  %v3170_v32 = vmul.f32 %v6539_v49, %v2537_v14  ;;  %v2505_v26 = vadd.f32 %v2473_v40, %v2373_v35 }
 0x35e   : > { %v2072_v54 = vadd.f32 %v2040_v62, %v6501_v15  ;;  %v3102_v15 = vadd.f32 %v3070_v37, %v3002_v0  ;;  %v1486_v31 = vadd.f32 %v1454_v56, %v1290_v60  ;;  %v2604_v34 = vadd.f32 %v2572_v58, %v2504_v19 }
 0x35f   : > { %v2144_v39 = vadd.f32 3.0, %v2112_v10  ;;  %v3201_v3 = vadd.f32 %v3169_v5, %v3101_v18  ;;  %v1683_v5 = vadd.f32 %v6626_v30, %v1487_v24  ;;  %v2870_v57 = vmul.f32 %v6055_v29, %v2536_v16  ;;  %v2438_v24 = vld [vmem:[#allocation2 + $0x151] sm:$0xff] }
 0x360   : > { %v2111_v8 = vadd.f32 %v6453_v22, %v2072_v54  ;;  %v1806_v17 = vpop.permute.xlu1 %1805  ;;  %v3202_v55 = vadd.f32 %v3170_v32, %v3102_v15  ;;  %v2803_v35 = vadd.f32 %v2771_v51, %v2703_v45  ;;  %v2871_v40 = vmul.f32 %v6055_v29, %v2537_v14 }
 0x361   : > { %v2176_v23 = vmax.f32 %v2144_v39, 0.0  ;;  %v6739_v36 = vadd.f32 %v6636_v7, %v3201_v3  ;;  %v1846_v37 = vmul.f32 %v5435_v2, %v1806_v17  ;;  %v2338_v39 = vld [vmem:[#allocation2 + $0x150] sm:$0xff]  ;;  %v1682_v30 = vadd.f32 %v6598_v9, %v1486_v31 }
 0x362   : > { %v2143_v59 = vadd.f32 3.0, %v2111_v8  ;;  %v2605_v47 = vadd.f32 %v2573_v6, %v2505_v26  ;;  %v6746_v60 = vadd.f32 %v6636_v7, %v3202_v55  ;;  %v2672_v16 = vmul.f32 %v6025_v27, %v2338_v39 }
 0x363   : > { %v2208_v13 = vmin.f32 %v2176_v23, 6.0  ;;  %v3293_v17 = vsel %vm419_vm0, %v6739_v36, 0.0  ;;  %v1878_v63 = vadd.f32 %v1846_v37, %v1682_v30  ;;  %v2902_v58 = vadd.f32 %v2870_v57, %v2802_v12 }
 0x364   : > { %v2175_v62 = vmax.f32 %v2143_v59, 0.0  ;;  %v1810_v0 = vpop.permute.xlu1 %1809  ;;  %v2339_v56 = vld [vmem:[#allocation2 + $0x158] sm:$0xff]  ;;  %v2903_v32 = vadd.f32 %v2871_v40, %v2803_v35  ;;  %v2374_v6 = vmul.f32 %v5983_v61, %v2338_v39  ;;  %v2474_v31 = vmul.f32 %v5988_v4, %v2438_v24 }
 0x365   : > { %v2240_v21 = vmul.f32 0.16666667, %v2208_v13  ;;  %v1847_v54 = vmul.f32 %v5435_v2, %v1810_v0  ;;  %v2972_v23 = vmul.f32 %v6060_v11, %v2339_v56  ;;  %v2439_v59 = vld [vmem:[#allocation2 + $0x159] sm:$0xff]  ;;  %v2375_v26 = vmul.f32 %v5983_v61, %v2339_v56 }
 0x366   : > { %v2207_v42 = vmin.f32 %v2175_v62, 6.0  ;;  %v2538_v45 = vld [vmem:[#allocation2 + $0x152] sm:$0xff]  ;;  %v2704_v62 = vadd.f32 %v2672_v16, %v2604_v34  ;;  %v2475_v55 = vmul.f32 %v5988_v4, %v2439_v59  ;;  %v2772_v57 = vmul.f32 %v6044_v25, %v2438_v24 }
 0x367   : > { %v2272_v41 = vmul.f32 %v2240_v21, %v2112_v10  ;;  %v1879_v18 = vadd.f32 %v1847_v54, %v1683_v5  ;;  %v2971_v10 = vmul.f32 %v6060_v11, %v2338_v39  ;;  %v3004_v21 = vadd.f32 %v2972_v23, %v2903_v32 }
 0x368   : > { %v2239_v15 = vmul.f32 0.16666667, %v2207_v42  ;;  %v3171_v42 = vmul.f32 %v6539_v49, %v2538_v45  ;;  %v2574_v39 = vmul.f32 %v6002_v48, %v2538_v45  ;;  %v3072_v34 = vmul.f32 %v6077_v46, %v2439_v59 }
 0x369   : > { %2305 = vst.msk [vmem:[#allocation2 + $0x171] sm:$0xff] %vm419_vm0, %v2272_v41  ;;  %v2075_v2 = vadd.f32 %v6681_v52, %v1879_v18  ;;  %v2002_v19 = vpop.permute.xlu1 %2001  ;;  %v2673_v52 = vmul.f32 %v6025_v27, %v2339_v56  ;;  %v3003_v0 = vadd.f32 %v2971_v10, %v2902_v58  ;;  %v2539_v18 = vld [vmem:[#allocation2 + $0x15a] sm:$0xff]  ;;  %v2773_v56 = vmul.f32 %v6044_v25, %v2439_v59 }
 0x36a   : > { %v2271_v14 = vmul.f32 %v2239_v15, %v2111_v8  ;;  %v2042_v9 = vmul.f32 %v5455_v28, %v2002_v19  ;;  %v6761_v8 = vadd.f32 %v3293_v17, %v6711_v53  ;;  %v6765_v28 = vsel %vm419_vm0, %v6746_v60, 0.0 }
 0x36b   : > { %v2114_v3 = vadd.f32 %v6453_v22, %v2075_v2  ;;  %v2705_v54 = vadd.f32 %v2673_v52, %v2605_v47  ;;  %v3071_v53 = vmul.f32 %v6077_v46, %v2438_v24  ;;  %v2507_v15 = vadd.f32 %v2475_v55, %v2375_v26 }
 0x36c   : > { %2304 = vst.msk [vmem:[#allocation2 + $0x169] sm:$0xff] %vm419_vm0, %v2271_v14  ;;  %v2074_v13 = vadd.f32 %v2042_v9, %v1878_v63  ;;  %v2872_v30 = vmul.f32 %v6055_v29, %v2538_v45  ;;  %v3104_v47 = vadd.f32 %v3072_v34, %v3004_v21  ;;  %v2804_v10 = vadd.f32 %v2772_v57, %v2704_v62 }
 0x36d   : > { %v2146_v51 = vadd.f32 3.0, %v2114_v3  ;;  %v3103_v35 = vadd.f32 %v3071_v53, %v3003_v0  ;;  %v2805_v17 = vadd.f32 %v2773_v56, %v2705_v54  ;;  %v2575_v9 = vmul.f32 %v6002_v48, %v2539_v18 }
 0x36e   : > { %v2113_v12 = vadd.f32 %v6453_v22, %v2074_v13  ;;  %v2506_v22 = vadd.f32 %v2474_v31, %v2374_v6  ;;  %v3172_v23 = vmul.f32 %v6539_v49, %v2539_v18  ;;  %v2873_v13 = vmul.f32 %v6055_v29, %v2539_v18 }
 0x36f   : > { %v2178_v5 = vmax.f32 %v2146_v51, 0.0  ;;  %v3203_v14 = vadd.f32 %v3171_v42, %v3103_v35  ;;  %v2607_v45 = vadd.f32 %v2575_v9, %v2507_v15  ;;  %v2904_v51 = vadd.f32 %v2872_v30, %v2804_v10  ;;  %v2941_v35 = vld [vmem:[#allocation2 + $0x198] sm:$0xff] }
 0x370   : > { %v2145_v37 = vadd.f32 3.0, %v2113_v12  ;;  %v2606_v24 = vadd.f32 %v2574_v39, %v2506_v22  ;;  %v3204_v31 = vadd.f32 %v3172_v23, %v3104_v47  ;;  %v2441_v0 = vld [vmem:[#allocation2 + $0x171] sm:$0xff]  ;;  %v2905_v26 = vadd.f32 %v2873_v13, %v2805_v17  ;;  %v2942_v17 = vld [vmem:[#allocation2 + $0x1a0] sm:$0xff] }
 0x371   : > { %v2210_v41 = vmin.f32 %v2178_v5, 6.0  ;;  %v2775_v22 = vmul.f32 %v6044_v25, %v2441_v0  ;;  %v2977_v23 = vmul.f32 %v6060_v11, %v2941_v35  ;;  %v3041_v35 = vld [vmem:[#allocation2 + $0x199] sm:$0xff] }
 0x372   : > { %v2177_v40 = vmax.f32 %v2145_v37, 0.0 }
 0x373   : > { %v2242_v2 = vmul.f32 0.16666667, %v2210_v41  ;;  %v2340_v19 = vld [vmem:[#allocation2 + $0x168] sm:$0xff]  ;;  %v2341_v16 = vld [vmem:[#allocation2 + $0x170] sm:$0xff]  ;;  %v2477_v41 = vmul.f32 %v5988_v4, %v2441_v0 }
 0x374   : > { %v2209_v63 = vmin.f32 %v2177_v40, 6.0  ;;  %v2440_v59 = vld [vmem:[#allocation2 + $0x169] sm:$0xff]  ;;  %v2674_v58 = vmul.f32 %v6025_v27, %v2340_v19  ;;  %v2675_v32 = vmul.f32 %v6025_v27, %v2341_v16  ;;  %v2376_v62 = vmul.f32 %v5983_v61, %v2340_v19 }
 0x375   : > { %v2274_v52 = vmul.f32 %v2242_v2, %v2114_v3  ;;  %v2973_v55 = vmul.f32 %v6060_v11, %v2340_v19  ;;  %v6787_v3 = vadd.f32 %v6636_v7, %v3203_v14  ;;  %v2377_v5 = vmul.f32 %v5983_v61, %v2341_v16  ;;  %v2540_v53 = vld [vmem:[#allocation2 + $0x16a] sm:$0xff]  ;;  %v2541_v61 = vld [vmem:[#allocation2 + $0x172] sm:$0xff] }
 0x376   : > { %v2241_v6 = vmul.f32 0.16666667, %v2209_v63  ;;  %v2476_v54 = vmul.f32 %v5988_v4, %v2440_v59  ;;  %v2974_v42 = vmul.f32 %v6060_v11, %v2341_v16  ;;  %v2706_v37 = vadd.f32 %v2674_v58, %v2606_v24 }
 0x377   : > { %2307 = vst.msk [vmem:[#allocation2 + $0x189] sm:$0xff] %vm419_vm0, %v2274_v52  ;;  %v2707_v39 = vadd.f32 %v2675_v32, %v2607_v45  ;;  %v3005_v57 = vadd.f32 %v2973_v55, %v2904_v51  ;;  %v3073_v34 = vmul.f32 %v6077_v46, %v2440_v59  ;;  %v2774_v56 = vmul.f32 %v6044_v25, %v2440_v59 }
 0x378   : > { %v2273_v21 = vmul.f32 %v2241_v6, %v2113_v12  ;;  %v3006_v18 = vadd.f32 %v2974_v42, %v2905_v26  ;;  %v6797_v12 = vadd.f32 %v6636_v7, %v3204_v31  ;;  %v3074_v40 = vmul.f32 %v6077_v46, %v2441_v0 }
 0x379   : > { %v3105_v15 = vadd.f32 %v3073_v34, %v3005_v57  ;;  %v3173_v30 = vmul.f32 %v6539_v49, %v2540_v53  ;;  %v2508_v47 = vadd.f32 %v2476_v54, %v2376_v62  ;;  %v2509_v2 = vadd.f32 %v2477_v41, %v2377_v5 }
 0x37a   : > { %2306 = vst.msk [vmem:[#allocation2 + $0x181] sm:$0xff] %vm419_vm0, %v2273_v21  ;;  %v3296_v4 = vadd.f32 %v6765_v28, %v6761_v8  ;;  %v3297_v19 = vsel %vm419_vm0, %v6787_v3, 0.0  ;;  %v2806_v16 = vadd.f32 %v2774_v56, %v2706_v37  ;;  %v2807_v10 = vadd.f32 %v2775_v22, %v2707_v39 }
 0x37b   : > { %v3106_v14 = vadd.f32 %v3074_v40, %v3006_v18  ;;  %v3205_v63 = vadd.f32 %v3173_v30, %v3105_v15  ;;  %v2576_v9 = vmul.f32 %v6002_v48, %v2540_v53  ;;  %v2577_v24 = vmul.f32 %v6002_v48, %v2541_v61  ;;  %v3042_v30 = vld [vmem:[#allocation2 + $0x1a1] sm:$0xff] }
 0x37c   : > { %v3299_v52 = vsel %vm419_vm0, %v6797_v12, 0.0  ;;  %v2874_v8 = vmul.f32 %v6055_v29, %v2540_v53  ;;  %v2875_v28 = vmul.f32 %v6055_v29, %v2541_v61  ;;  %v3174_v58 = vmul.f32 %v6539_v49, %v2541_v61 }
 0x37d   : > { %v3298_v32 = vadd.f32 %v3297_v19, %v3296_v4  ;;  %v2608_v13 = vadd.f32 %v2576_v9, %v2508_v47  ;;  %v2609_v6 = vadd.f32 %v2577_v24, %v2509_v2  ;;  %v2978_v51 = vmul.f32 %v6060_v11, %v2942_v17  ;;  %v3141_v19 = vld [vmem:[#allocation2 + $0x19a] sm:$0xff] }
 0x37e   : > { %v2741_v59 = vld [vmem:[#allocation2 + $0x189] sm:$0xff]  ;;  %v6816_v48 = vadd.f32 %v6636_v7, %v3205_v63  ;;  %v2906_v26 = vadd.f32 %v2874_v8, %v2806_v16  ;;  %v2907_v55 = vadd.f32 %v2875_v28, %v2807_v10  ;;  %v3206_v21 = vadd.f32 %v3174_v58, %v3106_v14 }
 0x37f   : > { %v2841_v45 = vld [vmem:[#allocation2 + $0x18a] sm:$0xff]  ;;  %v3300_v5 = vadd.f32 %v3299_v52, %v3298_v32  ;;  %v2777_v42 = vmul.f32 %v6044_v25, %v2741_v59  ;;  %v3076_v47 = vmul.f32 %v6077_v46, %v2741_v59  ;;  %v3142_v16 = vld [vmem:[#allocation2 + $0x1a2] sm:$0xff]  ;;  %v3077_v17 = vmul.f32 %v6077_v46, %v3041_v35 }
 0x380   : > { %v2877_v34 = vmul.f32 %v6055_v29, %v2841_v45  ;;  %v3176_v63 = vmul.f32 %v6539_v49, %v2841_v45  ;;  %v3078_v52 = vmul.f32 %v6077_v46, %v3042_v30  ;;  %v3177_v8 = vmul.f32 %v6539_v49, %v3141_v19 }
 0x381   : > { %v2640_v31 = vld [vmem:[#allocation2 + $0x180] sm:$0xff]  ;;  %v2641_v62 = vld [vmem:[#allocation2 + $0x188] sm:$0xff]  ;;  %v3178_v28 = vmul.f32 %v6539_v49, %v3142_v16  ;;  %v7374_v30 = vmov 4   ;;  %v7379_v19 = vmov 6   ;;  %v3668_v16 = vld [vmem:[%s7137_s9 + $0x10] sm:$0xff] }
 0x382   : > { %v2740_v0 = vld [vmem:[#allocation2 + $0x181] sm:$0xff]  ;;  %v2676_v54 = vmul.f32 %v6025_v27, %v2640_v31  ;;  %v2677_v53 = vmul.f32 %v6025_v27, %v2641_v62  ;;  %v2975_v39 = vmul.f32 %v6060_v11, %v2640_v31  ;;  %v2976_v41 = vmul.f32 %v6060_v11, %v2641_v62  ;;  %4215 = vmatprep.subr.mxu0 %v3668_v16 }
 0x383   : > { %v2840_v37 = vld [vmem:[#allocation2 + $0x182] sm:$0xff]  ;;  %v2776_v57 = vmul.f32 %v6044_v25, %v2740_v0  ;;  %v3075_v22 = vmul.f32 %v6077_v46, %v2740_v0  ;;  %v3301_v27 = vsel %vm419_vm0, %v6816_v48, 0.0  ;;  %v6831_v25 = vadd.f32 %v6636_v7, %v3206_v21  ;;  %4269 = vmatprep.subr.mxu1 %v3668_v16 }
 0x384   : > { %v2708_v18 = vadd.f32 %v2676_v54, %v2608_v13  ;;  %v2709_v61 = vadd.f32 %v2677_v53, %v2609_v6  ;;  %v3007_v56 = vadd.f32 %v2975_v39, %v2906_v26  ;;  %v2876_v40 = vmul.f32 %v6055_v29, %v2840_v37  ;;  %4272 = vmatpush3.msra.mxu1 %v3668_v16 }
 0x385   : > { %v3008_v15 = vadd.f32 %v2976_v41, %v2907_v55  ;;  %v3175_v10 = vmul.f32 %v6539_v49, %v2840_v37  ;;  %v3302_v29 = vadd.f32 %v3301_v27, %v3300_v5  ;;  %v3303_v31 = vsel %vm419_vm0, %v6831_v25, 0.0 }
 0x386   : > { %v2808_v2 = vadd.f32 %v2776_v57, %v2708_v18  ;;  %v2809_v11 = vadd.f32 %v2777_v42, %v2709_v61  ;;  %v3107_v4 = vadd.f32 %v3075_v22, %v3007_v56  ;;  %v3324_v56 = vld [vmem:[%s7134_s6] sm:$0x1] }
 0x387   : > { %v3108_v14 = vadd.f32 %v3076_v47, %v3008_v15  ;;  %v3304_v45 = vadd.f32 %v3303_v31, %v3302_v29  ;;  %v7375_v47 = vmov 2  }
 0x388   : > { %v2908_v9 = vadd.f32 %v2876_v40, %v2808_v2  ;;  %v2909_v24 = vadd.f32 %v2877_v34, %v2809_v11  ;;  %v3207_v59 = vadd.f32 %v3175_v10, %v3107_v4  ;;  %v7376_v2 = vmov 7   ;;  %v3667_v10 = vld [vmem:[%s7137_s9 + $0x8] sm:$0xff] }
 0x389   : > { %v3208_v58 = vadd.f32 %v3176_v63, %v3108_v14  ;;  %v7377_v11 = vmov 3   ;;  %v7378_v4 = vmov 5   ;;  %4270 = vmatprep.subr.mxu1 %v3667_v10  ;;  %v3399_v14 = vld [vmem:[%s7135_s7] sm:$0xff] }
 0x38a   : > { %v3009_v32 = vadd.f32 %v2977_v23, %v2908_v9  ;;  %v3010_v13 = vadd.f32 %v2978_v51, %v2909_v24  ;;  %v6840_v6 = vadd.f32 %v6636_v7, %v3207_v59  ;;  %4273 = vmatpush3.msra.mxu1 %v3667_v10  ;;  %v3412_v29 = vrot.slane %v3399_v14, 1 }
 0x38b   : > { %v6845_v26 = vadd.f32 %v6636_v7, %v3208_v58  ;;  %v3420_v24 = vrot.slane %v3399_v14, 2  ;;  %v3428_v58 = vrot.slane %v3399_v14, 3  ;;  %v3436_v31 = vrot.slane %v3399_v14, 4 }
 0x38c   : > { %v3109_v62 = vadd.f32 %v3077_v17, %v3009_v32  ;;  %v3110_v0 = vadd.f32 %v3078_v52, %v3010_v13  ;;  %v3305_v46 = vsel %vm419_vm0, %v6840_v6, 0.0  ;;  %v3666_v17 = vld [vmem:[%s7137_s9] sm:$0xff] }
 0x38d   : > { %v3306_v55 = vadd.f32 %v3305_v46, %v3304_v45  ;;  %v3307_v5 = vsel %vm419_vm0, %v6845_v26, 0.0  ;;  %4271 = vmatprep.subr.mxu1 %v3666_v17 }
 0x38e   : > { %v3209_v49 = vadd.f32 %v3177_v8, %v3109_v62  ;;  %v3210_v21 = vadd.f32 %v3178_v28, %v3110_v0  ;;  %4274 = vmatpush3.msra.mxu1 %v3666_v17 }
 0x38f   : > { %v3308_v54 = vadd.f32 %v3307_v5, %v3306_v55  ;;  %v3444_v55 = vrot.slane %v3399_v14, 5 }
 0x390   : > { %v6850_v23 = vadd.f32 %v6636_v7, %v3209_v49  ;;  %v6853_v51 = vadd.f32 %v6636_v7, %v3210_v21 }
 0x392   : > { %v3309_v53 = vsel %vm419_vm0, %v6850_v23, 0.0  ;;  %v3311_v37 = vsel %vm419_vm0, %v6853_v51, 0.0 }
 0x393   : > { %v3310_v42 = vadd.f32 %v3309_v53, %v3308_v54  ;;  %v3452_v53 = vrot.slane %v3399_v14, 6 }
 0x395   : > { %v3312_v39 = vadd.f32 %v3311_v37, %v3310_v42  ;;  %v3460_v42 = vrot.slane %v3399_v14, 7 }
 0x397   : > { %v3313_v57 = vrot.slane %v3312_v39, 4 }
 0x399   : > { %v3314_v34 = vadd.f32 %v3313_v57, %v3312_v39 }
 0x39b   : > { %v3315_v41 = vrot.slane %v3314_v34, 2 }
 0x39d   : > { %v3316_v22 = vadd.f32 %v3315_v41, %v3314_v34 }
 0x39f   : > { %v3317_v18 = vrot.slane %v3316_v22, 1 }
 0x3a1   : > { %v3318_v61 = vadd.f32 %v3317_v18, %v3316_v22  ;;  %v3464_v18 = vld [vmem:[%s7136_s8] sm:$0x1] }
 0x3a3   : > { %v3320_v7 = vmul.f32 0.00390625, %v3318_v61 }
 0x3a5   : > { %4213 = vmatmul.mubr.msk.f32.vlgmr.msra.gmra.mxu0 %vm419_vm0, %v3320_v7 }
 0x3a6   : > { %4216 = vmatpush3.msra.mxu0 %v3668_v16 }
 0x3a7   : > { %4217 = vmatprep.subr.mxu0 %v3667_v10 }
 0x3a8   : > { %4218 = vmatpush3.msra.mxu0 %v3667_v10  ;;  %v7383_v10 = vld [vmem:[#allocation13_spill] sm:$0xff] }
 0x3a9   : > { %4219 = vmatprep.subr.mxu0 %v3666_v17 }
 0x3aa   : > { %4220 = vmatpush3.msra.mxu0 %v3666_v17 }
 0x465   : > { %v3394_v35 = vpop.f32.mrf.mxu0 }
 0x466   : > { %v3395_v27 = vadd.f32 %v3394_v35, %v3324_v56 }
 0x467   : > { %v4214_v40 = vpop.f32.mrf.mxu0 }
 0x468   : > { %v3398_v15 = vmax.f32 %v3395_v27, 0.0 }
 0x46a   : > { %3408 = vperm.xlu0 %4417, %v3398_v15   ;;  %3402 = vperm.xlu1 %4416, %v3398_v15  }
 0x46e   : > { %4420 = vset.pattern.permute.xlu0 %v7374_v30  ;;  %4418 = vset.pattern.permute.xlu1 %v7375_v47  ;;  %v7381_v47 = vld [vmem:[#allocation18_spill] sm:$0xff] }
 0x46f   : > { %3433 = vperm.xlu0 %4420, %v3398_v15   ;;  %3417 = vperm.xlu1 %4418, %v3398_v15  }
 0x473   : > { %4423 = vset.pattern.permute.xlu0 %v7376_v2  ;;  %4419 = vset.pattern.permute.xlu1 %v7377_v11 }
 0x474   : > { %3457 = vperm.xlu0 %4423, %v3398_v15   ;;  %3425 = vperm.xlu1 %4419, %v3398_v15  }
 0x478   : > { %4421 = vset.pattern.permute.xlu1 %v7378_v4  ;;  %v7382_v4 = vld [vmem:[#allocation11_spill] sm:$0xff] }
 0x479   : > { %3441 = vperm.xlu1 %4421, %v3398_v15  }
 0x47d   : > { %4422 = vset.pattern.permute.xlu1 %v7379_v19 }
 0x47e   : > { %3449 = vperm.xlu1 %4422, %v3398_v15   ;;  %v7380_v15 = vld [vmem:[#allocation19_spill] sm:$0xff] }
 0x4e5   : > { %v3403_v63 = vpop.permute.xlu1 %3402  ;;  %v3409_v9 = vpop.permute.xlu0 %3408 }
 0x4e6   : > { %v3414_v52 = vmul.f32 %v3412_v29, %v3409_v9  ;;  %v3405_v59 = vmul.f32 %v3403_v63, %v3399_v14  ;;  %v7384_v63 = vld [vmem:[#allocation17_spill] sm:$0xff]  ;;  %v7385_v9 = vld [vmem:[#allocation27_spill] sm:$0xff] }
 0x4e8   : > { %v3415_v32 = vadd.f32 %v3414_v52, %v3405_v59 }
 0x4ea   : > { %v3418_v8 = vpop.permute.xlu1 %3417  ;;  %v3434_v0 = vpop.permute.xlu0 %3433 }
 0x4eb   : > { %v3422_v28 = vmul.f32 %v3420_v24, %v3418_v8  ;;  %v3438_v49 = vmul.f32 %v3436_v31, %v3434_v0 }
 0x4ed   : > { %v3423_v45 = vadd.f32 %v3422_v28, %v3415_v32 }
 0x4ef   : > { %v3426_v13 = vpop.permute.xlu1 %3425  ;;  %v3458_v37 = vpop.permute.xlu0 %3457 }
 0x4f0   : > { %v3430_v62 = vmul.f32 %v3428_v58, %v3426_v13  ;;  %v3462_v41 = vmul.f32 %v3460_v42, %v3458_v37 }
 0x4f2   : > { %v3431_v46 = vadd.f32 %v3430_v62, %v3423_v45 }
 0x4f4   : > { %v3442_v21 = vpop.permute.xlu1 %3441  ;;  %v3439_v5 = vadd.f32 %v3438_v49, %v3431_v46 }
 0x4f5   : > { %v3446_v54 = vmul.f32 %v3444_v55, %v3442_v21 }
 0x4f7   : > { %v3447_v57 = vadd.f32 %v3446_v54, %v3439_v5 }
 0x4f9   : > { %v3450_v39 = vpop.permute.xlu1 %3449 }
 0x4fa   : > { %v3454_v34 = vmul.f32 %v3452_v53, %v3450_v39 }
 0x4fc   : > { %v3455_v22 = vadd.f32 %v3454_v34, %v3447_v57 }
 0x4fe   : > { %v3463_v61 = vadd.f32 %v3462_v41, %v3455_v22  ;;  %v7386_v22 = vld [vmem:[#allocation24_spill] sm:$0xff] }
 0x500   : > { %v3465_v7 = vadd.f32 %v3464_v18, %v3463_v61 }
 0x502   : > { %v3466_v56 = vadd.f32 3.0, %v3465_v7 }
 0x504   : > { %v3467_v35 = vmax.f32 %v3466_v56, 0.0 }
 0x506   : > { %v3468_v27 = vmin.f32 %v3467_v35, 6.0 }
 0x508   : > { %v3469_v40 = vmul.f32 0.16666667, %v3468_v27 }
 0x50a   : > { %v6887_v30 = vrot.slane %v3469_v40, %v7380_v15 }
 0x50c   : > { %v3474_v2 = vmul.f32 %v6887_v30, %v7381_v47  ;;  %v3488_v11 = vmul.f32 %v6887_v30, %v6529_v1  ;;  %v3475_v19 = vmul.f32 %v6887_v30, %v7382_v4  ;;  %v3489_v16 = vmul.f32 %v6887_v30, %v6547_v33 }
 0x50d   : > { %v3476_v17 = vmul.f32 %v6887_v30, %v7383_v10  ;;  %v3490_v14 = vmul.f32 %v6887_v30, %v6575_v44  ;;  %v3477_v29 = vmul.f32 %v6887_v30, %v7384_v63  ;;  %v3491_v24 = vmul.f32 %v6887_v30, %v7385_v9 }
 0x50e   : > { %v3506_v52 = vadd.f32 3.0, %v3474_v2  ;;  %v3520_v1 = vadd.f32 3.0, %v3488_v11  ;;  %v3507_v59 = vadd.f32 3.0, %v3475_v19  ;;  %v3521_v8 = vadd.f32 3.0, %v3489_v16 }
 0x50f   : > { %v3508_v28 = vadd.f32 3.0, %v3476_v17  ;;  %v3522_v58 = vadd.f32 3.0, %v3490_v14  ;;  %v3509_v32 = vadd.f32 3.0, %v3477_v29  ;;  %v3523_v33 = vadd.f32 3.0, %v3491_v24 }
 0x510   : > { %v3538_v13 = vmax.f32 %v3506_v52, 0.0  ;;  %v3552_v31 = vmax.f32 %v3520_v1, 0.0  ;;  %v3539_v45 = vmax.f32 %v3507_v59, 0.0  ;;  %v3553_v62 = vmax.f32 %v3521_v8, 0.0  ;;  %v7387_v8 = vld [vmem:[#allocation26_spill] sm:$0xff] }
 0x511   : > { %v3540_v0 = vmax.f32 %v3508_v28, 0.0  ;;  %v3554_v44 = vmax.f32 %v3522_v58, 0.0  ;;  %v3541_v46 = vmax.f32 %v3509_v32, 0.0  ;;  %v3555_v55 = vmax.f32 %v3523_v33, 0.0  ;;  %v7389_v33 = vld [vmem:[#allocation45_spill] sm:$0xff] }
 0x512   : > { %v3570_v49 = vmin.f32 %v3538_v13, 6.0  ;;  %v3584_v21 = vmin.f32 %v3552_v31, 6.0  ;;  %v3571_v5 = vmin.f32 %v3539_v45, 6.0  ;;  %v3585_v54 = vmin.f32 %v3553_v62, 6.0 }
 0x513   : > { %v3572_v53 = vmin.f32 %v3540_v0, 6.0  ;;  %v3586_v42 = vmin.f32 %v3554_v44, 6.0  ;;  %v3573_v37 = vmin.f32 %v3541_v46, 6.0  ;;  %v3587_v39 = vmin.f32 %v3555_v55, 6.0 }
 0x514   : > { %v3602_v57 = vmul.f32 0.16666667, %v3570_v49  ;;  %v3616_v34 = vmul.f32 0.16666667, %v3584_v21  ;;  %v3603_v41 = vmul.f32 0.16666667, %v3571_v5  ;;  %v3478_v18 = vmul.f32 %v6887_v30, %v7386_v22 }
 0x515   : > { %v3617_v61 = vmul.f32 0.16666667, %v3585_v54  ;;  %v3604_v7 = vmul.f32 0.16666667, %v3572_v53  ;;  %v3618_v56 = vmul.f32 0.16666667, %v3586_v42  ;;  %v3492_v35 = vmul.f32 %v6887_v30, %v6639_v43 }
 0x516   : > { %v3634_v27 = vmul.f32 %v3602_v57, %v3474_v2  ;;  %v3648_v40 = vmul.f32 %v3616_v34, %v3488_v11  ;;  %v3635_v15 = vmul.f32 %v3603_v41, %v3475_v19  ;;  %v3605_v47 = vmul.f32 0.16666667, %v3573_v37  ;;  %v7388_v11 = vld [vmem:[#allocation43_spill] sm:$0xff] }
 0x517   : > { %v3649_v4 = vmul.f32 %v3617_v61, %v3489_v16  ;;  %v3636_v10 = vmul.f32 %v3604_v7, %v3476_v17  ;;  %v3650_v63 = vmul.f32 %v3618_v56, %v3490_v14  ;;  %v3619_v9 = vmul.f32 0.16666667, %v3587_v39 }
 0x518   : > { %4221 = vmatprep.mubr.msk.f32.mxu0 %vm419_vm0, %v3634_v27  ;;  %4242 = vmatprep.mubr.msk.f32.mxu1 %vm419_vm0, %v3648_v40  ;;  %v3637_v52 = vmul.f32 %v3605_v47, %v3477_v29  ;;  %v3510_v1 = vadd.f32 3.0, %v3478_v18  ;;  %v3524_v59 = vadd.f32 3.0, %v3492_v35  ;;  %v3479_v28 = vmul.f32 %v6887_v30, %v7387_v8  ;;  %v7390_v40 = vld [vmem:[#allocation46_spill] sm:$0xff] }
 0x519   : > { %4222 = vmatmul.mubr.msk.f32.vlgmr.msra.gmra.mxu0 %vm419_vm0, %v3635_v15  ;;  %4243 = vmatmul.mubr.msk.f32.vlgmr.msra.gmra.mxu1 %vm419_vm0, %v3649_v4  ;;  %v3651_v43 = vmul.f32 %v3619_v9, %v3491_v24  ;;  %v3493_v2 = vmul.f32 %v6887_v30, %v6655_v20  ;;  %v3480_v19 = vmul.f32 %v6887_v30, %v7388_v11 }
 0x51a   : > { %4224 = vmatprep.mubr.msk.f32.mxu0 %vm419_vm0, %v3636_v10  ;;  %4245 = vmatprep.mubr.msk.f32.mxu1 %vm419_vm0, %v3650_v63  ;;  %v3542_v16 = vmax.f32 %v3510_v1, 0.0  ;;  %v3556_v17 = vmax.f32 %v3524_v59, 0.0  ;;  %v3511_v14 = vadd.f32 3.0, %v3479_v28  ;;  %v3494_v29 = vmul.f32 %v6887_v30, %v6686_v50  ;;  %v7391_v1 = vld [vmem:[#allocation39_spill] sm:$0xff] }
 0x51b   : > { %v3525_v58 = vadd.f32 3.0, %v3493_v2  ;;  %v3512_v32 = vadd.f32 3.0, %v3480_v19  ;;  %v3481_v24 = vmul.f32 %v6887_v30, %v7389_v33  ;;  %v3495_v20 = vmul.f32 %v6887_v30, %v6694_v38 }
 0x51c   : > { %v3574_v13 = vmin.f32 %v3542_v16, 6.0  ;;  %v3588_v31 = vmin.f32 %v3556_v17, 6.0  ;;  %v3543_v45 = vmax.f32 %v3511_v14, 0.0  ;;  %v3526_v62 = vadd.f32 3.0, %v3494_v29 }
 0x51d   : > { %4225 = vmatmul.mubr.msk.f32.gmra.mxu0 %vm419_vm0, %v3637_v52  ;;  %4246 = vmatmul.mubr.msk.f32.gmra.mxu1 %vm419_vm0, %v3651_v43  ;;  %v3557_v0 = vmax.f32 %v3525_v58, 0.0  ;;  %v3544_v44 = vmax.f32 %v3512_v32, 0.0  ;;  %v3513_v46 = vadd.f32 3.0, %v3481_v24  ;;  %v3527_v50 = vadd.f32 3.0, %v3495_v20 }
 0x51e   : > { %v3606_v55 = vmul.f32 0.16666667, %v3574_v13  ;;  %v3620_v49 = vmul.f32 0.16666667, %v3588_v31  ;;  %v3575_v21 = vmin.f32 %v3543_v45, 6.0  ;;  %v3558_v5 = vmax.f32 %v3526_v62, 0.0 }
 0x51f   : > { %v3589_v54 = vmin.f32 %v3557_v0, 6.0  ;;  %v3576_v53 = vmin.f32 %v3544_v44, 6.0  ;;  %v3545_v42 = vmax.f32 %v3513_v46, 0.0  ;;  %v3559_v38 = vmax.f32 %v3527_v50, 0.0 }
 0x520   : > { %v3638_v37 = vmul.f32 %v3606_v55, %v3478_v18  ;;  %v3652_v39 = vmul.f32 %v3620_v49, %v3492_v35  ;;  %v3607_v57 = vmul.f32 0.16666667, %v3575_v21  ;;  %v3590_v34 = vmin.f32 %v3558_v5, 6.0 }
 0x521   : > { %v3621_v41 = vmul.f32 0.16666667, %v3589_v54  ;;  %v3608_v22 = vmul.f32 0.16666667, %v3576_v53  ;;  %v3577_v61 = vmin.f32 %v3545_v42, 6.0  ;;  %v3591_v7 = vmin.f32 %v3559_v38, 6.0 }
 0x522   : > { %4227 = vmatprep.mubr.msk.f32.mxu0 %vm419_vm0, %v3638_v37  ;;  %4248 = vmatprep.mubr.msk.f32.mxu1 %vm419_vm0, %v3652_v39  ;;  %v3639_v56 = vmul.f32 %v3607_v57, %v3479_v28  ;;  %v3622_v27 = vmul.f32 0.16666667, %v3590_v34  ;;  %v3482_v15 = vmul.f32 %v6887_v30, %v7390_v40  ;;  %v3496_v47 = vmul.f32 %v6887_v30, %v6739_v36 }
 0x523   : > { %v3653_v18 = vmul.f32 %v3621_v41, %v3493_v2  ;;  %v3640_v35 = vmul.f32 %v3608_v22, %v3480_v19  ;;  %v3609_v4 = vmul.f32 0.16666667, %v3577_v61  ;;  %v3623_v10 = vmul.f32 0.16666667, %v3591_v7  ;;  %v7392_v19 = vld [vmem:[#allocation40_spill] sm:$0xff]  ;;  %v7394_v41 = vld [vmem:[#allocation3_spill] sm:$0xff] }
 0x524   : > { %4228 = vmatmul.mubr.msk.f32.gmra.mxu0 %vm419_vm0, %v3639_v56  ;;  %v3654_v63 = vmul.f32 %v3622_v27, %v3494_v29  ;;  %v3514_v9 = vadd.f32 3.0, %v3482_v15  ;;  %v3528_v52 = vadd.f32 3.0, %v3496_v47  ;;  %v3483_v59 = vmul.f32 %v6887_v30, %v7391_v1  ;;  %v7393_v29 = vld [vmem:[#allocation47_spill] sm:$0xff] }
 0x525   : > { %4249 = vmatmul.mubr.msk.f32.gmra.mxu1 %vm419_vm0, %v3653_v18  ;;  %4230 = vmatprep.mubr.msk.f32.mxu0 %vm419_vm0, %v3640_v35  ;;  %v3641_v8 = vmul.f32 %v3609_v4, %v3481_v24  ;;  %v3655_v28 = vmul.f32 %v3623_v10, %v3495_v20  ;;  %v3497_v36 = vmul.f32 %v6887_v30, %v6746_v60  ;;  %v7395_v35 = vld [vmem:[#allocation50_spill] sm:$0xff] }
 0x526   : > { %4251 = vmatprep.mubr.msk.f32.mxu1 %vm419_vm0, %v3654_v63  ;;  %v3546_v43 = vmax.f32 %v3514_v9, 0.0  ;;  %v3560_v2 = vmax.f32 %v3528_v52, 0.0  ;;  %v3515_v11 = vadd.f32 3.0, %v3483_v59  ;;  %v3484_v16 = vmul.f32 %v6887_v30, %v7392_v19 }
 0x527   : > { %v3529_v17 = vadd.f32 3.0, %v3497_v36  ;;  %v3498_v14 = vmul.f32 %v6887_v30, %v6787_v3  ;;  %v3485_v58 = vmul.f32 %v6887_v30, %v7393_v29  ;;  %v3499_v32 = vmul.f32 %v6887_v30, %v6797_v12 }
 0x528   : > { %4231 = vmatmul.mubr.msk.f32.gmra.mxu0 %vm419_vm0, %v3641_v8  ;;  %v3578_v60 = vmin.f32 %v3546_v43, 6.0  ;;  %v3592_v33 = vmin.f32 %v3560_v2, 6.0  ;;  %v3547_v24 = vmax.f32 %v3515_v11, 0.0  ;;  %v3516_v20 = vadd.f32 3.0, %v3484_v16 }
 0x529   : > { %4252 = vmatmul.mubr.msk.f32.gmra.mxu1 %vm419_vm0, %v3655_v28  ;;  %v3561_v13 = vmax.f32 %v3529_v17, 0.0  ;;  %v3530_v31 = vadd.f32 3.0, %v3498_v14  ;;  %v3517_v45 = vadd.f32 3.0, %v3485_v58  ;;  %v3531_v62 = vadd.f32 3.0, %v3499_v32 }
 0x52a   : > { %v3610_v0 = vmul.f32 0.16666667, %v3578_v60  ;;  %v3624_v3 = vmul.f32 0.16666667, %v3592_v33  ;;  %v3579_v44 = vmin.f32 %v3547_v24, 6.0  ;;  %v3548_v46 = vmax.f32 %v3516_v20, 0.0 }
 0x52b   : > { %v3593_v50 = vmin.f32 %v3561_v13, 6.0  ;;  %v3562_v55 = vmax.f32 %v3530_v31, 0.0  ;;  %v3549_v49 = vmax.f32 %v3517_v45, 0.0  ;;  %v3563_v12 = vmax.f32 %v3531_v62, 0.0 }
 0x52c   : > { %v3642_v21 = vmul.f32 %v3610_v0, %v3482_v15  ;;  %v3656_v5 = vmul.f32 %v3624_v3, %v3496_v47  ;;  %v3611_v54 = vmul.f32 0.16666667, %v3579_v44  ;;  %v3580_v53 = vmin.f32 %v3548_v46, 6.0 }
 0x52d   : > { %v3625_v42 = vmul.f32 0.16666667, %v3593_v50  ;;  %v3594_v38 = vmin.f32 %v3562_v55, 6.0  ;;  %v3581_v37 = vmin.f32 %v3549_v49, 6.0  ;;  %v3595_v39 = vmin.f32 %v3563_v12, 6.0 }
 0x52e   : > { %4233 = vmatprep.mubr.msk.f32.mxu0 %vm419_vm0, %v3642_v21  ;;  %4254 = vmatprep.mubr.msk.f32.mxu1 %vm419_vm0, %v3656_v5  ;;  %v3643_v57 = vmul.f32 %v3611_v54, %v3483_v59  ;;  %v3612_v34 = vmul.f32 0.16666667, %v3580_v53  ;;  %v3486_v22 = vmul.f32 %v6887_v30, %v7394_v41  ;;  %v3500_v61 = vmul.f32 %v6887_v30, %v6816_v48 }
 0x52f   : > { %v3657_v7 = vmul.f32 %v3625_v42, %v3497_v36  ;;  %v3626_v56 = vmul.f32 0.16666667, %v3594_v38  ;;  %v3613_v27 = vmul.f32 0.16666667, %v3581_v37  ;;  %v3627_v40 = vmul.f32 0.16666667, %v3595_v39 }
 0x530   : > { %4234 = vmatmul.mubr.msk.f32.gmra.mxu0 %vm419_vm0, %v3643_v57  ;;  %v3644_v15 = vmul.f32 %v3612_v34, %v3484_v16  ;;  %v3518_v47 = vadd.f32 3.0, %v3486_v22  ;;  %v3532_v18 = vadd.f32 3.0, %v3500_v61  ;;  %v3487_v4 = vmul.f32 %v6887_v30, %v7395_v35  ;;  %v6988_v42 = vld [vmem:[%s7138_s10] ss:$0 sm:$0xff] }
 0x531   : > { %4255 = vmatmul.mubr.msk.f32.gmra.mxu1 %vm419_vm0, %v3657_v7  ;;  %v3658_v10 = vmul.f32 %v3626_v56, %v3498_v14  ;;  %v3645_v63 = vmul.f32 %v3613_v27, %v3485_v58  ;;  %v3659_v9 = vmul.f32 %v3627_v40, %v3499_v32  ;;  %v3501_v48 = vmul.f32 %v6887_v30, %v6831_v25  ;;  %v4456_v7 = vld [vmem:[%s4583_s22 + $0x78] sm:$0xff] }
 0x532   : > { %4236 = vmatprep.mubr.msk.f32.mxu0 %vm419_vm0, %v3644_v15  ;;  %v3550_v52 = vmax.f32 %v3518_v47, 0.0  ;;  %v3564_v1 = vmax.f32 %v3532_v18, 0.0  ;;  %v3519_v59 = vadd.f32 3.0, %v3487_v4  ;;  %v3502_v8 = vmul.f32 %v6887_v30, %v6840_v6  ;;  %v4457_v18 = vld [vmem:[%s4583_s22] sm:$0xff] }
 0x533   : > { %4257 = vmatprep.mubr.msk.f32.mxu1 %vm419_vm0, %v3658_v10  ;;  %v3533_v28 = vadd.f32 3.0, %v3501_v48  ;;  %v3503_v36 = vmul.f32 %v6887_v30, %v6845_v26  ;;  %v3504_v43 = vmul.f32 %v6887_v30, %v6850_v23  ;;  %v3505_v25 = vmul.f32 %v6887_v30, %v6853_v51 }
 0x534   : > { %4237 = vmatmul.mubr.msk.f32.gmra.mxu0 %vm419_vm0, %v3645_v63  ;;  %v3582_v2 = vmin.f32 %v3550_v52, 6.0  ;;  %v3596_v11 = vmin.f32 %v3564_v1, 6.0  ;;  %v3551_v19 = vmax.f32 %v3519_v59, 0.0  ;;  %v3534_v16 = vadd.f32 3.0, %v3502_v8  ;;  %v4459_v1 = vld [vmem:[%s4583_s22 + $0x18] sm:$0xff] }
 0x535   : > { %4258 = vmatmul.mubr.msk.f32.gmra.mxu1 %vm419_vm0, %v3659_v9  ;;  %v3565_v6 = vmax.f32 %v3533_v28, 0.0  ;;  %v3535_v17 = vadd.f32 3.0, %v3503_v36  ;;  %v3536_v14 = vadd.f32 3.0, %v3504_v43  ;;  %v3537_v29 = vadd.f32 3.0, %v3505_v25 }
 0x536   : > { %v3614_v58 = vmul.f32 0.16666667, %v3582_v2  ;;  %v3628_v26 = vmul.f32 0.16666667, %v3596_v11  ;;  %v3583_v32 = vmin.f32 %v3551_v19, 6.0  ;;  %v3566_v60 = vmax.f32 %v3534_v16, 0.0 }
 0x537   : > { %v3597_v23 = vmin.f32 %v3565_v6, 6.0  ;;  %v3567_v33 = vmax.f32 %v3535_v17, 0.0  ;;  %v3568_v24 = vmax.f32 %v3536_v14, 0.0  ;;  %v3569_v51 = vmax.f32 %v3537_v29, 0.0  ;;  %v4462_v11 = vld [vmem:[%s4583_s22 + $0x80] sm:$0xff] }
 0x538   : > { %v3646_v30 = vmul.f32 %v3614_v58, %v3486_v22  ;;  %v3660_v20 = vmul.f32 %v3628_v26, %v3500_v61  ;;  %v3615_v13 = vmul.f32 0.16666667, %v3583_v32  ;;  %v3598_v31 = vmin.f32 %v3566_v60, 6.0  ;;  %v4455_v22 = vld [vmem:[%s4583_s22 + $0x8] sm:$0xff] }
 0x539   : > { %v3629_v45 = vmul.f32 0.16666667, %v3597_v23  ;;  %v3599_v62 = vmin.f32 %v3567_v33, 6.0  ;;  %v3600_v0 = vmin.f32 %v3568_v24, 6.0  ;;  %v3601_v55 = vmin.f32 %v3569_v51, 6.0  ;;  %v4463_v58 = vld [vmem:[%s4583_s22 + $0x28] sm:$0xff] }
 0x53a   : > { %4239 = vmatprep.mubr.msk.f32.mxu0 %vm419_vm0, %v3646_v30  ;;  %4260 = vmatprep.mubr.msk.f32.mxu1 %vm419_vm0, %v3660_v20  ;;  %v3647_v3 = vmul.f32 %v3615_v13, %v3487_v4  ;;  %v3630_v44 = vmul.f32 0.16666667, %v3598_v31  ;;  %v4458_v4 = vld [vmem:[%s4583_s22 + $0x70] sm:$0xff]  ;;  %v4464_v23 = vld [vmem:[%s4583_s22 + $0x98] sm:$0xff]  ;;  %v4465_v30 = vld [vmem:[%s4583_s22 + $0x20] sm:$0xff] }
 0x53b   : > { %v3661_v46 = vmul.f32 %v3629_v45, %v3501_v48  ;;  %v3631_v50 = vmul.f32 0.16666667, %v3599_v62  ;;  %v3632_v12 = vmul.f32 0.16666667, %v3600_v0  ;;  %v3633_v5 = vmul.f32 0.16666667, %v3601_v55 }
 0x53c   : > { %4240 = vmatmul.mubr.msk.f32.gmra.mxu0 %vm419_vm0, %v3647_v3  ;;  %v3662_v49 = vmul.f32 %v3630_v44, %v3502_v8  ;;  %v4460_v8 = vld [vmem:[%s4583_s22 + $0x88] sm:$0xff]  ;;  %v4466_v45 = vld [vmem:[%s4583_s22 + $0x90] sm:$0xff]  ;;  %v4467_v44 = vld [vmem:[%s4583_s22 + $0x38] sm:$0xff] }
 0x53d   : > { %4261 = vmatmul.mubr.msk.f32.gmra.mxu1 %vm419_vm0, %v3661_v46  ;;  %v3663_v21 = vmul.f32 %v3631_v50, %v3503_v36  ;;  %v3664_v54 = vmul.f32 %v3632_v12, %v3504_v43  ;;  %v3665_v53 = vmul.f32 %v3633_v5, %v3505_v25  ;;  %v4461_v25 = vld [vmem:[%s4583_s22 + $0x10] sm:$0xff] }
 0x53e   : > { %4263 = vmatprep.mubr.msk.f32.mxu1 %vm419_vm0, %v3662_v49  ;;  %v4468_v49 = vld [vmem:[%s4583_s22 + $0xa8] sm:$0xff]  ;;  %v4469_v5 = vld [vmem:[%s4583_s22 + $0x30] sm:$0xff] }
 0x541   : > { %4264 = vmatmul.mubr.msk.f32.gmra.mxu1 %vm419_vm0, %v3663_v21 }
 0x542   : > { %4266 = vmatprep.mubr.msk.f32.mxu1 %vm419_vm0, %v3664_v54 }
 0x545   : > { %4267 = vmatmul.mubr.msk.f32.gmra.mxu1 %vm419_vm0, %v3665_v53  ;;  %v4470_v53 = vld [vmem:[%s4583_s22 + $0xa0] sm:$0xff] }
 0x5d9   : > { %v4223_v38 = vpop.f32.mrf.mxu0  ;;  %v4244_v37 = vpop.f32.mrf.mxu1 }
 0x5da   : > { %v3844_v39 = vadd.f32 %v4223_v38, %v6988_v42  ;;  %v3914_v57 = vadd.f32 %v4244_v37, %v6988_v42 }
 0x5db   : > { %v3838_v34 = vpop.f32.mrf.mxu0  ;;  %v3908_v41 = vpop.f32.mrf.mxu1 }
 0x5dc   : > { %v3998_v61 = vadd.f32 %v4455_v22, %v3844_v39  ;;  %v4012_v56 = vadd.f32 %v4456_v7, %v3914_v57  ;;  %v3839_v27 = vadd.f32 %v6988_v42, %v3838_v34  ;;  %v3909_v40 = vadd.f32 %v6988_v42, %v3908_v41  ;;  %v4471_v22 = vld [vmem:[%s4583_s22 + $0x48] sm:$0xff] }
 0x5dd   : > { %v4226_v15 = vpop.f32.mrf.mxu0  ;;  %v4247_v47 = vpop.f32.mrf.mxu1 }
 0x5de   : > { %4031 = vst.msk [vmem:[%s6997_s14 + $0x8] sm:$0xff] %vm4029_vm3, %v3998_v61  ;;  %4045 = vst.msk [vmem:[%s6997_s14 + $0x78] sm:$0xff] %vm4029_vm3, %v4012_v56  ;;  %v3997_v35 = vadd.f32 %v4457_v18, %v3839_v27  ;;  %v4011_v10 = vadd.f32 %v4458_v4, %v3909_v40  ;;  %v3854_v63 = vadd.f32 %v4226_v15, %v6988_v42  ;;  %v4472_v27 = vld [vmem:[%s4583_s22 + $0xb8] sm:$0xff]  ;;  %v4473_v18 = vld [vmem:[%s4583_s22 + $0x40] sm:$0xff] }
 0x5df   : > { %v3924_v9 = vadd.f32 %v4247_v47, %v6988_v42  ;;  %v3848_v48 = vpop.f32.mrf.mxu0  ;;  %v3918_v52 = vpop.f32.mrf.mxu1 }
 0x5e0   : > { %4030 = vst.msk [vmem:[%s6997_s14] sm:$0xff] %vm4029_vm3, %v3997_v35  ;;  %4044 = vst.msk [vmem:[%s6997_s14 + $0x70] sm:$0xff] %vm4029_vm3, %v4011_v10  ;;  %v4000_v59 = vadd.f32 %v4459_v1, %v3854_v63  ;;  %v3849_v36 = vadd.f32 %v6988_v42, %v3848_v48  ;;  %v3919_v43 = vadd.f32 %v6988_v42, %v3918_v52  ;;  %v4474_v63 = vld [vmem:[%s4583_s22 + $0xb0] sm:$0xff]  ;;  %v4475_v1 = vld [vmem:[%s4583_s22 + $0x58] sm:$0xff] }
 0x5e1   : > { %v4014_v28 = vadd.f32 %v4460_v8, %v3924_v9 }
 0x5e2   : > { %4033 = vst.msk [vmem:[%s6997_s14 + $0x18] sm:$0xff] %vm4029_vm3, %v4000_v59  ;;  %v3999_v2 = vadd.f32 %v4461_v25, %v3849_v36  ;;  %v4013_v19 = vadd.f32 %v4462_v11, %v3919_v43  ;;  %v4476_v36 = vld [vmem:[%s4583_s22 + $0xc8] sm:$0xff] }
 0x5e3   : > { %4047 = vst.msk [vmem:[%s6997_s14 + $0x88] sm:$0xff] %vm4029_vm3, %v4014_v28 }
 0x5e4   : > { %4032 = vst.msk [vmem:[%s6997_s14 + $0x10] sm:$0xff] %vm4029_vm3, %v3999_v2  ;;  %4046 = vst.msk [vmem:[%s6997_s14 + $0x80] sm:$0xff] %vm4029_vm3, %v4013_v19  ;;  %v4229_v16 = vpop.f32.mrf.mxu0  ;;  %v4477_v2 = vld [vmem:[%s4583_s22 + $0x50] sm:$0xff]  ;;  %v4478_v19 = vld [vmem:[%s4583_s22 + $0xc0] sm:$0xff] }
 0x5e5   : > { %v3864_v6 = vadd.f32 %v4229_v16, %v6988_v42  ;;  %v4250_v17 = vpop.f32.mrf.mxu1 }
 0x5e6   : > { %v3934_v14 = vadd.f32 %v4250_v17, %v6988_v42  ;;  %v3858_v29 = vpop.f32.mrf.mxu0 }
 0x5e7   : > { %v4002_v26 = vadd.f32 %v4463_v58, %v3864_v6  ;;  %v3859_v32 = vadd.f32 %v6988_v42, %v3858_v29  ;;  %v3928_v60 = vpop.f32.mrf.mxu1 }
 0x5e8   : > { %v4016_v33 = vadd.f32 %v4464_v23, %v3934_v14  ;;  %v3929_v24 = vadd.f32 %v6988_v42, %v3928_v60  ;;  %v4232_v51 = vpop.f32.mrf.mxu0 }
 0x5e9   : > { %4035 = vst.msk [vmem:[%s6997_s14 + $0x28] sm:$0xff] %vm4029_vm3, %v4002_v26  ;;  %v4001_v20 = vadd.f32 %v4465_v30, %v3859_v32  ;;  %v3874_v13 = vadd.f32 %v4232_v51, %v6988_v42  ;;  %v4253_v31 = vpop.f32.mrf.mxu1  ;;  %v4479_v26 = vld [vmem:[%s4583_s22 + $0x68] sm:$0xff]  ;;  %v4481_v30 = vld [vmem:[%s4583_s22 + $0x60] sm:$0xff] }
 0x5ea   : > { %4049 = vst.msk [vmem:[%s6997_s14 + $0x98] sm:$0xff] %vm4029_vm3, %v4016_v33  ;;  %v4015_v62 = vadd.f32 %v4466_v45, %v3929_v24  ;;  %v3944_v0 = vadd.f32 %v4253_v31, %v6988_v42  ;;  %v3868_v3 = vpop.f32.mrf.mxu0  ;;  %v4480_v33 = vld [vmem:[%s4583_s22 + $0xd8] sm:$0xff]  ;;  %v4482_v31 = vld [vmem:[%s4583_s22 + $0xd0] sm:$0xff] }
 0x5eb   : > { %4034 = vst.msk [vmem:[%s6997_s14 + $0x20] sm:$0xff] %vm4029_vm3, %v4001_v20  ;;  %v4004_v46 = vadd.f32 %v4467_v44, %v3874_v13  ;;  %v3869_v50 = vadd.f32 %v6988_v42, %v3868_v3  ;;  %v3938_v55 = vpop.f32.mrf.mxu1  ;;  %v4483_v3 = vld [vmem:[%s4583_s22 + $0xe8] sm:$0xff] }
 0x5ec   : > { %4048 = vst.msk [vmem:[%s6997_s14 + $0x90] sm:$0xff] %vm4029_vm3, %v4015_v62  ;;  %v4018_v12 = vadd.f32 %v4468_v49, %v3944_v0  ;;  %v3939_v21 = vadd.f32 %v6988_v42, %v3938_v55  ;;  %v4484_v55 = vld [vmem:[%s4583_s22 + $0xe0] sm:$0xff] }
 0x5ed   : > { %4037 = vst.msk [vmem:[%s6997_s14 + $0x38] sm:$0xff] %vm4029_vm3, %v4004_v46  ;;  %v4003_v54 = vadd.f32 %v4469_v5, %v3869_v50  ;;  %v4485_v5 = vld [vmem:[%s4583_s22 + $0xf8] sm:$0xff] }
 0x5ee   : > { %4051 = vst.msk [vmem:[%s6997_s14 + $0xa8] sm:$0xff] %vm4029_vm3, %v4018_v12  ;;  %v4017_v38 = vadd.f32 %v4470_v53, %v3939_v21 }
 0x5ef   : > { %4036 = vst.msk [vmem:[%s6997_s14 + $0x30] sm:$0xff] %vm4029_vm3, %v4003_v54 }
 0x5f0   : > { %4050 = vst.msk [vmem:[%s6997_s14 + $0xa0] sm:$0xff] %vm4029_vm3, %v4017_v38  ;;  %v4235_v37 = vpop.f32.mrf.mxu0  ;;  %v4486_v38 = vld [vmem:[%s4583_s22 + $0xf0] sm:$0xff] }
 0x5f1   : > { %v3884_v39 = vadd.f32 %v4235_v37, %v6988_v42  ;;  %v4256_v57 = vpop.f32.mrf.mxu1 }
 0x5f2   : > { %v3954_v34 = vadd.f32 %v4256_v57, %v6988_v42  ;;  %v3878_v41 = vpop.f32.mrf.mxu0 }
 0x5f3   : > { %v4006_v61 = vadd.f32 %v4471_v22, %v3884_v39  ;;  %v3879_v7 = vadd.f32 %v6988_v42, %v3878_v41  ;;  %v3948_v56 = vpop.f32.mrf.mxu1 }
 0x5f4   : > { %v4020_v40 = vadd.f32 %v4472_v27, %v3954_v34  ;;  %v3949_v15 = vadd.f32 %v6988_v42, %v3948_v56  ;;  %v4238_v47 = vpop.f32.mrf.mxu0 }
 0x5f5   : > { %4039 = vst.msk [vmem:[%s6997_s14 + $0x48] sm:$0xff] %vm4029_vm3, %v4006_v61  ;;  %v4005_v35 = vadd.f32 %v4473_v18, %v3879_v7  ;;  %v3894_v4 = vadd.f32 %v4238_v47, %v6988_v42  ;;  %v4259_v10 = vpop.f32.mrf.mxu1 }
 0x5f6   : > { %4053 = vst.msk [vmem:[%s6997_s14 + $0xb8] sm:$0xff] %vm4029_vm3, %v4020_v40  ;;  %v4019_v9 = vadd.f32 %v4474_v63, %v3949_v15  ;;  %v3964_v48 = vadd.f32 %v4259_v10, %v6988_v42  ;;  %v3888_v52 = vpop.f32.mrf.mxu0 }
 0x5f7   : > { %4038 = vst.msk [vmem:[%s6997_s14 + $0x40] sm:$0xff] %vm4029_vm3, %v4005_v35  ;;  %v4008_v59 = vadd.f32 %v4475_v1, %v3894_v4  ;;  %v3889_v8 = vadd.f32 %v6988_v42, %v3888_v52  ;;  %v3958_v28 = vpop.f32.mrf.mxu1 }
 0x5f8   : > { %4052 = vst.msk [vmem:[%s6997_s14 + $0xb0] sm:$0xff] %vm4029_vm3, %v4019_v9  ;;  %v4022_v43 = vadd.f32 %v4476_v36, %v3964_v48  ;;  %v3959_v25 = vadd.f32 %v6988_v42, %v3958_v28 }
 0x5f9   : > { %4041 = vst.msk [vmem:[%s6997_s14 + $0x58] sm:$0xff] %vm4029_vm3, %v4008_v59  ;;  %v4007_v11 = vadd.f32 %v4477_v2, %v3889_v8 }
 0x5fa   : > { %4055 = vst.msk [vmem:[%s6997_s14 + $0xc8] sm:$0xff] %vm4029_vm3, %v4022_v43  ;;  %v4021_v16 = vadd.f32 %v4478_v19, %v3959_v25 }
 0x5fb   : > { %4040 = vst.msk [vmem:[%s6997_s14 + $0x50] sm:$0xff] %vm4029_vm3, %v4007_v11 }
 0x5fc   : > { %4054 = vst.msk [vmem:[%s6997_s14 + $0xc0] sm:$0xff] %vm4029_vm3, %v4021_v16  ;;  %v4241_v6 = vpop.f32.mrf.mxu0 }
 0x5fd   : > { %v3904_v17 = vadd.f32 %v4241_v6, %v6988_v42  ;;  %v4262_v14 = vpop.f32.mrf.mxu1 }
 0x5fe   : > { %v3974_v29 = vadd.f32 %v4262_v14, %v6988_v42  ;;  %v3898_v58 = vpop.f32.mrf.mxu0 }
 0x5ff   : > { %v4010_v32 = vadd.f32 %v4479_v26, %v3904_v17  ;;  %v3899_v60 = vadd.f32 %v6988_v42, %v3898_v58  ;;  %v3968_v23 = vpop.f32.mrf.mxu1 }
 0x600   : > { %v4024_v24 = vadd.f32 %v4480_v33, %v3974_v29  ;;  %v3969_v51 = vadd.f32 %v6988_v42, %v3968_v23 }
 0x601   : > { %4043 = vst.msk [vmem:[%s6997_s14 + $0x68] sm:$0xff] %vm4029_vm3, %v4010_v32  ;;  %v4009_v20 = vadd.f32 %v4481_v30, %v3899_v60  ;;  %v4265_v13 = vpop.f32.mrf.mxu1 }
 0x602   : > { %4057 = vst.msk [vmem:[%s6997_s14 + $0xd8] sm:$0xff] %vm4029_vm3, %v4024_v24  ;;  %v4023_v45 = vadd.f32 %v4482_v31, %v3969_v51  ;;  %v3984_v62 = vadd.f32 %v4265_v13, %v6988_v42 }
 0x603   : > { %4042 = vst.msk [vmem:[%s6997_s14 + $0x60] sm:$0xff] %vm4029_vm3, %v4009_v20  ;;  %v3978_v0 = vpop.f32.mrf.mxu1 }
 0x604   : > { %4056 = vst.msk [vmem:[%s6997_s14 + $0xd0] sm:$0xff] %vm4029_vm3, %v4023_v45  ;;  %v4026_v44 = vadd.f32 %v4483_v3, %v3984_v62  ;;  %v3979_v46 = vadd.f32 %v6988_v42, %v3978_v0 }
 0x605   : > { %v4268_v50 = vpop.f32.mrf.mxu1 }
 0x606   : > { %4059 = vst.msk [vmem:[%s6997_s14 + $0xe8] sm:$0xff] %vm4029_vm3, %v4026_v44  ;;  %v4025_v49 = vadd.f32 %v4484_v55, %v3979_v46  ;;  %v3994_v12 = vadd.f32 %v4268_v50, %v6988_v42 }
 0x607   : > { %v3988_v21 = vpop.f32.mrf.mxu1 }
 0x608   : > { %4058 = vst.msk [vmem:[%s6997_s14 + $0xe0] sm:$0xff] %vm4029_vm3, %v4025_v49  ;;  %v4028_v54 = vadd.f32 %v4485_v5, %v3994_v12  ;;  %v3989_v53 = vadd.f32 %v6988_v42, %v3988_v21 }
 0x60a   : > { %4061 = vst.msk [vmem:[%s6997_s14 + $0xf8] sm:$0xff] %vm4029_vm3, %v4028_v54  ;;  %v4027_v37 = vadd.f32 %v4486_v38, %v3989_v53 }
 0x60c   : > { %4060 = vst.msk [vmem:[%s6997_s14 + $0xf0] sm:$0xff] %vm4029_vm3, %v4027_v37 }
 0x60d PF: > { %s21_s17 = sadd.s32 1, %s4493_s17  }
 0x60e   : > { %p18_p4 = scmp.ge.s32.totalorder %s21_s17, 4  }
 0x610   :  { %20 = sbr.rel (!%p18_p4) target bundleno = 1 (0x1), region = 96 }

</bundles_post_ra>
